<compile_context>
chip_gen: v7x
topology: tpu7x:2x2x1
jax: 0.10.0
libtpu: 0.0.40
codegen_flags: <defaults>
</compile_context>

<pallas_src>
import jax
import jax.numpy as jnp
import numpy as np
from jax.experimental import pallas as pl
from jax.experimental.pallas import tpu as pltpu

OUT_HW = 178          # F.interpolate(..., 178, mode='bilinear')
CONV_OUT_CH = 8
CONV_K = 3
CONV_PAD = 2
_F32 = 4              # bytes


# --------------------------------------------------------------------------- host-side helpers
def _bilinear_matrix(out_size, in_size):
    # PyTorch F.interpolate(mode='bilinear', align_corners=False) weight matrix (float64).
    i = np.arange(out_size, dtype=np.float64)
    src = (i + 0.5) * (in_size / out_size) - 0.5
    src = np.maximum(src, 0.0)
    i0 = np.minimum(np.floor(src).astype(np.int64), in_size - 1)
    i1 = np.minimum(i0 + 1, in_size - 1)
    lam = src - i0
    m = np.zeros((out_size, in_size), dtype=np.float64)
    m[np.arange(out_size), i0] += 1.0 - lam
    m[np.arange(out_size), i1] += lam
    return m


def _round_up(x, m):
    return (x + m - 1) // m * m


def _vmem_budget_bytes():
    # Robust generation detection: read physical VMEM and take half as the scoped budget
    # (leaves headroom for compiler scratch / spills).  Fallback is the smallest per-core
    # VMEM of current generations (v7x: 64 MiB).
    try:
        cap = int(pltpu.get_tpu_info().vmem_capacity_bytes)
    except Exception:
        cap = 64 * 1024 * 1024
    return cap // 2


def _image_block_bytes(b, lp, lc):
    # Padding-aware estimate of the VMEM needed by one grid step of the image kernel.
    img_blk = b * _round_up(OUT_HW, 8) * _round_up(OUT_HW, 128) * _F32      # (B,184,256) f32
    xp_blk = _round_up(b, 8) * _round_up(lp, 128) * _F32
    ct_blk = _round_up(lc, 8) * _round_up(OUT_HW, 128) * _F32
    r_blk = _round_up(OUT_HW, 8) * 128 * _F32
    w_blk = 8 * 128 * _F32
    conv8 = b * CONV_OUT_CH * _round_up(lc, 128) * _F32                      # live value
    return 2 * (img_blk + xp_blk + ct_blk + r_blk + w_blk) + conv8           # 2x double-buffer


def _logits_block_bytes(b, lp, nc):
    xp_blk = _round_up(b, 8) * _round_up(lp, 128) * _F32
    out_blk = _round_up(b, 8) * _round_up(nc, 128) * _F32
    acc = _round_up(b, 8) * _round_up(lp, 128) * _F32
    return 2 * (xp_blk + out_blk) + acc


def _pick_batch_block(n, block_bytes_fn, budget, cap):
    # Largest multiple-of-8 block that fits 80% of the VMEM budget; prefer an even number of
    # grid steps (the single "parallel" axis is split across v7x's two TensorCores), then
    # fewer steps, then less host-side batch padding.
    n8 = _round_up(max(n, 1), 8)
    cands = [b for b in range(8, min(cap, n8) + 1, 8) if block_bytes_fn(b) <= 0.8 * budget]
    if not cands:
        cands = [8]

    def score(b):
        steps = pl.cdiv(n8, b)
        pad = steps * b - n
        return (int(steps % 2 == 1 and steps > 1), steps, pad)

    return min(cands, key=score)


# --------------------------------------------------------------------------- kernels
def _logits_kernel(xp_ref, coef_ref, head_ref, logits_ref):
    # xp_ref    : (B, L+4)       zero-padded signals (Conv1d padding=2 each side)
    # coef_ref  : (CONV_K+1, lc) rows 0..2 = weff[k]*csum, row 3 = beff*csum
    #             (conv channels collapsed with rsum = R.sum(0); width GAP folded via
    #              csum = C.sum(0); height GAP folded via rsum)
    # head_ref  : (2, NC)        row 0: fc_w.sum(axis=1)/(178*178), row 1: fc_b
    # logits_ref: (B, NC)
    lc = coef_ref.shape[1]
    xp = xp_ref[...]
    coef = coef_ref[...]
    acc = coef[CONV_K:CONV_K + 1, :] + coef[0:1, :] * xp[:, 0:lc]     # (B, lc)
    for k in range(1, CONV_K):                                        # static 3-tap unroll
        acc = acc + coef[k:k + 1, :] * xp[:, k:k + lc]
    s = jnp.sum(acc, axis=1, keepdims=True)                           # (B, 1) lane reduce
    logits_ref[...] = s * head_ref[0:1, :] + head_ref[1:2, :]


def _image_kernel(xp_ref, w_ref, r_ref, ct_ref, img_ref):
    # xp_ref : (B, L+4)           zero-padded signals
    # w_ref  : (8, CONV_K+1)      [conv taps | bias]
    # r_ref  : (178, 8)           height bilinear-interpolation matrix (shared)
    # ct_ref : (L+2, 178)         width bilinear-interpolation matrix, transposed (shared)
    # img_ref: (B, 178, 178)      conv + bilinear-resize image (fed 3x to base_model)
    lc = ct_ref.shape[0]
    bsz = xp_ref.shape[0]
    xp = xp_ref[...]
    w = w_ref[...]

    # 3-tap conv in 8-channel space: conv8[b,c,l] = sum_k w[c,k]*xp[b,l+k] + bias[c]
    conv8 = w[None, :, CONV_K:CONV_K + 1] + w[None, :, 0:1] * xp[:, None, 0:lc]
    for k in range(1, CONV_K):
        conv8 = conv8 + w[None, :, k:k + 1] * xp[:, None, k:k + lc]   # (B, 8, lc)

    ct = ct_ref[...]                                                  # stationary 2-D MXU RHS
    r = r_ref[...]
    for b in range(bsz):                                              # static unroll over block
        wide = jnp.dot(conv8[b], ct, preferred_element_type=jnp.float32)        # (8, 178)
        img_ref[b, :, :] = jnp.dot(r, wide, preferred_element_type=jnp.float32)  # (178, 178)


# --------------------------------------------------------------------------- wrappers
def cnn_one_layer_image(x, conv_w, conv_b, block_b=None):
    """Conv1d(1,8,3,pad=2) + unsqueeze + bilinear resize to (178,178). Returns (N,178,178)."""
    n, cin, l = x.shape
    assert cin == 1
    lc = l + 2 * CONV_PAD - (CONV_K - 1)                              # L + 2
    lp = l + 2 * CONV_PAD                                             # L + 4
    budget = _vmem_budget_bytes()
    b = block_b or _pick_batch_block(n, lambda bb: _image_block_bytes(bb, lp, lc), budget, cap=32)
    n_pad = _round_up(n, b)

    xp = jnp.pad(x[:, 0, :].astype(jnp.float32), ((0, n_pad - n), (CONV_PAD, CONV_PAD)))
    w = jnp.concatenate([conv_w.reshape(CONV_OUT_CH, CONV_K).astype(jnp.float32),
                         conv_b.reshape(CONV_OUT_CH, 1).astype(jnp.float32)], axis=1)
    r = jnp.asarray(_bilinear_matrix(OUT_HW, CONV_OUT_CH), dtype=jnp.float32)
    ct = jnp.asarray(_bilinear_matrix(OUT_HW, lc).T, dtype=jnp.float32)

    flops = n_pad * (2 * CONV_K * CONV_OUT_CH * lc
                     + 2 * CONV_OUT_CH * lc * OUT_HW
                     + 2 * OUT_HW * CONV_OUT_CH * OUT_HW)
    bytes_accessed = (n_pad * (lp + OUT_HW * OUT_HW) * _F32
                      + int(w.size + r.size + ct.size) * _F32)

    img = pl.pallas_call(
        _image_kernel,
        out_shape=jax.ShapeDtypeStruct((n_pad, OUT_HW, OUT_HW), jnp.float32),
        grid_spec=pltpu.PrefetchScalarGridSpec(
            num_scalar_prefetch=0,
            grid=(n_pad // b,),
            in_specs=[
                pl.BlockSpec((b, lp), lambda i: (i, 0)),
                pl.BlockSpec((CONV_OUT_CH, CONV_K + 1), lambda i: (0, 0)),
                pl.BlockSpec((OUT_HW, CONV_OUT_CH), lambda i: (0, 0)),
                pl.BlockSpec((lc, OUT_HW), lambda i: (0, 0)),
            ],
            out_specs=pl.BlockSpec((b, OUT_HW, OUT_HW), lambda i: (i, 0, 0)),
        ),
        compiler_params=pltpu.CompilerParams(
            dimension_semantics=("parallel",), vmem_limit_bytes=int(budget)),
        cost_estimate=pl.CostEstimate(
            flops=int(flops), transcendentals=0, bytes_accessed=int(bytes_accessed)),
    )(xp, w, r, ct)
    return img[:n]


def cnn_one_layer_logits(x, conv_w, conv_b, fc_w, fc_b, block_b=None):
    """Logits-only fused path: never materializes the (N,178,178) image."""
    n, cin, l = x.shape
    assert cin == 1
    lc = l + 2 * CONV_PAD - (CONV_K - 1)
    lp = l + 2 * CONV_PAD
    num_classes = fc_w.shape[0]
    budget = _vmem_budget_bytes()
    b = block_b or _pick_batch_block(
        n, lambda bb: _logits_block_bytes(bb, lp, num_classes), budget, cap=128)
    n_pad = _round_up(n, b)

    xp = jnp.pad(x[:, 0, :].astype(jnp.float32), ((0, n_pad - n), (CONV_PAD, CONV_PAD)))

    r = _bilinear_matrix(OUT_HW, CONV_OUT_CH)                          # (178, 8) float64
    c = _bilinear_matrix(OUT_HW, lc)                                   # (178, lc) float64
    rsum = jnp.asarray(r.sum(axis=0), dtype=jnp.float32)               # (8,)
    csum = jnp.asarray(c.sum(axis=0), dtype=jnp.float32)               # (lc,)
    w2 = conv_w.reshape(CONV_OUT_CH, CONV_K).astype(jnp.float32)
    weff = rsum @ w2                                                   # (CONV_K,)
    beff = jnp.dot(rsum, conv_b.reshape(CONV_OUT_CH).astype(jnp.float32))
    coef = jnp.concatenate(
        [weff[:, None] * csum[None, :], (beff * csum)[None, :]], axis=0)   # (CONV_K+1, lc)
    head = jnp.stack(
        [jnp.sum(fc_w.astype(jnp.float32), axis=1) / float(OUT_HW * OUT_HW),
         fc_b.astype(jnp.float32)], axis=0)                                 # (2, NC)

    flops = n_pad * (2 * (CONV_K + 1) * lc + 2 * num_classes)
    bytes_accessed = (n_pad * (lp + num_classes) * _F32
                      + int(coef.size + head.size) * _F32)

    logits = pl.pallas_call(
        _logits_kernel,
        out_shape=jax.ShapeDtypeStruct((n_pad, num_classes), jnp.float32),
        grid_spec=pltpu.PrefetchScalarGridSpec(
            num_scalar_prefetch=0,
            grid=(n_pad // b,),
            in_specs=[
                pl.BlockSpec((b, lp), lambda i: (i, 0)),
                pl.BlockSpec((CONV_K + 1, lc), lambda i: (0, 0)),
                pl.BlockSpec((2, num_classes), lambda i: (0, 0)),
            ],
            out_specs=pl.BlockSpec((b, num_classes), lambda i: (i, 0)),
        ),
        compiler_params=pltpu.CompilerParams(
            dimension_semantics=("parallel",), vmem_limit_bytes=int(budget)),
        cost_estimate=pl.CostEstimate(
            flops=int(flops), transcendentals=0, bytes_accessed=int(bytes_accessed)),
    )(xp, coef, head)
    return logits[:n]


def cnn_one_layer_forward(x, params):
    # TODO(synk): the real `base_model` (external torchvision resnet/vgg/densenet backbone) is
    # not reproducible here; only its replaced last layer (global-avg-pool + Linear(3, classes))
    # is modelled and fused.  The resized image for a real backbone is available from
    # cnn_one_layer_image().
    return cnn_one_layer_logits(
        x, params["conv_w"], params["conv_b"], params["fc_w"], params["fc_b"])


# --------------------------------------------------------------------------- pure-JAX reference
def reference_forward(x, params):
    w = params["conv_w"].reshape(CONV_OUT_CH, CONV_K)
    bias = params["conv_b"]
    n, _, l = x.shape
    lc = l + 2
    xp = jnp.pad(x[:, 0, :], ((0, 0), (CONV_PAD, CONV_PAD)))
    conv = jnp.stack(
        [sum(w[c, k] * xp[:, k:k + lc] for k in range(CONV_K)) + bias[c]
         for c in range(CONV_OUT_CH)],
        axis=1)                                                       # (N, 8, L+2)
    r = jnp.asarray(_bilinear_matrix(OUT_HW, CONV_OUT_CH), jnp.float32)
    cmat = jnp.asarray(_bilinear_matrix(OUT_HW, lc), jnp.float32)
    img = jnp.einsum("hi,niw,jw->nhj", r, conv, cmat,
                     precision=jax.lax.Precision.HIGHEST)             # (N, 178, 178)
    rgb = jnp.concatenate([img[:, None]] * 3, axis=1)                 # torch.cat((out,)*3, 1)
    feat = jnp.mean(rgb, axis=(2, 3))                                 # (N, 3)
    logits = feat @ params["fc_w"].T + params["fc_b"]
    return img, logits


if __name__ == "__main__":
    key = jax.random.PRNGKey(0)
    n, l, num_classes = 16, 64, 5
    kx, kw, kb, kfw, kfb = jax.random.split(key, 5)
    x = jax.random.normal(kx, (n, 1, l), dtype=jnp.float32)
    params = {
        "conv_w": 0.2 * jax.random.normal(kw, (CONV_OUT_CH, 1, CONV_K), dtype=jnp.float32),
        "conv_b": 0.1 * jax.random.normal(kb, (CONV_OUT_CH,), dtype=jnp.float32),
        "fc_w": 0.3 * jax.random.normal(kfw, (num_classes, 3), dtype=jnp.float32),
        "fc_b": 0.1 * jax.random.normal(kfb, (num_classes,), dtype=jnp.float32),
    }

    # Image-producing kernel (what a real backbone would consume).
    img = cnn_one_layer_image(x, params["conv_w"], params["conv_b"])
    img = jax.block_until_ready(img)

    # Logits-only fused path (module forward with the stand-in classifier).
    logits = cnn_one_layer_forward(x, params)
    logits = jax.block_until_ready(logits)

    ref_img, ref_logits = reference_forward(x, params)
    ref_img = jax.block_until_ready(ref_img)
    ref_logits = jax.block_until_ready(ref_logits)

    assert logits.shape == (n, num_classes)
    np.testing.assert_allclose(np.asarray(img), np.asarray(ref_img), rtol=5e-3, atol=5e-3)
    np.testing.assert_allclose(np.asarray(logits), np.asarray(ref_logits), rtol=5e-3, atol=5e-3)
    print("KERNEL_OK")
</pallas_src>

<mosaic_0001>
module attributes {stable_mosaic.version = 11 : i64} {
  func.func @_image_kernel(%arg0: i32, %arg1: memref<16x68xf32, #tpu.memory_space<vmem>>, %arg2: memref<8x4xf32, #tpu.memory_space<vmem>>, %arg3: memref<178x8xf32, #tpu.memory_space<vmem>>, %arg4: memref<66x178xf32, #tpu.memory_space<vmem>>, %arg5: memref<16x178x178xf32, #tpu.memory_space<vmem>>) attributes {dimension_semantics = [#tpu.dimension_semantics<parallel>], iteration_bounds = array<i64: 1>, scalar_prefetch = 0 : i64, scratch_operands = 0 : i64, tpu.core_type = #tpu.core_type<tc>, window_params = [{transform_indices = @transform_0, window_bounds = array<i64: 16, 68>}, {pipeline_mode = #tpu.pipeline_mode<synchronous>, transform_indices = @transform_1, window_bounds = array<i64: 8, 4>}, {pipeline_mode = #tpu.pipeline_mode<synchronous>, transform_indices = @transform_2, window_bounds = array<i64: 178, 8>}, {pipeline_mode = #tpu.pipeline_mode<synchronous>, transform_indices = @transform_3, window_bounds = array<i64: 66, 178>}, {transform_indices = @transform_4, window_bounds = array<i64: 16, 178, 178>}]} {
    %c0 = arith.constant 0 : index
    %c0_0 = arith.constant 0 : index
    %0 = vector.load %arg1[%c0, %c0_0] : memref<16x68xf32, #tpu.memory_space<vmem>>, vector<16x68xf32>
    %c0_1 = arith.constant 0 : index
    %c0_2 = arith.constant 0 : index
    %1 = vector.load %arg2[%c0_1, %c0_2] : memref<8x4xf32, #tpu.memory_space<vmem>>, vector<8x4xf32>
    %2 = vector.extract_strided_slice %1 {offsets = [0, 3], sizes = [8, 1], strides = [1, 1]} : vector<8x4xf32> to vector<8x1xf32>
    %3 = vector.shape_cast %2 : vector<8x1xf32> to vector<1x8x1xf32>
    %4 = vector.extract_strided_slice %1 {offsets = [0, 0], sizes = [8, 1], strides = [1, 1]} : vector<8x4xf32> to vector<8x1xf32>
    %5 = vector.shape_cast %4 : vector<8x1xf32> to vector<1x8x1xf32>
    %6 = vector.extract_strided_slice %0 {offsets = [0, 0], sizes = [16, 66], strides = [1, 1]} : vector<16x68xf32> to vector<16x66xf32>
    %7 = vector.shape_cast %6 : vector<16x66xf32> to vector<16x1x66xf32>
    %8 = vector.broadcast %5 : vector<1x8x1xf32> to vector<16x8x66xf32>
    %9 = vector.broadcast %7 : vector<16x1x66xf32> to vector<16x8x66xf32>
    %10 = arith.mulf %8, %9 : vector<16x8x66xf32>
    %11 = vector.broadcast %3 : vector<1x8x1xf32> to vector<16x8x66xf32>
    %12 = arith.addf %11, %10 : vector<16x8x66xf32>
    %13 = vector.extract_strided_slice %1 {offsets = [0, 1], sizes = [8, 1], strides = [1, 1]} : vector<8x4xf32> to vector<8x1xf32>
    %14 = vector.shape_cast %13 : vector<8x1xf32> to vector<1x8x1xf32>
    %15 = vector.extract_strided_slice %0 {offsets = [0, 1], sizes = [16, 66], strides = [1, 1]} : vector<16x68xf32> to vector<16x66xf32>
    %16 = vector.shape_cast %15 : vector<16x66xf32> to vector<16x1x66xf32>
    %17 = vector.broadcast %14 : vector<1x8x1xf32> to vector<16x8x66xf32>
    %18 = vector.broadcast %16 : vector<16x1x66xf32> to vector<16x8x66xf32>
    %19 = arith.mulf %17, %18 : vector<16x8x66xf32>
    %20 = arith.addf %12, %19 : vector<16x8x66xf32>
    %21 = vector.extract_strided_slice %1 {offsets = [0, 2], sizes = [8, 1], strides = [1, 1]} : vector<8x4xf32> to vector<8x1xf32>
    %22 = vector.shape_cast %21 : vector<8x1xf32> to vector<1x8x1xf32>
    %23 = vector.extract_strided_slice %0 {offsets = [0, 2], sizes = [16, 66], strides = [1, 1]} : vector<16x68xf32> to vector<16x66xf32>
    %24 = vector.shape_cast %23 : vector<16x66xf32> to vector<16x1x66xf32>
    %25 = vector.broadcast %22 : vector<1x8x1xf32> to vector<16x8x66xf32>
    %26 = vector.broadcast %24 : vector<16x1x66xf32> to vector<16x8x66xf32>
    %27 = arith.mulf %25, %26 : vector<16x8x66xf32>
    %28 = arith.addf %20, %27 : vector<16x8x66xf32>
    %c0_3 = arith.constant 0 : index
    %c0_4 = arith.constant 0 : index
    %29 = vector.load %arg4[%c0_3, %c0_4] : memref<66x178xf32, #tpu.memory_space<vmem>>, vector<66x178xf32>
    %c0_5 = arith.constant 0 : index
    %c0_6 = arith.constant 0 : index
    %30 = vector.load %arg3[%c0_5, %c0_6] : memref<178x8xf32, #tpu.memory_space<vmem>>, vector<178x8xf32>
    %31 = vector.extract_strided_slice %28 {offsets = [0, 0, 0], sizes = [1, 8, 66], strides = [1, 1, 1]} : vector<16x8x66xf32> to vector<1x8x66xf32>
    %32 = vector.shape_cast %31 : vector<1x8x66xf32> to vector<8x66xf32>
    %cst = arith.constant dense<0.000000e+00> : vector<8x178xf32>
    %33 = tpu.matmul %32, %29, %cst {dimension_numbers = #tpu.dot_dimension_numbers<[1], [0], [0], [1], [0, 0, 1, 1], [], []>} : vector<8x66xf32>, vector<66x178xf32>, vector<8x178xf32> -> vector<8x178xf32>
    %cst_7 = arith.constant dense<0.000000e+00> : vector<178x178xf32>
    %34 = tpu.matmul %30, %33, %cst_7 {dimension_numbers = #tpu.dot_dimension_numbers<[1], [0], [0], [1], [0, 0, 1, 1], [], []>} : vector<178x8xf32>, vector<8x178xf32>, vector<178x178xf32> -> vector<178x178xf32>
    %c0_8 = arith.constant 0 : index
    %c0_9 = arith.constant 0 : index
    %c0_10 = arith.constant 0 : index
    %35 = vector.load %arg5[%c0_8, %c0_9, %c0_10] : memref<16x178x178xf32, #tpu.memory_space<vmem>>, vector<1x178x178xf32>
    %36 = vector.shape_cast %35 : vector<1x178x178xf32> to vector<178x178xf32>
    %37 = vector.shape_cast %34 : vector<178x178xf32> to vector<1x178x178xf32>
    tpu.vector_store %arg5[%c0_8, %c0_9, %c0_10], %37 {strides = array<i32>} : memref<16x178x178xf32, #tpu.memory_space<vmem>>, vector<1x178x178xf32>,
    %38 = vector.extract_strided_slice %28 {offsets = [1, 0, 0], sizes = [1, 8, 66], strides = [1, 1, 1]} : vector<16x8x66xf32> to vector<1x8x66xf32>
    %39 = vector.shape_cast %38 : vector<1x8x66xf32> to vector<8x66xf32>
    %cst_11 = arith.constant dense<0.000000e+00> : vector<8x178xf32>
    %40 = tpu.matmul %39, %29, %cst_11 {dimension_numbers = #tpu.dot_dimension_numbers<[1], [0], [0], [1], [0, 0, 1, 1], [], []>} : vector<8x66xf32>, vector<66x178xf32>, vector<8x178xf32> -> vector<8x178xf32>
    %cst_12 = arith.constant dense<0.000000e+00> : vector<178x178xf32>
    %41 = tpu.matmul %30, %40, %cst_12 {dimension_numbers = #tpu.dot_dimension_numbers<[1], [0], [0], [1], [0, 0, 1, 1], [], []>} : vector<178x8xf32>, vector<8x178xf32>, vector<178x178xf32> -> vector<178x178xf32>
    %c1 = arith.constant 1 : index
    %c0_13 = arith.constant 0 : index
    %c0_14 = arith.constant 0 : index
    %42 = vector.load %arg5[%c1, %c0_13, %c0_14] : memref<16x178x178xf32, #tpu.memory_space<vmem>>, vector<1x178x178xf32>
    %43 = vector.shape_cast %42 : vector<1x178x178xf32> to vector<178x178xf32>
    %44 = vector.shape_cast %41 : vector<178x178xf32> to vector<1x178x178xf32>
    tpu.vector_store %arg5[%c1, %c0_13, %c0_14], %44 {strides = array<i32>} : memref<16x178x178xf32, #tpu.memory_space<vmem>>, vector<1x178x178xf32>,
    %45 = vector.extract_strided_slice %28 {offsets = [2, 0, 0], sizes = [1, 8, 66], strides = [1, 1, 1]} : vector<16x8x66xf32> to vector<1x8x66xf32>
    %46 = vector.shape_cast %45 : vector<1x8x66xf32> to vector<8x66xf32>
    %cst_15 = arith.constant dense<0.000000e+00> : vector<8x178xf32>
    %47 = tpu.matmul %46, %29, %cst_15 {dimension_numbers = #tpu.dot_dimension_numbers<[1], [0], [0], [1], [0, 0, 1, 1], [], []>} : vector<8x66xf32>, vector<66x178xf32>, vector<8x178xf32> -> vector<8x178xf32>
    %cst_16 = arith.constant dense<0.000000e+00> : vector<178x178xf32>
    %48 = tpu.matmul %30, %47, %cst_16 {dimension_numbers = #tpu.dot_dimension_numbers<[1], [0], [0], [1], [0, 0, 1, 1], [], []>} : vector<178x8xf32>, vector<8x178xf32>, vector<178x178xf32> -> vector<178x178xf32>
    %c2 = arith.constant 2 : index
    %c0_17 = arith.constant 0 : index
    %c0_18 = arith.constant 0 : index
    %49 = vector.load %arg5[%c2, %c0_17, %c0_18] : memref<16x178x178xf32, #tpu.memory_space<vmem>>, vector<1x178x178xf32>
    %50 = vector.shape_cast %49 : vector<1x178x178xf32> to vector<178x178xf32>
    %51 = vector.shape_cast %48 : vector<178x178xf32> to vector<1x178x178xf32>
    tpu.vector_store %arg5[%c2, %c0_17, %c0_18], %51 {strides = array<i32>} : memref<16x178x178xf32, #tpu.memory_space<vmem>>, vector<1x178x178xf32>,
    %52 = vector.extract_strided_slice %28 {offsets = [3, 0, 0], sizes = [1, 8, 66], strides = [1, 1, 1]} : vector<16x8x66xf32> to vector<1x8x66xf32>
    %53 = vector.shape_cast %52 : vector<1x8x66xf32> to vector<8x66xf32>
    %cst_19 = arith.constant dense<0.000000e+00> : vector<8x178xf32>
    %54 = tpu.matmul %53, %29, %cst_19 {dimension_numbers = #tpu.dot_dimension_numbers<[1], [0], [0], [1], [0, 0, 1, 1], [], []>} : vector<8x66xf32>, vector<66x178xf32>, vector<8x178xf32> -> vector<8x178xf32>
    %cst_20 = arith.constant dense<0.000000e+00> : vector<178x178xf32>
    %55 = tpu.matmul %30, %54, %cst_20 {dimension_numbers = #tpu.dot_dimension_numbers<[1], [0], [0], [1], [0, 0, 1, 1], [], []>} : vector<178x8xf32>, vector<8x178xf32>, vector<178x178xf32> -> vector<178x178xf32>
    %c3 = arith.constant 3 : index
    %c0_21 = arith.constant 0 : index
    %c0_22 = arith.constant 0 : index
    %56 = vector.load %arg5[%c3, %c0_21, %c0_22] : memref<16x178x178xf32, #tpu.memory_space<vmem>>, vector<1x178x178xf32>
    %57 = vector.shape_cast %56 : vector<1x178x178xf32> to vector<178x178xf32>
    %58 = vector.shape_cast %55 : vector<178x178xf32> to vector<1x178x178xf32>
    tpu.vector_store %arg5[%c3, %c0_21, %c0_22], %58 {strides = array<i32>} : memref<16x178x178xf32, #tpu.memory_space<vmem>>, vector<1x178x178xf32>,
    %59 = vector.extract_strided_slice %28 {offsets = [4, 0, 0], sizes = [1, 8, 66], strides = [1, 1, 1]} : vector<16x8x66xf32> to vector<1x8x66xf32>
    %60 = vector.shape_cast %59 : vector<1x8x66xf32> to vector<8x66xf32>
    %cst_23 = arith.constant dense<0.000000e+00> : vector<8x178xf32>
    %61 = tpu.matmul %60, %29, %cst_23 {dimension_numbers = #tpu.dot_dimension_numbers<[1], [0], [0], [1], [0, 0, 1, 1], [], []>} : vector<8x66xf32>, vector<66x178xf32>, vector<8x178xf32> -> vector<8x178xf32>
    %cst_24 = arith.constant dense<0.000000e+00> : vector<178x178xf32>
    %62 = tpu.matmul %30, %61, %cst_24 {dimension_numbers = #tpu.dot_dimension_numbers<[1], [0], [0], [1], [0, 0, 1, 1], [], []>} : vector<178x8xf32>, vector<8x178xf32>, vector<178x178xf32> -> vector<178x178xf32>
    %c4 = arith.constant 4 : index
    %c0_25 = arith.constant 0 : index
    %c0_26 = arith.constant 0 : index
    %63 = vector.load %arg5[%c4, %c0_25, %c0_26] : memref<16x178x178xf32, #tpu.memory_space<vmem>>, vector<1x178x178xf32>
    %64 = vector.shape_cast %63 : vector<1x178x178xf32> to vector<178x178xf32>
    %65 = vector.shape_cast %62 : vector<178x178xf32> to vector<1x178x178xf32>
    tpu.vector_store %arg5[%c4, %c0_25, %c0_26], %65 {strides = array<i32>} : memref<16x178x178xf32, #tpu.memory_space<vmem>>, vector<1x178x178xf32>,
    %66 = vector.extract_strided_slice %28 {offsets = [5, 0, 0], sizes = [1, 8, 66], strides = [1, 1, 1]} : vector<16x8x66xf32> to vector<1x8x66xf32>
    %67 = vector.shape_cast %66 : vector<1x8x66xf32> to vector<8x66xf32>
    %cst_27 = arith.constant dense<0.000000e+00> : vector<8x178xf32>
    %68 = tpu.matmul %67, %29, %cst_27 {dimension_numbers = #tpu.dot_dimension_numbers<[1], [0], [0], [1], [0, 0, 1, 1], [], []>} : vector<8x66xf32>, vector<66x178xf32>, vector<8x178xf32> -> vector<8x178xf32>
    %cst_28 = arith.constant dense<0.000000e+00> : vector<178x178xf32>
    %69 = tpu.matmul %30, %68, %cst_28 {dimension_numbers = #tpu.dot_dimension_numbers<[1], [0], [0], [1], [0, 0, 1, 1], [], []>} : vector<178x8xf32>, vector<8x178xf32>, vector<178x178xf32> -> vector<178x178xf32>
    %c5 = arith.constant 5 : index
    %c0_29 = arith.constant 0 : index
    %c0_30 = arith.constant 0 : index
    %70 = vector.load %arg5[%c5, %c0_29, %c0_30] : memref<16x178x178xf32, #tpu.memory_space<vmem>>, vector<1x178x178xf32>
    %71 = vector.shape_cast %70 : vector<1x178x178xf32> to vector<178x178xf32>
    %72 = vector.shape_cast %69 : vector<178x178xf32> to vector<1x178x178xf32>
    tpu.vector_store %arg5[%c5, %c0_29, %c0_30], %72 {strides = array<i32>} : memref<16x178x178xf32, #tpu.memory_space<vmem>>, vector<1x178x178xf32>,
    %73 = vector.extract_strided_slice %28 {offsets = [6, 0, 0], sizes = [1, 8, 66], strides = [1, 1, 1]} : vector<16x8x66xf32> to vector<1x8x66xf32>
    %74 = vector.shape_cast %73 : vector<1x8x66xf32> to vector<8x66xf32>
    %cst_31 = arith.constant dense<0.000000e+00> : vector<8x178xf32>
    %75 = tpu.matmul %74, %29, %cst_31 {dimension_numbers = #tpu.dot_dimension_numbers<[1], [0], [0], [1], [0, 0, 1, 1], [], []>} : vector<8x66xf32>, vector<66x178xf32>, vector<8x178xf32> -> vector<8x178xf32>
    %cst_32 = arith.constant dense<0.000000e+00> : vector<178x178xf32>
    %76 = tpu.matmul %30, %75, %cst_32 {dimension_numbers = #tpu.dot_dimension_numbers<[1], [0], [0], [1], [0, 0, 1, 1], [], []>} : vector<178x8xf32>, vector<8x178xf32>, vector<178x178xf32> -> vector<178x178xf32>
    %c6 = arith.constant 6 : index
    %c0_33 = arith.constant 0 : index
    %c0_34 = arith.constant 0 : index
    %77 = vector.load %arg5[%c6, %c0_33, %c0_34] : memref<16x178x178xf32, #tpu.memory_space<vmem>>, vector<1x178x178xf32>
    %78 = vector.shape_cast %77 : vector<1x178x178xf32> to vector<178x178xf32>
    %79 = vector.shape_cast %76 : vector<178x178xf32> to vector<1x178x178xf32>
    tpu.vector_store %arg5[%c6, %c0_33, %c0_34], %79 {strides = array<i32>} : memref<16x178x178xf32, #tpu.memory_space<vmem>>, vector<1x178x178xf32>,
    %80 = vector.extract_strided_slice %28 {offsets = [7, 0, 0], sizes = [1, 8, 66], strides = [1, 1, 1]} : vector<16x8x66xf32> to vector<1x8x66xf32>
    %81 = vector.shape_cast %80 : vector<1x8x66xf32> to vector<8x66xf32>
    %cst_35 = arith.constant dense<0.000000e+00> : vector<8x178xf32>
    %82 = tpu.matmul %81, %29, %cst_35 {dimension_numbers = #tpu.dot_dimension_numbers<[1], [0], [0], [1], [0, 0, 1, 1], [], []>} : vector<8x66xf32>, vector<66x178xf32>, vector<8x178xf32> -> vector<8x178xf32>
    %cst_36 = arith.constant dense<0.000000e+00> : vector<178x178xf32>
    %83 = tpu.matmul %30, %82, %cst_36 {dimension_numbers = #tpu.dot_dimension_numbers<[1], [0], [0], [1], [0, 0, 1, 1], [], []>} : vector<178x8xf32>, vector<8x178xf32>, vector<178x178xf32> -> vector<178x178xf32>
    %c7 = arith.constant 7 : index
    %c0_37 = arith.constant 0 : index
    %c0_38 = arith.constant 0 : index
    %84 = vector.load %arg5[%c7, %c0_37, %c0_38] : memref<16x178x178xf32, #tpu.memory_space<vmem>>, vector<1x178x178xf32>
    %85 = vector.shape_cast %84 : vector<1x178x178xf32> to vector<178x178xf32>
    %86 = vector.shape_cast %83 : vector<178x178xf32> to vector<1x178x178xf32>
    tpu.vector_store %arg5[%c7, %c0_37, %c0_38], %86 {strides = array<i32>} : memref<16x178x178xf32, #tpu.memory_space<vmem>>, vector<1x178x178xf32>,
    %87 = vector.extract_strided_slice %28 {offsets = [8, 0, 0], sizes = [1, 8, 66], strides = [1, 1, 1]} : vector<16x8x66xf32> to vector<1x8x66xf32>
    %88 = vector.shape_cast %87 : vector<1x8x66xf32> to vector<8x66xf32>
    %cst_39 = arith.constant dense<0.000000e+00> : vector<8x178xf32>
    %89 = tpu.matmul %88, %29, %cst_39 {dimension_numbers = #tpu.dot_dimension_numbers<[1], [0], [0], [1], [0, 0, 1, 1], [], []>} : vector<8x66xf32>, vector<66x178xf32>, vector<8x178xf32> -> vector<8x178xf32>
    %cst_40 = arith.constant dense<0.000000e+00> : vector<178x178xf32>
    %90 = tpu.matmul %30, %89, %cst_40 {dimension_numbers = #tpu.dot_dimension_numbers<[1], [0], [0], [1], [0, 0, 1, 1], [], []>} : vector<178x8xf32>, vector<8x178xf32>, vector<178x178xf32> -> vector<178x178xf32>
    %c8 = arith.constant 8 : index
    %c0_41 = arith.constant 0 : index
    %c0_42 = arith.constant 0 : index
    %91 = vector.load %arg5[%c8, %c0_41, %c0_42] : memref<16x178x178xf32, #tpu.memory_space<vmem>>, vector<1x178x178xf32>
    %92 = vector.shape_cast %91 : vector<1x178x178xf32> to vector<178x178xf32>
    %93 = vector.shape_cast %90 : vector<178x178xf32> to vector<1x178x178xf32>
    tpu.vector_store %arg5[%c8, %c0_41, %c0_42], %93 {strides = array<i32>} : memref<16x178x178xf32, #tpu.memory_space<vmem>>, vector<1x178x178xf32>,
    %94 = vector.extract_strided_slice %28 {offsets = [9, 0, 0], sizes = [1, 8, 66], strides = [1, 1, 1]} : vector<16x8x66xf32> to vector<1x8x66xf32>
    %95 = vector.shape_cast %94 : vector<1x8x66xf32> to vector<8x66xf32>
    %cst_43 = arith.constant dense<0.000000e+00> : vector<8x178xf32>
    %96 = tpu.matmul %95, %29, %cst_43 {dimension_numbers = #tpu.dot_dimension_numbers<[1], [0], [0], [1], [0, 0, 1, 1], [], []>} : vector<8x66xf32>, vector<66x178xf32>, vector<8x178xf32> -> vector<8x178xf32>
    %cst_44 = arith.constant dense<0.000000e+00> : vector<178x178xf32>
    %97 = tpu.matmul %30, %96, %cst_44 {dimension_numbers = #tpu.dot_dimension_numbers<[1], [0], [0], [1], [0, 0, 1, 1], [], []>} : vector<178x8xf32>, vector<8x178xf32>, vector<178x178xf32> -> vector<178x178xf32>
    %c9 = arith.constant 9 : index
    %c0_45 = arith.constant 0 : index
    %c0_46 = arith.constant 0 : index
    %98 = vector.load %arg5[%c9, %c0_45, %c0_46] : memref<16x178x178xf32, #tpu.memory_space<vmem>>, vector<1x178x178xf32>
    %99 = vector.shape_cast %98 : vector<1x178x178xf32> to vector<178x178xf32>
    %100 = vector.shape_cast %97 : vector<178x178xf32> to vector<1x178x178xf32>
    tpu.vector_store %arg5[%c9, %c0_45, %c0_46], %100 {strides = array<i32>} : memref<16x178x178xf32, #tpu.memory_space<vmem>>, vector<1x178x178xf32>,
    %101 = vector.extract_strided_slice %28 {offsets = [10, 0, 0], sizes = [1, 8, 66], strides = [1, 1, 1]} : vector<16x8x66xf32> to vector<1x8x66xf32>
    %102 = vector.shape_cast %101 : vector<1x8x66xf32> to vector<8x66xf32>
    %cst_47 = arith.constant dense<0.000000e+00> : vector<8x178xf32>
    %103 = tpu.matmul %102, %29, %cst_47 {dimension_numbers = #tpu.dot_dimension_numbers<[1], [0], [0], [1], [0, 0, 1, 1], [], []>} : vector<8x66xf32>, vector<66x178xf32>, vector<8x178xf32> -> vector<8x178xf32>
    %cst_48 = arith.constant dense<0.000000e+00> : vector<178x178xf32>
    %104 = tpu.matmul %30, %103, %cst_48 {dimension_numbers = #tpu.dot_dimension_numbers<[1], [0], [0], [1], [0, 0, 1, 1], [], []>} : vector<178x8xf32>, vector<8x178xf32>, vector<178x178xf32> -> vector<178x178xf32>
    %c10 = arith.constant 10 : index
    %c0_49 = arith.constant 0 : index
    %c0_50 = arith.constant 0 : index
    %105 = vector.load %arg5[%c10, %c0_49, %c0_50] : memref<16x178x178xf32, #tpu.memory_space<vmem>>, vector<1x178x178xf32>
    %106 = vector.shape_cast %105 : vector<1x178x178xf32> to vector<178x178xf32>
    %107 = vector.shape_cast %104 : vector<178x178xf32> to vector<1x178x178xf32>
    tpu.vector_store %arg5[%c10, %c0_49, %c0_50], %107 {strides = array<i32>} : memref<16x178x178xf32, #tpu.memory_space<vmem>>, vector<1x178x178xf32>,
    %108 = vector.extract_strided_slice %28 {offsets = [11, 0, 0], sizes = [1, 8, 66], strides = [1, 1, 1]} : vector<16x8x66xf32> to vector<1x8x66xf32>
    %109 = vector.shape_cast %108 : vector<1x8x66xf32> to vector<8x66xf32>
    %cst_51 = arith.constant dense<0.000000e+00> : vector<8x178xf32>
    %110 = tpu.matmul %109, %29, %cst_51 {dimension_numbers = #tpu.dot_dimension_numbers<[1], [0], [0], [1], [0, 0, 1, 1], [], []>} : vector<8x66xf32>, vector<66x178xf32>, vector<8x178xf32> -> vector<8x178xf32>
    %cst_52 = arith.constant dense<0.000000e+00> : vector<178x178xf32>
    %111 = tpu.matmul %30, %110, %cst_52 {dimension_numbers = #tpu.dot_dimension_numbers<[1], [0], [0], [1], [0, 0, 1, 1], [], []>} : vector<178x8xf32>, vector<8x178xf32>, vector<178x178xf32> -> vector<178x178xf32>
    %c11 = arith.constant 11 : index
    %c0_53 = arith.constant 0 : index
    %c0_54 = arith.constant 0 : index
    %112 = vector.load %arg5[%c11, %c0_53, %c0_54] : memref<16x178x178xf32, #tpu.memory_space<vmem>>, vector<1x178x178xf32>
    %113 = vector.shape_cast %112 : vector<1x178x178xf32> to vector<178x178xf32>
    %114 = vector.shape_cast %111 : vector<178x178xf32> to vector<1x178x178xf32>
    tpu.vector_store %arg5[%c11, %c0_53, %c0_54], %114 {strides = array<i32>} : memref<16x178x178xf32, #tpu.memory_space<vmem>>, vector<1x178x178xf32>,
    %115 = vector.extract_strided_slice %28 {offsets = [12, 0, 0], sizes = [1, 8, 66], strides = [1, 1, 1]} : vector<16x8x66xf32> to vector<1x8x66xf32>
    %116 = vector.shape_cast %115 : vector<1x8x66xf32> to vector<8x66xf32>
    %cst_55 = arith.constant dense<0.000000e+00> : vector<8x178xf32>
    %117 = tpu.matmul %116, %29, %cst_55 {dimension_numbers = #tpu.dot_dimension_numbers<[1], [0], [0], [1], [0, 0, 1, 1], [], []>} : vector<8x66xf32>, vector<66x178xf32>, vector<8x178xf32> -> vector<8x178xf32>
    %cst_56 = arith.constant dense<0.000000e+00> : vector<178x178xf32>
    %118 = tpu.matmul %30, %117, %cst_56 {dimension_numbers = #tpu.dot_dimension_numbers<[1], [0], [0], [1], [0, 0, 1, 1], [], []>} : vector<178x8xf32>, vector<8x178xf32>, vector<178x178xf32> -> vector<178x178xf32>
    %c12 = arith.constant 12 : index
    %c0_57 = arith.constant 0 : index
    %c0_58 = arith.constant 0 : index
    %119 = vector.load %arg5[%c12, %c0_57, %c0_58] : memref<16x178x178xf32, #tpu.memory_space<vmem>>, vector<1x178x178xf32>
    %120 = vector.shape_cast %119 : vector<1x178x178xf32> to vector<178x178xf32>
    %121 = vector.shape_cast %118 : vector<178x178xf32> to vector<1x178x178xf32>
    tpu.vector_store %arg5[%c12, %c0_57, %c0_58], %121 {strides = array<i32>} : memref<16x178x178xf32, #tpu.memory_space<vmem>>, vector<1x178x178xf32>,
    %122 = vector.extract_strided_slice %28 {offsets = [13, 0, 0], sizes = [1, 8, 66], strides = [1, 1, 1]} : vector<16x8x66xf32> to vector<1x8x66xf32>
    %123 = vector.shape_cast %122 : vector<1x8x66xf32> to vector<8x66xf32>
    %cst_59 = arith.constant dense<0.000000e+00> : vector<8x178xf32>
    %124 = tpu.matmul %123, %29, %cst_59 {dimension_numbers = #tpu.dot_dimension_numbers<[1], [0], [0], [1], [0, 0, 1, 1], [], []>} : vector<8x66xf32>, vector<66x178xf32>, vector<8x178xf32> -> vector<8x178xf32>
    %cst_60 = arith.constant dense<0.000000e+00> : vector<178x178xf32>
    %125 = tpu.matmul %30, %124, %cst_60 {dimension_numbers = #tpu.dot_dimension_numbers<[1], [0], [0], [1], [0, 0, 1, 1], [], []>} : vector<178x8xf32>, vector<8x178xf32>, vector<178x178xf32> -> vector<178x178xf32>
    %c13 = arith.constant 13 : index
    %c0_61 = arith.constant 0 : index
    %c0_62 = arith.constant 0 : index
    %126 = vector.load %arg5[%c13, %c0_61, %c0_62] : memref<16x178x178xf32, #tpu.memory_space<vmem>>, vector<1x178x178xf32>
    %127 = vector.shape_cast %126 : vector<1x178x178xf32> to vector<178x178xf32>
    %128 = vector.shape_cast %125 : vector<178x178xf32> to vector<1x178x178xf32>
    tpu.vector_store %arg5[%c13, %c0_61, %c0_62], %128 {strides = array<i32>} : memref<16x178x178xf32, #tpu.memory_space<vmem>>, vector<1x178x178xf32>,
    %129 = vector.extract_strided_slice %28 {offsets = [14, 0, 0], sizes = [1, 8, 66], strides = [1, 1, 1]} : vector<16x8x66xf32> to vector<1x8x66xf32>
    %130 = vector.shape_cast %129 : vector<1x8x66xf32> to vector<8x66xf32>
    %cst_63 = arith.constant dense<0.000000e+00> : vector<8x178xf32>
    %131 = tpu.matmul %130, %29, %cst_63 {dimension_numbers = #tpu.dot_dimension_numbers<[1], [0], [0], [1], [0, 0, 1, 1], [], []>} : vector<8x66xf32>, vector<66x178xf32>, vector<8x178xf32> -> vector<8x178xf32>
    %cst_64 = arith.constant dense<0.000000e+00> : vector<178x178xf32>
    %132 = tpu.matmul %30, %131, %cst_64 {dimension_numbers = #tpu.dot_dimension_numbers<[1], [0], [0], [1], [0, 0, 1, 1], [], []>} : vector<178x8xf32>, vector<8x178xf32>, vector<178x178xf32> -> vector<178x178xf32>
    %c14 = arith.constant 14 : index
    %c0_65 = arith.constant 0 : index
    %c0_66 = arith.constant 0 : index
    %133 = vector.load %arg5[%c14, %c0_65, %c0_66] : memref<16x178x178xf32, #tpu.memory_space<vmem>>, vector<1x178x178xf32>
    %134 = vector.shape_cast %133 : vector<1x178x178xf32> to vector<178x178xf32>
    %135 = vector.shape_cast %132 : vector<178x178xf32> to vector<1x178x178xf32>
    tpu.vector_store %arg5[%c14, %c0_65, %c0_66], %135 {strides = array<i32>} : memref<16x178x178xf32, #tpu.memory_space<vmem>>, vector<1x178x178xf32>,
    %136 = vector.extract_strided_slice %28 {offsets = [15, 0, 0], sizes = [1, 8, 66], strides = [1, 1, 1]} : vector<16x8x66xf32> to vector<1x8x66xf32>
    %137 = vector.shape_cast %136 : vector<1x8x66xf32> to vector<8x66xf32>
    %cst_67 = arith.constant dense<0.000000e+00> : vector<8x178xf32>
    %138 = tpu.matmul %137, %29, %cst_67 {dimension_numbers = #tpu.dot_dimension_numbers<[1], [0], [0], [1], [0, 0, 1, 1], [], []>} : vector<8x66xf32>, vector<66x178xf32>, vector<8x178xf32> -> vector<8x178xf32>
    %cst_68 = arith.constant dense<0.000000e+00> : vector<178x178xf32>
    %139 = tpu.matmul %30, %138, %cst_68 {dimension_numbers = #tpu.dot_dimension_numbers<[1], [0], [0], [1], [0, 0, 1, 1], [], []>} : vector<178x8xf32>, vector<8x178xf32>, vector<178x178xf32> -> vector<178x178xf32>
    %c15 = arith.constant 15 : index
    %c0_69 = arith.constant 0 : index
    %c0_70 = arith.constant 0 : index
    %140 = vector.load %arg5[%c15, %c0_69, %c0_70] : memref<16x178x178xf32, #tpu.memory_space<vmem>>, vector<1x178x178xf32>
    %141 = vector.shape_cast %140 : vector<1x178x178xf32> to vector<178x178xf32>
    %142 = vector.shape_cast %139 : vector<178x178xf32> to vector<1x178x178xf32>
    tpu.vector_store %arg5[%c15, %c0_69, %c0_70], %142 {strides = array<i32>} : memref<16x178x178xf32, #tpu.memory_space<vmem>>, vector<1x178x178xf32>,
    return
  }
  func.func @transform_0(%arg0: i32) -> (i32, i32) {
    %c0_i32 = arith.constant 0 : i32
    %c0_i32_0 = arith.constant 0 : i32
    return %arg0, %c0_i32 : i32, i32
  }
  func.func @transform_1(%arg0: i32) -> (i32, i32) {
    %c0_i32 = arith.constant 0 : i32
    %c0_i32_0 = arith.constant 0 : i32
    %c0_i32_1 = arith.constant 0 : i32
    return %c0_i32, %c0_i32_0 : i32, i32
  }
  func.func @transform_2(%arg0: i32) -> (i32, i32) {
    %c0_i32 = arith.constant 0 : i32
    %c0_i32_0 = arith.constant 0 : i32
    %c0_i32_1 = arith.constant 0 : i32
    return %c0_i32, %c0_i32_0 : i32, i32
  }
  func.func @transform_3(%arg0: i32) -> (i32, i32) {
    %c0_i32 = arith.constant 0 : i32
    %c0_i32_0 = arith.constant 0 : i32
    %c0_i32_1 = arith.constant 0 : i32
    return %c0_i32, %c0_i32_0 : i32, i32
  }
  func.func @transform_4(%arg0: i32) -> (i32, i32, i32) {
    %c0_i32 = arith.constant 0 : i32
    %c0_i32_0 = arith.constant 0 : i32
    %c0_i32_1 = arith.constant 0 : i32
    return %arg0, %c0_i32, %c0_i32_0 : i32, i32, i32
  }
}

</mosaic_0001>

<bundles_post_ra>
// kernel: tpu_custom_call.1
= control target key start
LH: loop header
LB: loop body
LE: loop exit
PB: predicated region body
PF: predicated region fallthrough
CT: control target
= control target key end

     0   :  { %9 = vsyncpa [#allocation3], 0  ;;  %s11920_s0 = inlined_call_operand.hbm [shape: f32[16,68], index: 0, kind: input, shape index: {}]   ;;  %s11921_s1 = inlined_call_operand.vmem [shape: f32[8,4], index: 1, kind: input, shape index: {}]   ;;  %s11922_s2 = inlined_call_operand.vmem [shape: f32[178,8], index: 2, kind: input, shape index: {}]   ;;  %s11923_s3 = inlined_call_operand.hbm [shape: f32[66,178], index: 3, kind: input, shape index: {}]   ;;  %s11924_s4 = inlined_call_operand.vmem [shape: f32[16,178,178], index: 4, kind: output, shape index: {}]  }
   0x1   :  { %10 = vsyncpa [#allocation5], 0  ;;  %s7284_s15 = smov [#allocation2]   ;;  %s7236_s19 = scalar_lea.hbm %s11920_s0, 256 }
   0x2   :  { %s16_s16 = sshll.u32 %s7284_s15, 4  ;;  %p7237_p0 = scmp.ne.s32.totalorder %s11920_s0, %s7236_s19  ;;  %s17_s16 = int_to_ptr.vmem [resolvable:$true] %s16_s16 }
   0x3   :  { %p7240_p1 = scmp.lt.u32.totalorder %s7236_s19, %s11920_s0 }
   0x5   :  { %p7242_p2 = pnand %p7240_p1, %p7237_p0 }
   0x7   :  { %7245 = shalt.err (!%p7242_p2)
}
   0x8   :  { %s7246_s24 = scalar_lea.vmem %s17_s16, 256  ;;  %p7251_p4 = scmp.lt.s32.totalorder %s17_s16, %s17_s16 }
   0x9   :  { %p7247_p3 = scmp.ne.s32.totalorder %s17_s16, %s7246_s24  ;;  %p7252_p5 = scmp.lt.s32.totalorder %s7246_s24, %s7246_s24 }
   0xb   :  { %p7253_p6 = por %p7252_p5, %p7251_p4 }
   0xd   :  { %p7254_p7 = pnand %p7253_p6, %p7247_p3 }
   0xf   :  { %7257 = shalt.err (!%p7254_p7)
}
  0x10   :  { %s7285_s25 = smov 128   ;;  %s7286_s26 = smov 8  }
  0x11   :  { %22 = dma.hbm_to_vmem [thread:$0]  %s11920_s0, 256, %s17_s16, [#allocation3], %s7285_s25, %s7285_s25, %s7286_s26  }
  0x12   :  { %s7287_s29 = smov [#allocation4]   ;;  %s7258_s7 = scalar_lea.hbm %s11923_s3, 2304 }
  0x13   :  { %s32_s30 = sshll.u32 %s7287_s29, 4  ;;  %p7259_p8 = scmp.ne.s32.totalorder %s11923_s3, %s7258_s7  ;;  %s33_s30 = int_to_ptr.vmem [resolvable:$true] %s32_s30 }
  0x14   :  { %p7262_p9 = scmp.lt.u32.totalorder %s7258_s7, %s11923_s3 }
  0x16   :  { %p7264_p10 = pnand %p7262_p9, %p7259_p8 }
  0x18   :  { %7267 = shalt.err (!%p7264_p10)
}
  0x19   :  { %s7268_s12 = scalar_lea.vmem %s33_s30, 2304  ;;  %p7273_p12 = scmp.lt.s32.totalorder %s33_s30, %s33_s30 }
  0x1a   :  { %p7269_p11 = scmp.ne.s32.totalorder %s33_s30, %s7268_s12  ;;  %p7274_p13 = scmp.lt.s32.totalorder %s7268_s12, %s7268_s12 }
  0x1c   :  { %p7275_p0 = por %p7274_p13, %p7273_p12 }
  0x1e   :  { %p7276_p1 = pnand %p7275_p0, %p7269_p11 }
  0x20   :  { %7279 = shalt.err (!%p7276_p1)
}
  0x21   :  { %s7288_s0 = smov 256   ;;  %s7289_s13 = smov 16  }
  0x22   :  { %38 = dma.hbm_to_vmem [thread:$0]  %s11923_s3, 2304, %s33_s30, [#allocation5], %s7288_s0, %s7288_s0, %s7289_s13  }
  0x23   :  { %7280 = dma.done.wait [#allocation3], 256  }
  0x24   :  { %7281 = vsyncadd [#allocation3], 4294967040 }
  0x25   :  { %7282 = dma.done.wait [#allocation5], 2304  }
  0x26   :  { %7283 = vsyncadd [#allocation5], 4294964992  ;;  %v7290_v0 = vmov 1   ;;  %v7291_v1 = vmov 0   ;;  %v47_v2 = vld [vmem:[%s11921_s1] sm:$0xff]  ;;  %v7292_v3 = vmov 2   ;;  %v54_v25 = vlaneseq }
  0x27   :  { %7155 = vset.pattern.permute.xlu0 %v7290_v0  ;;  %7157 = vset.pattern.permute.xlu1 %v7291_v1  ;;  %v7293_v4 = vmov 3   ;;  %v470_v5 = vld [vmem:[#allocation4 + $0x8] sm:$0xff]  ;;  %v472_v6 = vld [vmem:[#allocation4 + $0x18] sm:$0xff]  ;;  %v469_v7 = vld [vmem:[#allocation4] sm:$0xff]  ;;  %v7294_v23 = vmov 1966171168  }
  0x28   :  { %270 = vperm.xlu0 %7155, %v47_v2   ;;  %150 = vperm.xlu1 %7157, %v47_v2   ;;  %v7350_v8 = vpack.c.bf16 %v472_v6, %v470_v5  ;;  %v471_v9 = vld [vmem:[#allocation4 + $0x10] sm:$0xff]  ;;  %v474_v10 = vld [vmem:[#allocation4 + $0x28] sm:$0xff]  ;;  %v476_v11 = vld [vmem:[#allocation4 + $0x38] sm:$0xff]  ;;  %v52_v24 = vunpack.c.l.s4 %v7294_v23  ;;  %v55_v27 = vshrl.u32 %v54_v25, 7  ;;  %vm514_vm0 = vcmask 1041408   ;;  %s7296_s1 = smov 127  }
  0x29   :  { %v7352_v12 = vpack.c.bf16 %v471_v9, %v469_v7  ;;  %v7354_v13 = vpack.c.bf16 %v476_v11, %v474_v10  ;;  %v473_v14 = vld [vmem:[#allocation4 + $0x20] sm:$0xff]  ;;  %v475_v15 = vld [vmem:[#allocation4 + $0x30] sm:$0xff]  ;;  %v478_v16 = vld [vmem:[#allocation4 + $0x48] sm:$0xff]  ;;  %v7295_v50 = vmov 0.0   ;;  %s7297_s3 = smov 126   ;;  %vm510_vm1 = vcmask 539648  }
  0x2a   :  { %6886 = vmatprep.subr.bf16.mxu1 %v7350_v8  ;;  %6902 = vmatprep.subr.bf16.mxu0 %v7350_v8  ;;  %v480_v17 = vld [vmem:[#allocation4 + $0x58] sm:$0xff]  ;;  %v7360_v18 = vpack.c.bf16 %v475_v15, %v473_v14  ;;  %v477_v20 = vld [vmem:[#allocation4 + $0x40] sm:$0xff]  ;;  %v479_v21 = vld [vmem:[#allocation4 + $0x50] sm:$0xff]  ;;  %v53_v26 = vunpack.c.0.s8 %v52_v24  ;;  %v7378_v40 = vsub.s32 0, %v55_v27  ;;  %vm592_vm2 = vcmask 64512  }
  0x2b   :  { %6888 = vmatpush1.bf16.msra.mxu1 %v7352_v12  ;;  %6904 = vmatpush1.bf16.msra.mxu0 %v7352_v12  ;;  %v7364_v19 = vpack.c.bf16 %v480_v17, %v478_v16  ;;  %v7368_v22 = vpack.c.bf16 %v479_v21, %v477_v20  ;;  %v45_v29 = vld [vmem:[#allocation2] sm:$0xff]  ;;  %v482_v32 = vld [vmem:[#allocation4 + $0x68] sm:$0xff]  ;;  %v484_v33 = vld [vmem:[#allocation4 + $0x78] sm:$0xff]  ;;  %vm866_vm3 = vcmask 408576   ;;  %vm911_vm4 = vcmask 402432  }
  0x2c   :  { %7156 = vset.pattern.permute.xlu0 %v7292_v3  ;;  %7158 = vset.pattern.permute.xlu1 %v7293_v4  ;;  %v56_v28 = vsub.s32 %v53_v26, %v55_v27  ;;  %v50_v31 = vcombine.high %v45_v29, %v45_v29  ;;  %v481_v34 = vld [vmem:[#allocation4 + $0x60] sm:$0xff]  ;;  %v46_v36 = vld [vmem:[#allocation2 + $0x8] sm:$0xff]  ;;  %v7374_v37 = vpack.c.bf16 %v484_v33, %v482_v32  ;;  %v483_v38 = vld [vmem:[#allocation4 + $0x70] sm:$0xff] }
  0x2d   :  { %370 = vperm.xlu0 %7156, %v47_v2   ;;  %250 = vperm.xlu1 %7158, %v47_v2   ;;  %v7376_v39 = vpack.c.bf16 %v483_v38, %v481_v34  ;;  %v99_v42 = vcombine.high %v46_v36, %v46_v36  ;;  %v7384_v45 = vld [vmem:[#allocation4 + $0x88] sm:$0x3]  ;;  %v7386_v46 = vld [vmem:[#allocation4 + $0x80] sm:$0x3] }
  0x2e   :  { %6890 = vmatprep.subr.bf16.mxu1 %v7354_v13  ;;  %6906 = vmatprep.subr.bf16.mxu0 %v7354_v13  ;;  %v57_v30 = vrot.slane %v45_v29, %v56_v28  ;;  %v64_v41 = vrot.slane %v50_v31, %v56_v28  ;;  %v106_v47 = vrot.slane %v46_v36, %v56_v28 }
  0x2f   :  { %6892 = vmatpush1.bf16.msra.mxu1 %v7360_v18  ;;  %6908 = vmatpush1.bf16.msra.mxu0 %v7360_v18  ;;  %v113_v52 = vrot.slane %v99_v42, %v56_v28 }
  0x30   :  { %6894 = vmatprep.subr.bf16.mxu1 %v7364_v19  ;;  %6910 = vmatprep.subr.bf16.mxu0 %v7364_v19  ;;  %v65_v35 = vcombine.high %v57_v30, %v57_v30  ;;  %v73_v43 = vrot.slane %v57_v30, %v56_v28  ;;  %v66_v51 = vcombine.high %v64_v41, %v64_v41 }
  0x31   :  { %585 = vmatprep.mubr.f32.mxu1 %v7295_v50  ;;  %980 = vmatprep.mubr.f32.mxu0 %v7295_v50  ;;  %v80_v55 = vrot.slane %v64_v41, %v56_v28  ;;  %v114_v56 = vcombine.high %v106_v47, %v106_v47  ;;  %v122_v60 = vrot.slane %v106_v47, %v56_v28 }
  0x32   :  { %v87_v44 = vrot.slane %v65_v35, %v56_v28  ;;  %v7393_v48 = vrot.slane %v73_v43, %v7378_v40  ;;  %v95_v53 = vcombine.high %v73_v43, %v73_v43  ;;  %v94_v61 = vrot.slane %v66_v51, %v56_v28 }
  0x33   :  { %6896 = vmatpush1.bf16.msra.mxu1 %v7368_v22  ;;  %6912 = vmatpush1.bf16.msra.mxu0 %v7368_v22  ;;  %v115_v62 = vcombine.high %v113_v52, %v113_v52  ;;  %v96_v0 = vcombine.high %v80_v55, %v80_v55  ;;  %v136_v1 = vrot.slane %v114_v56, %v56_v28 }
  0x34   :  { %6898 = vmatprep.subr.bf16.mxu1 %v7374_v37  ;;  %6914 = vmatprep.subr.bf16.mxu0 %v7374_v37  ;;  %v7396_v49 = vrot.slane %v87_v44, %v7378_v40  ;;  %v97_v59 = vcombine.high %v87_v44, %v87_v44  ;;  %v164_v63 = vrot.slane %v95_v53, %v7378_v40 }
  0x35   :  { %v144_v5 = vcombine.high %v122_v60, %v122_v60  ;;  %v129_v6 = vrot.slane %v113_v52, %v56_v28  ;;  %v98_v11 = vcombine.high %v94_v61, %v94_v61  ;;  %v143_v14 = vrot.slane %v115_v62, %v56_v28 }
  0x36   :  { %v168_v4 = vrot.slane %v97_v59, %v7378_v40  ;;  %v188_v15 = vrot.slane %v122_v60, %v7378_v40  ;;  %v172_v16 = vrot.slane %v80_v55, %v7378_v40  ;;  %v192_v17 = vrot.slane %v136_v1, %v7378_v40 }
  0x37   :  { %6900 = vmatpush1.bf16.msra.mxu1 %v7376_v39  ;;  %6916 = vmatpush1.bf16.msra.mxu0 %v7376_v39  ;;  %v146_v20 = vcombine.high %v136_v1, %v136_v1  ;;  %v176_v21 = vrot.slane %v94_v61, %v7378_v40  ;;  %v180_v23 = vrot.slane %v96_v0, %v7378_v40 }
  0x38   :  { %5779 = vmatprep.subr.msk.mxu1 %vm514_vm0, %v7384_v45  ;;  %5805 = vmatprep.subr.msk.mxu0 %vm514_vm0, %v7384_v45  ;;  %v196_v24 = vrot.slane %v144_v5, %v7378_v40  ;;  %v145_v25 = vcombine.high %v129_v6, %v129_v6  ;;  %v184_v28 = vrot.slane %v98_v11, %v7378_v40 }
  0x39   :  { %v147_v29 = vcombine.high %v143_v14, %v143_v14  ;;  %v200_v38 = vrot.slane %v146_v20, %v7378_v40  ;;  %v204_v41 = vrot.slane %v129_v6, %v7378_v40  ;;  %v208_v42 = vrot.slane %v143_v14, %v7378_v40 }
  0x3a   :  { %v212_v43 = vrot.slane %v145_v25, %v7378_v40 }
  0x3b   :  { %5780 = vmatpush1.msk.msra.mxu1 %vm514_vm0, %v7386_v46  ;;  %5806 = vmatpush1.msk.msra.mxu0 %vm514_vm0, %v7386_v46  ;;  %v216_v51 = vrot.slane %v147_v29, %v7378_v40 }
  0xa7   :  { %v7404_v54 = vpop.permute.xlu0 %270  ;;  %v7413_v2 = vpop.permute.xlu1 %150 }
  0xa8   :  { %v273_v57 = vmul.f32 %v7404_v54, %v7393_v48  ;;  %v274_v58 = vmul.f32 %v7404_v54, %v7396_v49  ;;  %v7419_v7 = vmul.f32 %v164_v63, %v7413_v2  ;;  %v275_v26 = vmul.f32 %v7404_v54, %v164_v63 }
  0xa9   :  { %v276_v27 = vmul.f32 %v7404_v54, %v168_v4  ;;  %v7437_v30 = vmul.f32 %v168_v4, %v7413_v2  ;;  %v7440_v31 = vmul.f32 %v172_v16, %v7413_v2  ;;  %v7443_v32 = vmul.f32 %v176_v21, %v7413_v2 }
  0xaa   :  { %305 = vrot.lane.b32.xlu1 %v273_v57, %s7296_s1  ;;  %307 = vrot.lane.b32.xlu0 %v274_v58, %s7296_s1  ;;  %v7446_v33 = vmul.f32 %v180_v23, %v7413_v2  ;;  %v7451_v34 = vmul.f32 %v184_v28, %v7413_v2  ;;  %v7454_v35 = vmul.f32 %v188_v15, %v7413_v2 }
  0xab   :  { %v7457_v36 = vmul.f32 %v192_v17, %v7413_v2  ;;  %v7467_v52 = vmul.f32 %v196_v24, %v7413_v2  ;;  %v7470_v53 = vmul.f32 %v200_v38, %v7413_v2  ;;  %v7473_v55 = vmul.f32 %v204_v41, %v7413_v2 }
  0xac   :  { %v7415_v3 = vpop.permute.xlu0 %370  ;;  %v7476_v56 = vmul.f32 %v208_v42, %v7413_v2  ;;  %v7479_v57 = vmul.f32 %v212_v43, %v7413_v2  ;;  %v7484_v40 = vmul.f32 %v216_v51, %v7413_v2  ;;  %v277_v58 = vmul.f32 %v7404_v54, %v172_v16 }
  0xad   :  { %v373_v9 = vmul.f32 %v7415_v3, %v7393_v48  ;;  %v374_v10 = vmul.f32 %v7415_v3, %v7396_v49  ;;  %v375_v44 = vmul.f32 %v7415_v3, %v164_v63  ;;  %v376_v47 = vmul.f32 %v7415_v3, %v168_v4 }
  0xae   :  { %v278_v59 = vmul.f32 %v7404_v54, %v176_v21  ;;  %v377_v60 = vmul.f32 %v7415_v3, %v172_v16  ;;  %v378_v61 = vmul.f32 %v7415_v3, %v176_v21  ;;  %v279_v62 = vmul.f32 %v7404_v54, %v180_v23 }
  0xaf   :  { %405 = vrot.lane.b32.xlu1 %v373_v9, %s7297_s3  ;;  %407 = vrot.lane.b32.xlu0 %v374_v10, %s7297_s3  ;;  %v280_v63 = vmul.f32 %v7404_v54, %v184_v28  ;;  %v379_v0 = vmul.f32 %v7415_v3, %v180_v23  ;;  %v380_v1 = vmul.f32 %v7415_v3, %v184_v28 }
  0xb0   :  { %v281_v4 = vmul.f32 %v7404_v54, %v188_v15  ;;  %v282_v5 = vmul.f32 %v7404_v54, %v192_v17  ;;  %v381_v6 = vmul.f32 %v7415_v3, %v188_v15  ;;  %v382_v9 = vmul.f32 %v7415_v3, %v192_v17 }
  0xb1   :  { %v283_v10 = vmul.f32 %v7404_v54, %v196_v24  ;;  %v284_v11 = vmul.f32 %v7404_v54, %v200_v38  ;;  %v383_v14 = vmul.f32 %v7415_v3, %v196_v24  ;;  %v384_v16 = vmul.f32 %v7415_v3, %v200_v38 }
  0xb2   :  { %v285_v15 = vmul.f32 %v7404_v54, %v204_v41  ;;  %v286_v17 = vmul.f32 %v7404_v54, %v208_v42  ;;  %v385_v20 = vmul.f32 %v7415_v3, %v204_v41  ;;  %v386_v21 = vmul.f32 %v7415_v3, %v208_v42 }
  0xb3   :  { %309 = vrot.lane.b32.xlu1 %v275_v26, %s7296_s1  ;;  %311 = vrot.lane.b32.xlu0 %v276_v27, %s7296_s1  ;;  %v287_v23 = vmul.f32 %v7404_v54, %v212_v43  ;;  %v288_v24 = vmul.f32 %v7404_v54, %v216_v51  ;;  %v387_v25 = vmul.f32 %v7415_v3, %v212_v43  ;;  %v7534_v27 = vpop.permute.xlu1 %250 }
  0xb4   :  { %v388_v26 = vmul.f32 %v7415_v3, %v216_v51  ;;  %v233_v28 = vmul.f32 %v7393_v48, %v7413_v2  ;;  %v234_v54 = vmul.f32 %v7396_v49, %v7413_v2 }
  0xb6   :  { %v253_v41 = vadd.f32 %v7534_v27, %v233_v28  ;;  %v254_v42 = vadd.f32 %v7534_v27, %v234_v54  ;;  %v7815_v28 = vld [vmem:[%s11922_s2 + $0xb0] sm:$0x3]  ;;  %v255_v54 = vadd.f32 %v7534_v27, %v7419_v7 }
  0xb7   :  { %409 = vrot.lane.b32.xlu1 %v375_v44, %s7297_s3  ;;  %411 = vrot.lane.b32.xlu0 %v376_v47, %s7297_s3 }
  0xbb   :  { %313 = vrot.lane.b32.xlu1 %v277_v58, %s7296_s1  ;;  %315 = vrot.lane.b32.xlu0 %v278_v59, %s7296_s1 }
  0xbf   :  { %413 = vrot.lane.b32.xlu1 %v377_v60, %s7297_s3  ;;  %415 = vrot.lane.b32.xlu0 %v378_v61, %s7297_s3  ;;  %v7549_v60 = vld [vmem:[%s11922_s2] sm:$0xff]  ;;  %v7560_v61 = vld [vmem:[%s11922_s2 + $0x8] sm:$0xff] }
  0xc3   :  { %317 = vrot.lane.b32.xlu1 %v279_v62, %s7296_s1  ;;  %319 = vrot.lane.b32.xlu0 %v280_v63, %s7296_s1  ;;  %v7575_v62 = vld [vmem:[%s11922_s2 + $0x10] sm:$0xff]  ;;  %v7590_v63 = vld [vmem:[%s11922_s2 + $0x18] sm:$0xff] }
  0xc7   :  { %417 = vrot.lane.b32.xlu1 %v379_v0, %s7297_s3  ;;  %419 = vrot.lane.b32.xlu0 %v380_v1, %s7297_s3  ;;  %v7605_v0 = vld [vmem:[%s11922_s2 + $0x20] sm:$0xff]  ;;  %v7620_v1 = vld [vmem:[%s11922_s2 + $0x28] sm:$0xff] }
  0xcb   :  { %321 = vrot.lane.b32.xlu1 %v281_v4, %s7296_s1  ;;  %323 = vrot.lane.b32.xlu0 %v282_v5, %s7296_s1  ;;  %v7661_v4 = vld [vmem:[%s11922_s2 + $0x40] sm:$0xff]  ;;  %v7672_v5 = vld [vmem:[%s11922_s2 + $0x48] sm:$0xff] }
  0xcf   :  { %421 = vrot.lane.b32.xlu1 %v381_v6, %s7297_s3  ;;  %423 = vrot.lane.b32.xlu0 %v382_v9, %s7297_s3  ;;  %v7683_v6 = vld [vmem:[%s11922_s2 + $0x50] sm:$0xff]  ;;  %v7694_v9 = vld [vmem:[%s11922_s2 + $0x58] sm:$0xff] }
  0xd3   :  { %325 = vrot.lane.b32.xlu1 %v283_v10, %s7296_s1  ;;  %327 = vrot.lane.b32.xlu0 %v284_v11, %s7296_s1  ;;  %v7705_v10 = vld [vmem:[%s11922_s2 + $0x60] sm:$0xff]  ;;  %v7716_v11 = vld [vmem:[%s11922_s2 + $0x68] sm:$0xff] }
  0xd7   :  { %425 = vrot.lane.b32.xlu1 %v383_v14, %s7297_s3  ;;  %427 = vrot.lane.b32.xlu0 %v384_v16, %s7297_s3  ;;  %v7727_v14 = vld [vmem:[%s11922_s2 + $0x70] sm:$0xff]  ;;  %v7738_v16 = vld [vmem:[%s11922_s2 + $0x78] sm:$0xff] }
  0xdb   :  { %329 = vrot.lane.b32.xlu1 %v285_v15, %s7296_s1  ;;  %331 = vrot.lane.b32.xlu0 %v286_v17, %s7296_s1  ;;  %v7749_v15 = vld [vmem:[%s11922_s2 + $0x80] sm:$0xff]  ;;  %v7760_v17 = vld [vmem:[%s11922_s2 + $0x88] sm:$0xff] }
  0xdf   :  { %429 = vrot.lane.b32.xlu1 %v385_v20, %s7297_s3  ;;  %431 = vrot.lane.b32.xlu0 %v386_v21, %s7297_s3  ;;  %v7771_v20 = vld [vmem:[%s11922_s2 + $0x90] sm:$0xff]  ;;  %v7782_v21 = vld [vmem:[%s11922_s2 + $0x98] sm:$0xff] }
  0xe3   :  { %333 = vrot.lane.b32.xlu1 %v287_v23, %s7296_s1  ;;  %335 = vrot.lane.b32.xlu0 %v288_v24, %s7296_s1  ;;  %v7793_v23 = vld [vmem:[%s11922_s2 + $0xa0] sm:$0xff] }
  0xe7   :  { %433 = vrot.lane.b32.xlu1 %v387_v25, %s7297_s3  ;;  %435 = vrot.lane.b32.xlu0 %v388_v26, %s7297_s3  ;;  %v7804_v26 = vld [vmem:[%s11922_s2 + $0xa8] sm:$0xff] }
 0x11c   :  { %v306_v29 = vpop.permute.xlu1 %305  ;;  %v308_v38 = vpop.permute.xlu0 %307 }
 0x11d   :  { %v353_v43 = vadd.f32 %v306_v29, %v253_v41  ;;  %v354_v3 = vadd.f32 %v308_v38, %v254_v42  ;;  %v256_v29 = vadd.f32 %v7534_v27, %v7437_v30 }
 0x121   :  { %v406_v44 = vpop.permute.xlu1 %405  ;;  %v408_v47 = vpop.permute.xlu0 %407 }
 0x122   :  { %v453_v51 = vadd.f32 %v406_v44, %v353_v43  ;;  %v454_v58 = vadd.f32 %v408_v47, %v354_v3 }
 0x124   :  { %5781 = vmatmul.mubr.msk.f32.vlgmr.msra.gmra.mrb[0].mxu1 %vm510_vm1, %v453_v51  ;;  %5807 = vmatmul.mubr.msk.f32.vlgmr.msra.gmra.mrb[0].mxu0 %vm510_vm1, %v454_v58 }
 0x125   :  { %726 = vmatprep.mubr.f32.mxu1 %v7295_v50  ;;  %1051 = vmatprep.mubr.f32.mxu0 %v7295_v50  ;;  %v310_v24 = vpop.permute.xlu1 %309  ;;  %v312_v25 = vpop.permute.xlu0 %311 }
 0x126   :  { %v355_v42 = vadd.f32 %v310_v24, %v255_v54  ;;  %v356_v43 = vadd.f32 %v312_v25, %v256_v29 }
 0x129   :  { %v410_v38 = vpop.permute.xlu1 %409  ;;  %v412_v41 = vpop.permute.xlu0 %411 }
 0x12a   :  { %v455_v3 = vadd.f32 %v410_v38, %v355_v42  ;;  %v456_v44 = vadd.f32 %v412_v41, %v356_v43 }
 0x1f7   :  { %v587_v48 = vpop.f32.mrb[0].mxu1  ;;  %v982_v49 = vpop.f32.mrb[0].mxu0 }
 0x1f8   :  { %v589_v2 = vpop.f32.mrb[1].mxu1  ;;  %v984_v59 = vpop.f32.mrb[1].mxu0 }
 0x1f9   :  { %662 = vmatprep.subr.mxu1 %v589_v2  ;;  %987 = vmatprep.subr.mxu0 %v984_v59 }
 0x1fa   :  { %663 = vmatpush1.msra.mxu1 %v587_v48  ;;  %988 = vmatpush1.msra.mxu0 %v982_v49 }
 0x1fb   :  { %5782 = vmatmul.mubr.msk.f32.vlgmr.msra.gmra.mrb[2].mxu1 %vm592_vm2, %v7549_v60  ;;  %5808 = vmatmul.mubr.msk.f32.vlgmr.msra.gmra.mrb[2].mxu0 %vm592_vm2, %v7549_v60 }
 0x1fc   :  { %6918 = vmatprep.subr.bf16.mxu1 %v7350_v8  ;;  %6934 = vmatprep.subr.bf16.mxu0 %v7350_v8 }
 0x1fd   :  { %732 = vmatprep.mubr.f32.mxu1 %v7295_v50  ;;  %1057 = vmatprep.mubr.f32.mxu0 %v7295_v50 }
 0x1fe   :  { %6920 = vmatpush1.bf16.msra.mxu1 %v7352_v12  ;;  %6936 = vmatpush1.bf16.msra.mxu0 %v7352_v12 }
 0x1ff   :  { %5783 = vmatmul.mubr.msk.f32.gmra.mrb[4].mxu1 %vm592_vm2, %v7560_v61  ;;  %5809 = vmatmul.mubr.msk.f32.gmra.mrb[4].mxu0 %vm592_vm2, %v7560_v61 }
 0x200   :  { %738 = vmatprep.mubr.f32.mxu1 %v7295_v50  ;;  %1063 = vmatprep.mubr.f32.mxu0 %v7295_v50 }
 0x201   :  { %6922 = vmatprep.subr.bf16.mxu1 %v7354_v13  ;;  %6938 = vmatprep.subr.bf16.mxu0 %v7354_v13 }
 0x202   :  { %6924 = vmatpush1.bf16.msra.mxu1 %v7360_v18  ;;  %6940 = vmatpush1.bf16.msra.mxu0 %v7360_v18 }
 0x203   :  { %5784 = vmatmul.mubr.msk.f32.gmra.mrb[6].mxu1 %vm592_vm2, %v7575_v62  ;;  %5810 = vmatmul.mubr.msk.f32.gmra.mrb[6].mxu0 %vm592_vm2, %v7575_v62 }
 0x204   :  { %744 = vmatprep.mubr.f32.mxu1 %v7295_v50  ;;  %1069 = vmatprep.mubr.f32.mxu0 %v7295_v50 }
 0x205   :  { %6926 = vmatprep.subr.bf16.mxu1 %v7364_v19  ;;  %6942 = vmatprep.subr.bf16.mxu0 %v7364_v19 }
 0x206   :  { %6928 = vmatpush1.bf16.msra.mxu1 %v7368_v22  ;;  %6944 = vmatpush1.bf16.msra.mxu0 %v7368_v22 }
 0x207   :  { %5785 = vmatmul.mubr.msk.f32.gmra.mrb[8].mxu1 %vm592_vm2, %v7590_v63  ;;  %5811 = vmatmul.mubr.msk.f32.gmra.mrb[8].mxu0 %vm592_vm2, %v7590_v63 }
 0x208   :  { %750 = vmatprep.mubr.f32.mxu1 %v7295_v50  ;;  %1075 = vmatprep.mubr.f32.mxu0 %v7295_v50 }
 0x209   :  { %6930 = vmatprep.subr.bf16.mxu1 %v7374_v37  ;;  %6946 = vmatprep.subr.bf16.mxu0 %v7374_v37 }
 0x20a   :  { %6932 = vmatpush1.bf16.msra.mxu1 %v7376_v39  ;;  %6948 = vmatpush1.bf16.msra.mxu0 %v7376_v39 }
 0x20b   :  { %5786 = vmatmul.mubr.msk.f32.gmra.mrb[10].mxu1 %vm592_vm2, %v7605_v0  ;;  %5812 = vmatmul.mubr.msk.f32.gmra.mrb[10].mxu0 %vm592_vm2, %v7605_v0 }
 0x20c   :  { %756 = vmatprep.mubr.f32.mxu1 %v7295_v50  ;;  %1081 = vmatprep.mubr.f32.mxu0 %v7295_v50 }
 0x20d   :  { %5877 = vmatprep.subr.msk.mxu1 %vm514_vm0, %v7384_v45  ;;  %5949 = vmatprep.subr.msk.mxu0 %vm514_vm0, %v7384_v45  ;;  %v7639_v45 = vld [vmem:[%s11922_s2 + $0x30] sm:$0xff] }
 0x20e   :  { %5878 = vmatpush1.msk.msra.mxu1 %vm514_vm0, %v7386_v46  ;;  %5950 = vmatpush1.msk.msra.mxu0 %vm514_vm0, %v7386_v46  ;;  %v7650_v46 = vld [vmem:[%s11922_s2 + $0x38] sm:$0xff] }
 0x20f   :  { %5787 = vmatmul.mubr.msk.f32.gmra.mrb[12].mxu1 %vm592_vm2, %v7620_v1  ;;  %5813 = vmatmul.mubr.msk.f32.gmra.mrb[12].mxu0 %vm592_vm2, %v7620_v1 }
 0x210   :  { %762 = vmatprep.mubr.f32.mxu1 %v7295_v50  ;;  %1087 = vmatprep.mubr.f32.mxu0 %v7295_v50 }
 0x213   :  { %5788 = vmatmul.mubr.msk.f32.gmra.mrb[14].mxu1 %vm592_vm2, %v7639_v45  ;;  %5814 = vmatmul.mubr.msk.f32.gmra.mrb[14].mxu0 %vm592_vm2, %v7639_v45 }
 0x214   :  { %768 = vmatprep.mubr.f32.mxu1 %v7295_v50  ;;  %1093 = vmatprep.mubr.f32.mxu0 %v7295_v50 }
 0x217   :  { %5789 = vmatmul.mubr.msk.f32.gmra.mrb[16].mxu1 %vm592_vm2, %v7650_v46  ;;  %5815 = vmatmul.mubr.msk.f32.gmra.mrb[16].mxu0 %vm592_vm2, %v7650_v46 }
 0x218   :  { %774 = vmatprep.mubr.f32.mxu1 %v7295_v50  ;;  %1099 = vmatprep.mubr.f32.mxu0 %v7295_v50 }
 0x21b   :  { %5790 = vmatmul.mubr.msk.f32.gmra.mrb[18].mxu1 %vm592_vm2, %v7661_v4  ;;  %5816 = vmatmul.mubr.msk.f32.gmra.mrb[18].mxu0 %vm592_vm2, %v7661_v4 }
 0x21c   :  { %780 = vmatprep.mubr.f32.mxu1 %v7295_v50  ;;  %1105 = vmatprep.mubr.f32.mxu0 %v7295_v50 }
 0x21f   :  { %5791 = vmatmul.mubr.msk.f32.gmra.mrb[20].mxu1 %vm592_vm2, %v7672_v5  ;;  %5817 = vmatmul.mubr.msk.f32.gmra.mrb[20].mxu0 %vm592_vm2, %v7672_v5 }
 0x220   :  { %786 = vmatprep.mubr.f32.mxu1 %v7295_v50  ;;  %1111 = vmatprep.mubr.f32.mxu0 %v7295_v50 }
 0x223   :  { %5792 = vmatmul.mubr.msk.f32.gmra.mrb[22].mxu1 %vm592_vm2, %v7683_v6  ;;  %5818 = vmatmul.mubr.msk.f32.gmra.mrb[22].mxu0 %vm592_vm2, %v7683_v6 }
 0x224   :  { %792 = vmatprep.mubr.f32.mxu1 %v7295_v50  ;;  %1117 = vmatprep.mubr.f32.mxu0 %v7295_v50 }
 0x227   :  { %5793 = vmatmul.mubr.msk.f32.gmra.mrb[24].mxu1 %vm592_vm2, %v7694_v9  ;;  %5819 = vmatmul.mubr.msk.f32.gmra.mrb[24].mxu0 %vm592_vm2, %v7694_v9 }
 0x228   :  { %798 = vmatprep.mubr.f32.mxu1 %v7295_v50  ;;  %1123 = vmatprep.mubr.f32.mxu0 %v7295_v50 }
 0x22b   :  { %5794 = vmatmul.mubr.msk.f32.gmra.mrb[26].mxu1 %vm592_vm2, %v7705_v10  ;;  %5820 = vmatmul.mubr.msk.f32.gmra.mrb[26].mxu0 %vm592_vm2, %v7705_v10 }
 0x22c   :  { %804 = vmatprep.mubr.f32.mxu1 %v7295_v50  ;;  %1129 = vmatprep.mubr.f32.mxu0 %v7295_v50 }
 0x22f   :  { %5795 = vmatmul.mubr.msk.f32.gmra.mrb[28].mxu1 %vm592_vm2, %v7716_v11  ;;  %5821 = vmatmul.mubr.msk.f32.gmra.mrb[28].mxu0 %vm592_vm2, %v7716_v11 }
 0x230   :  { %810 = vmatprep.mubr.f32.mxu1 %v7295_v50  ;;  %1135 = vmatprep.mubr.f32.mxu0 %v7295_v50 }
 0x233   :  { %5796 = vmatmul.mubr.msk.f32.gmra.mrb[30].mxu1 %vm592_vm2, %v7727_v14  ;;  %5822 = vmatmul.mubr.msk.f32.gmra.mrb[30].mxu0 %vm592_vm2, %v7727_v14 }
 0x234   :  { %816 = vmatprep.mubr.f32.mxu1 %v7295_v50  ;;  %1141 = vmatprep.mubr.f32.mxu0 %v7295_v50 }
 0x237   :  { %5797 = vmatmul.mubr.msk.f32.gmra.mrb[32].mxu1 %vm592_vm2, %v7738_v16  ;;  %5823 = vmatmul.mubr.msk.f32.gmra.mrb[32].mxu0 %vm592_vm2, %v7738_v16 }
 0x238   :  { %822 = vmatprep.mubr.f32.mxu1 %v7295_v50  ;;  %1147 = vmatprep.mubr.f32.mxu0 %v7295_v50 }
 0x23b   :  { %5798 = vmatmul.mubr.msk.f32.gmra.mrb[34].mxu1 %vm592_vm2, %v7749_v15  ;;  %5824 = vmatmul.mubr.msk.f32.gmra.mrb[34].mxu0 %vm592_vm2, %v7749_v15 }
 0x23c   :  { %828 = vmatprep.mubr.f32.mxu1 %v7295_v50  ;;  %1153 = vmatprep.mubr.f32.mxu0 %v7295_v50 }
 0x23f   :  { %5799 = vmatmul.mubr.msk.f32.gmra.mrb[36].mxu1 %vm592_vm2, %v7760_v17  ;;  %5825 = vmatmul.mubr.msk.f32.gmra.mrb[36].mxu0 %vm592_vm2, %v7760_v17 }
 0x240   :  { %834 = vmatprep.mubr.f32.mxu1 %v7295_v50  ;;  %1159 = vmatprep.mubr.f32.mxu0 %v7295_v50 }
 0x243   :  { %5800 = vmatmul.mubr.msk.f32.gmra.mrb[38].mxu1 %vm592_vm2, %v7771_v20  ;;  %5826 = vmatmul.mubr.msk.f32.gmra.mrb[38].mxu0 %vm592_vm2, %v7771_v20 }
 0x244   :  { %840 = vmatprep.mubr.f32.mxu1 %v7295_v50  ;;  %1165 = vmatprep.mubr.f32.mxu0 %v7295_v50 }
 0x247   :  { %5801 = vmatmul.mubr.msk.f32.gmra.mrb[40].mxu1 %vm592_vm2, %v7782_v21  ;;  %5827 = vmatmul.mubr.msk.f32.gmra.mrb[40].mxu0 %vm592_vm2, %v7782_v21 }
 0x248   :  { %846 = vmatprep.mubr.f32.mxu1 %v7295_v50  ;;  %1171 = vmatprep.mubr.f32.mxu0 %v7295_v50 }
 0x24b   :  { %5802 = vmatmul.mubr.msk.f32.gmra.mrb[42].mxu1 %vm592_vm2, %v7793_v23  ;;  %5828 = vmatmul.mubr.msk.f32.gmra.mrb[42].mxu0 %vm592_vm2, %v7793_v23 }
 0x24c   :  { %852 = vmatprep.mubr.f32.mxu1 %v7295_v50  ;;  %1177 = vmatprep.mubr.f32.mxu0 %v7295_v50 }
 0x24f   :  { %5803 = vmatmul.mubr.msk.f32.gmra.mrb[44].mxu1 %vm592_vm2, %v7804_v26  ;;  %5829 = vmatmul.mubr.msk.f32.gmra.mrb[44].mxu0 %vm592_vm2, %v7804_v26 }
 0x250   :  { %858 = vmatprep.mubr.f32.mxu1 %v7295_v50  ;;  %1183 = vmatprep.mubr.f32.mxu0 %v7295_v50 }
 0x253   :  { %5804 = vmatmul.mubr.msk.f32.gmra.mrb[46].mxu1 %vm592_vm2, %v7815_v28  ;;  %5830 = vmatmul.mubr.msk.f32.gmra.mrb[46].mxu0 %vm592_vm2, %v7815_v28 }
 0x254   :  { %1304 = vmatprep.mubr.f32.mxu1 %v7295_v50  ;;  %1628 = vmatprep.mubr.f32.mxu0 %v7295_v50 }
 0x257   :  { %5879 = vmatmul.mubr.msk.f32.vlgmr.msra.gmra.mrb[48].mxu1 %vm510_vm1, %v455_v3  ;;  %5951 = vmatmul.mubr.msk.f32.vlgmr.msra.gmra.mrb[48].mxu0 %vm510_vm1, %v456_v44 }
 0x258   :  { %1375 = vmatprep.mubr.f32.mxu1 %v7295_v50  ;;  %1699 = vmatprep.mubr.f32.mxu0 %v7295_v50 }
 0x2ce   :  { %v728_v7 = vpop.f32.mrb[2].mxu1  ;;  %v1053_v30 = vpop.f32.mrb[2].mxu0 }
 0x2cf   :  { %865 = vst [vmem:[%s11924_s4] sm:$0xff] %v728_v7  ;;  %5831 = vst [vmem:[%s11924_s4 + $0x170] sm:$0xff] %v1053_v30  ;;  %v730_v47 = vpop.f32.mrb[3].mxu1  ;;  %v1055_v51 = vpop.f32.mrb[3].mxu0 }
 0x2d0   :  { %867 = vst.msk [vmem:[%s11924_s4 + $0x8] sm:$0xff] %vm866_vm3, %v730_v47  ;;  %5832 = vst.msk [vmem:[%s11924_s4 + $0x178] sm:$0xff] %vm866_vm3, %v1055_v51 }
 0x2d2   :  { %v734_v58 = vpop.f32.mrb[4].mxu1  ;;  %v1059_v48 = vpop.f32.mrb[4].mxu0 }
 0x2d3   :  { %868 = vst [vmem:[%s11924_s4 + $0x10] sm:$0xff] %v734_v58  ;;  %5833 = vst [vmem:[%s11924_s4 + $0x180] sm:$0xff] %v1059_v48  ;;  %v736_v49 = vpop.f32.mrb[5].mxu1  ;;  %v1061_v2 = vpop.f32.mrb[5].mxu0 }
 0x2d4   :  { %869 = vst.msk [vmem:[%s11924_s4 + $0x18] sm:$0xff] %vm866_vm3, %v736_v49  ;;  %5834 = vst.msk [vmem:[%s11924_s4 + $0x188] sm:$0xff] %vm866_vm3, %v1061_v2 }
 0x2d6   :  { %v740_v59 = vpop.f32.mrb[6].mxu1  ;;  %v1065_v24 = vpop.f32.mrb[6].mxu0 }
 0x2d7   :  { %870 = vst [vmem:[%s11924_s4 + $0x20] sm:$0xff] %v740_v59  ;;  %5835 = vst [vmem:[%s11924_s4 + $0x190] sm:$0xff] %v1065_v24  ;;  %v742_v25 = vpop.f32.mrb[7].mxu1  ;;  %v1067_v54 = vpop.f32.mrb[7].mxu0 }
 0x2d8   :  { %871 = vst.msk [vmem:[%s11924_s4 + $0x28] sm:$0xff] %vm866_vm3, %v742_v25  ;;  %5836 = vst.msk [vmem:[%s11924_s4 + $0x198] sm:$0xff] %vm866_vm3, %v1067_v54 }
 0x2da   :  { %v746_v29 = vpop.f32.mrb[8].mxu1  ;;  %v1071_v38 = vpop.f32.mrb[8].mxu0 }
 0x2db   :  { %872 = vst [vmem:[%s11924_s4 + $0x30] sm:$0xff] %v746_v29  ;;  %5837 = vst [vmem:[%s11924_s4 + $0x1a0] sm:$0xff] %v1071_v38  ;;  %v748_v41 = vpop.f32.mrb[9].mxu1  ;;  %v1073_v42 = vpop.f32.mrb[9].mxu0 }
 0x2dc   :  { %873 = vst.msk [vmem:[%s11924_s4 + $0x38] sm:$0xff] %vm866_vm3, %v748_v41  ;;  %5838 = vst.msk [vmem:[%s11924_s4 + $0x1a8] sm:$0xff] %vm866_vm3, %v1073_v42 }
 0x2de   :  { %v752_v43 = vpop.f32.mrb[10].mxu1  ;;  %v1077_v3 = vpop.f32.mrb[10].mxu0 }
 0x2df   :  { %874 = vst [vmem:[%s11924_s4 + $0x40] sm:$0xff] %v752_v43  ;;  %5839 = vst [vmem:[%s11924_s4 + $0x1b0] sm:$0xff] %v1077_v3  ;;  %v754_v44 = vpop.f32.mrb[11].mxu1  ;;  %v1079_v7 = vpop.f32.mrb[11].mxu0 }
 0x2e0   :  { %875 = vst.msk [vmem:[%s11924_s4 + $0x48] sm:$0xff] %vm866_vm3, %v754_v44  ;;  %5840 = vst.msk [vmem:[%s11924_s4 + $0x1b8] sm:$0xff] %vm866_vm3, %v1079_v7 }
 0x2e2   :  { %v758_v30 = vpop.f32.mrb[12].mxu1  ;;  %v1083_v47 = vpop.f32.mrb[12].mxu0 }
 0x2e3   :  { %876 = vst [vmem:[%s11924_s4 + $0x50] sm:$0xff] %v758_v30  ;;  %5841 = vst [vmem:[%s11924_s4 + $0x1c0] sm:$0xff] %v1083_v47  ;;  %v760_v51 = vpop.f32.mrb[13].mxu1  ;;  %v1085_v58 = vpop.f32.mrb[13].mxu0 }
 0x2e4   :  { %877 = vst.msk [vmem:[%s11924_s4 + $0x58] sm:$0xff] %vm866_vm3, %v760_v51  ;;  %5842 = vst.msk [vmem:[%s11924_s4 + $0x1c8] sm:$0xff] %vm866_vm3, %v1085_v58 }
 0x2e6   :  { %v764_v48 = vpop.f32.mrb[14].mxu1  ;;  %v1089_v49 = vpop.f32.mrb[14].mxu0 }
 0x2e7   :  { %878 = vst [vmem:[%s11924_s4 + $0x60] sm:$0xff] %v764_v48  ;;  %5843 = vst [vmem:[%s11924_s4 + $0x1d0] sm:$0xff] %v1089_v49  ;;  %v766_v2 = vpop.f32.mrb[15].mxu1  ;;  %v1091_v59 = vpop.f32.mrb[15].mxu0 }
 0x2e8   :  { %879 = vst.msk [vmem:[%s11924_s4 + $0x68] sm:$0xff] %vm866_vm3, %v766_v2  ;;  %5844 = vst.msk [vmem:[%s11924_s4 + $0x1d8] sm:$0xff] %vm866_vm3, %v1091_v59 }
 0x2ea   :  { %v770_v24 = vpop.f32.mrb[16].mxu1  ;;  %v1095_v25 = vpop.f32.mrb[16].mxu0 }
 0x2eb   :  { %880 = vst [vmem:[%s11924_s4 + $0x70] sm:$0xff] %v770_v24  ;;  %5845 = vst [vmem:[%s11924_s4 + $0x1e0] sm:$0xff] %v1095_v25  ;;  %v772_v54 = vpop.f32.mrb[17].mxu1  ;;  %v1097_v29 = vpop.f32.mrb[17].mxu0 }
 0x2ec   :  { %881 = vst.msk [vmem:[%s11924_s4 + $0x78] sm:$0xff] %vm866_vm3, %v772_v54  ;;  %5846 = vst.msk [vmem:[%s11924_s4 + $0x1e8] sm:$0xff] %vm866_vm3, %v1097_v29 }
 0x2ee   :  { %v776_v38 = vpop.f32.mrb[18].mxu1  ;;  %v1101_v41 = vpop.f32.mrb[18].mxu0 }
 0x2ef   :  { %882 = vst [vmem:[%s11924_s4 + $0x80] sm:$0xff] %v776_v38  ;;  %5847 = vst [vmem:[%s11924_s4 + $0x1f0] sm:$0xff] %v1101_v41  ;;  %v778_v42 = vpop.f32.mrb[19].mxu1  ;;  %v1103_v43 = vpop.f32.mrb[19].mxu0 }
 0x2f0   :  { %883 = vst.msk [vmem:[%s11924_s4 + $0x88] sm:$0xff] %vm866_vm3, %v778_v42  ;;  %5848 = vst.msk [vmem:[%s11924_s4 + $0x1f8] sm:$0xff] %vm866_vm3, %v1103_v43 }
 0x2f2   :  { %v782_v3 = vpop.f32.mrb[20].mxu1  ;;  %v1107_v44 = vpop.f32.mrb[20].mxu0 }
 0x2f3   :  { %884 = vst [vmem:[%s11924_s4 + $0x90] sm:$0xff] %v782_v3  ;;  %5849 = vst [vmem:[%s11924_s4 + $0x200] sm:$0xff] %v1107_v44  ;;  %v784_v7 = vpop.f32.mrb[21].mxu1  ;;  %v1109_v30 = vpop.f32.mrb[21].mxu0 }
 0x2f4   :  { %885 = vst.msk [vmem:[%s11924_s4 + $0x98] sm:$0xff] %vm866_vm3, %v784_v7  ;;  %5850 = vst.msk [vmem:[%s11924_s4 + $0x208] sm:$0xff] %vm866_vm3, %v1109_v30 }
 0x2f6   :  { %v788_v47 = vpop.f32.mrb[22].mxu1  ;;  %v1113_v51 = vpop.f32.mrb[22].mxu0 }
 0x2f7   :  { %886 = vst [vmem:[%s11924_s4 + $0xa0] sm:$0xff] %v788_v47  ;;  %5851 = vst [vmem:[%s11924_s4 + $0x210] sm:$0xff] %v1113_v51  ;;  %v790_v58 = vpop.f32.mrb[23].mxu1  ;;  %v1115_v48 = vpop.f32.mrb[23].mxu0 }
 0x2f8   :  { %887 = vst.msk [vmem:[%s11924_s4 + $0xa8] sm:$0xff] %vm866_vm3, %v790_v58  ;;  %5852 = vst.msk [vmem:[%s11924_s4 + $0x218] sm:$0xff] %vm866_vm3, %v1115_v48 }
 0x2fa   :  { %v794_v49 = vpop.f32.mrb[24].mxu1  ;;  %v1119_v2 = vpop.f32.mrb[24].mxu0 }
 0x2fb   :  { %888 = vst [vmem:[%s11924_s4 + $0xb0] sm:$0xff] %v794_v49  ;;  %5853 = vst [vmem:[%s11924_s4 + $0x220] sm:$0xff] %v1119_v2  ;;  %v796_v59 = vpop.f32.mrb[25].mxu1  ;;  %v1121_v24 = vpop.f32.mrb[25].mxu0 }
 0x2fc   :  { %889 = vst.msk [vmem:[%s11924_s4 + $0xb8] sm:$0xff] %vm866_vm3, %v796_v59  ;;  %5854 = vst.msk [vmem:[%s11924_s4 + $0x228] sm:$0xff] %vm866_vm3, %v1121_v24 }
 0x2fe   :  { %v800_v25 = vpop.f32.mrb[26].mxu1  ;;  %v1125_v54 = vpop.f32.mrb[26].mxu0 }
 0x2ff   :  { %890 = vst [vmem:[%s11924_s4 + $0xc0] sm:$0xff] %v800_v25  ;;  %5855 = vst [vmem:[%s11924_s4 + $0x230] sm:$0xff] %v1125_v54  ;;  %v802_v29 = vpop.f32.mrb[27].mxu1  ;;  %v1127_v38 = vpop.f32.mrb[27].mxu0 }
 0x300   :  { %891 = vst.msk [vmem:[%s11924_s4 + $0xc8] sm:$0xff] %vm866_vm3, %v802_v29  ;;  %5856 = vst.msk [vmem:[%s11924_s4 + $0x238] sm:$0xff] %vm866_vm3, %v1127_v38 }
 0x302   :  { %v806_v41 = vpop.f32.mrb[28].mxu1  ;;  %v1131_v42 = vpop.f32.mrb[28].mxu0 }
 0x303   :  { %892 = vst [vmem:[%s11924_s4 + $0xd0] sm:$0xff] %v806_v41  ;;  %5857 = vst [vmem:[%s11924_s4 + $0x240] sm:$0xff] %v1131_v42  ;;  %v808_v43 = vpop.f32.mrb[29].mxu1  ;;  %v1133_v3 = vpop.f32.mrb[29].mxu0 }
 0x304   :  { %893 = vst.msk [vmem:[%s11924_s4 + $0xd8] sm:$0xff] %vm866_vm3, %v808_v43  ;;  %5858 = vst.msk [vmem:[%s11924_s4 + $0x248] sm:$0xff] %vm866_vm3, %v1133_v3 }
 0x306   :  { %v812_v44 = vpop.f32.mrb[30].mxu1  ;;  %v1137_v7 = vpop.f32.mrb[30].mxu0 }
 0x307   :  { %894 = vst [vmem:[%s11924_s4 + $0xe0] sm:$0xff] %v812_v44  ;;  %5859 = vst [vmem:[%s11924_s4 + $0x250] sm:$0xff] %v1137_v7  ;;  %v814_v30 = vpop.f32.mrb[31].mxu1  ;;  %v1139_v47 = vpop.f32.mrb[31].mxu0 }
 0x308   :  { %895 = vst.msk [vmem:[%s11924_s4 + $0xe8] sm:$0xff] %vm866_vm3, %v814_v30  ;;  %5860 = vst.msk [vmem:[%s11924_s4 + $0x258] sm:$0xff] %vm866_vm3, %v1139_v47 }
 0x30a   :  { %v818_v51 = vpop.f32.mrb[32].mxu1  ;;  %v1143_v58 = vpop.f32.mrb[32].mxu0 }
 0x30b   :  { %896 = vst [vmem:[%s11924_s4 + $0xf0] sm:$0xff] %v818_v51  ;;  %5861 = vst [vmem:[%s11924_s4 + $0x260] sm:$0xff] %v1143_v58  ;;  %v820_v48 = vpop.f32.mrb[33].mxu1  ;;  %v1145_v49 = vpop.f32.mrb[33].mxu0 }
 0x30c   :  { %897 = vst.msk [vmem:[%s11924_s4 + $0xf8] sm:$0xff] %vm866_vm3, %v820_v48  ;;  %5862 = vst.msk [vmem:[%s11924_s4 + $0x268] sm:$0xff] %vm866_vm3, %v1145_v49 }
 0x30e   :  { %v824_v2 = vpop.f32.mrb[34].mxu1  ;;  %v1149_v59 = vpop.f32.mrb[34].mxu0 }
 0x30f   :  { %898 = vst [vmem:[%s11924_s4 + $0x100] sm:$0xff] %v824_v2  ;;  %5863 = vst [vmem:[%s11924_s4 + $0x270] sm:$0xff] %v1149_v59  ;;  %v826_v24 = vpop.f32.mrb[35].mxu1  ;;  %v1151_v25 = vpop.f32.mrb[35].mxu0 }
 0x310   :  { %899 = vst.msk [vmem:[%s11924_s4 + $0x108] sm:$0xff] %vm866_vm3, %v826_v24  ;;  %5864 = vst.msk [vmem:[%s11924_s4 + $0x278] sm:$0xff] %vm866_vm3, %v1151_v25 }
 0x312   :  { %v830_v54 = vpop.f32.mrb[36].mxu1  ;;  %v1155_v29 = vpop.f32.mrb[36].mxu0 }
 0x313   :  { %900 = vst [vmem:[%s11924_s4 + $0x110] sm:$0xff] %v830_v54  ;;  %5865 = vst [vmem:[%s11924_s4 + $0x280] sm:$0xff] %v1155_v29  ;;  %v832_v38 = vpop.f32.mrb[37].mxu1  ;;  %v1157_v41 = vpop.f32.mrb[37].mxu0 }
 0x314   :  { %901 = vst.msk [vmem:[%s11924_s4 + $0x118] sm:$0xff] %vm866_vm3, %v832_v38  ;;  %5866 = vst.msk [vmem:[%s11924_s4 + $0x288] sm:$0xff] %vm866_vm3, %v1157_v41 }
 0x316   :  { %v836_v42 = vpop.f32.mrb[38].mxu1  ;;  %v1161_v43 = vpop.f32.mrb[38].mxu0 }
 0x317   :  { %902 = vst [vmem:[%s11924_s4 + $0x120] sm:$0xff] %v836_v42  ;;  %5867 = vst [vmem:[%s11924_s4 + $0x290] sm:$0xff] %v1161_v43  ;;  %v838_v3 = vpop.f32.mrb[39].mxu1  ;;  %v1163_v44 = vpop.f32.mrb[39].mxu0 }
 0x318   :  { %903 = vst.msk [vmem:[%s11924_s4 + $0x128] sm:$0xff] %vm866_vm3, %v838_v3  ;;  %5868 = vst.msk [vmem:[%s11924_s4 + $0x298] sm:$0xff] %vm866_vm3, %v1163_v44 }
 0x31a   :  { %v842_v7 = vpop.f32.mrb[40].mxu1  ;;  %v1167_v30 = vpop.f32.mrb[40].mxu0 }
 0x31b   :  { %904 = vst [vmem:[%s11924_s4 + $0x130] sm:$0xff] %v842_v7  ;;  %5869 = vst [vmem:[%s11924_s4 + $0x2a0] sm:$0xff] %v1167_v30  ;;  %v844_v47 = vpop.f32.mrb[41].mxu1  ;;  %v1169_v51 = vpop.f32.mrb[41].mxu0 }
 0x31c   :  { %905 = vst.msk [vmem:[%s11924_s4 + $0x138] sm:$0xff] %vm866_vm3, %v844_v47  ;;  %5870 = vst.msk [vmem:[%s11924_s4 + $0x2a8] sm:$0xff] %vm866_vm3, %v1169_v51 }
 0x31e   :  { %v848_v58 = vpop.f32.mrb[42].mxu1  ;;  %v1173_v48 = vpop.f32.mrb[42].mxu0 }
 0x31f   :  { %906 = vst [vmem:[%s11924_s4 + $0x140] sm:$0xff] %v848_v58  ;;  %5871 = vst [vmem:[%s11924_s4 + $0x2b0] sm:$0xff] %v1173_v48  ;;  %v850_v49 = vpop.f32.mrb[43].mxu1  ;;  %v1175_v2 = vpop.f32.mrb[43].mxu0 }
 0x320   :  { %907 = vst.msk [vmem:[%s11924_s4 + $0x148] sm:$0xff] %vm866_vm3, %v850_v49  ;;  %5872 = vst.msk [vmem:[%s11924_s4 + $0x2b8] sm:$0xff] %vm866_vm3, %v1175_v2 }
 0x322   :  { %v854_v59 = vpop.f32.mrb[44].mxu1  ;;  %v1179_v24 = vpop.f32.mrb[44].mxu0 }
 0x323   :  { %908 = vst [vmem:[%s11924_s4 + $0x150] sm:$0xff] %v854_v59  ;;  %5873 = vst [vmem:[%s11924_s4 + $0x2c0] sm:$0xff] %v1179_v24  ;;  %v856_v25 = vpop.f32.mrb[45].mxu1  ;;  %v1181_v54 = vpop.f32.mrb[45].mxu0 }
 0x324   :  { %909 = vst.msk [vmem:[%s11924_s4 + $0x158] sm:$0xff] %vm866_vm3, %v856_v25  ;;  %5874 = vst.msk [vmem:[%s11924_s4 + $0x2c8] sm:$0xff] %vm866_vm3, %v1181_v54 }
 0x326   :  { %v860_v29 = vpop.f32.mrb[46].mxu1  ;;  %v1185_v38 = vpop.f32.mrb[46].mxu0 }
 0x327   :  { %910 = vst [vmem:[%s11924_s4 + $0x160] sm:$0x3] %v860_v29  ;;  %5875 = vst [vmem:[%s11924_s4 + $0x2d0] sm:$0x3] %v1185_v38  ;;  %v862_v41 = vpop.f32.mrb[47].mxu1  ;;  %v1187_v42 = vpop.f32.mrb[47].mxu0 }
 0x328   :  { %912 = vst.msk [vmem:[%s11924_s4 + $0x168] sm:$0x3] %vm911_vm4, %v862_v41  ;;  %5876 = vst.msk [vmem:[%s11924_s4 + $0x2d8] sm:$0x3] %vm911_vm4, %v1187_v42 }
 0x32a   :  { %v1306_v43 = vpop.f32.mrb[48].mxu1  ;;  %v1630_v3 = vpop.f32.mrb[48].mxu0 }
 0x32b   :  { %v1308_v44 = vpop.f32.mrb[49].mxu1  ;;  %v1632_v7 = vpop.f32.mrb[49].mxu0 }
 0x32c   :  { %1311 = vmatprep.subr.mxu1 %v1308_v44  ;;  %1635 = vmatprep.subr.mxu0 %v1632_v7 }
 0x32d   :  { %1312 = vmatpush1.msra.mxu1 %v1306_v43  ;;  %1636 = vmatpush1.msra.mxu0 %v1630_v3 }
 0x32e   :  { %5880 = vmatmul.mubr.msk.f32.vlgmr.msra.gmra.mrb[50].mxu1 %vm592_vm2, %v7549_v60  ;;  %5952 = vmatmul.mubr.msk.f32.vlgmr.msra.gmra.mrb[50].mxu0 %vm592_vm2, %v7549_v60  ;;  %v8199_v60 = vld [vmem:[#allocation4 + $0x88] sm:$0x3] }
 0x32f   :  { %6950 = vmatprep.subr.bf16.mxu1 %v7350_v8  ;;  %6966 = vmatprep.subr.bf16.mxu0 %v7350_v8 }
 0x330   :  { %1381 = vmatprep.mubr.f32.mxu1 %v7295_v50  ;;  %1705 = vmatprep.mubr.f32.mxu0 %v7295_v50 }
 0x331   :  { %6952 = vmatpush1.bf16.msra.mxu1 %v7352_v12  ;;  %6968 = vmatpush1.bf16.msra.mxu0 %v7352_v12 }
 0x332   :  { %5881 = vmatmul.mubr.msk.f32.gmra.mrb[52].mxu1 %vm592_vm2, %v7560_v61  ;;  %5953 = vmatmul.mubr.msk.f32.gmra.mrb[52].mxu0 %vm592_vm2, %v7560_v61  ;;  %v8205_v61 = vld [vmem:[#allocation4 + $0x80] sm:$0x3] }
 0x333   :  { %1387 = vmatprep.mubr.f32.mxu1 %v7295_v50  ;;  %1711 = vmatprep.mubr.f32.mxu0 %v7295_v50 }
 0x334   :  { %6954 = vmatprep.subr.bf16.mxu1 %v7354_v13  ;;  %6970 = vmatprep.subr.bf16.mxu0 %v7354_v13 }
 0x335   :  { %6956 = vmatpush1.bf16.msra.mxu1 %v7360_v18  ;;  %6972 = vmatpush1.bf16.msra.mxu0 %v7360_v18 }
 0x336   :  { %5882 = vmatmul.mubr.msk.f32.gmra.mrb[54].mxu1 %vm592_vm2, %v7575_v62  ;;  %5954 = vmatmul.mubr.msk.f32.gmra.mrb[54].mxu0 %vm592_vm2, %v7575_v62  ;;  %v314_v62 = vpop.permute.xlu1 %313 }
 0x337   :  { %1393 = vmatprep.mubr.f32.mxu1 %v7295_v50  ;;  %1717 = vmatprep.mubr.f32.mxu0 %v7295_v50 }
 0x338   :  { %6958 = vmatprep.subr.bf16.mxu1 %v7364_v19  ;;  %6974 = vmatprep.subr.bf16.mxu0 %v7364_v19 }
 0x339   :  { %6960 = vmatpush1.bf16.msra.mxu1 %v7368_v22  ;;  %6976 = vmatpush1.bf16.msra.mxu0 %v7368_v22 }
 0x33a   :  { %5883 = vmatmul.mubr.msk.f32.gmra.mrb[56].mxu1 %vm592_vm2, %v7590_v63  ;;  %5955 = vmatmul.mubr.msk.f32.gmra.mrb[56].mxu0 %vm592_vm2, %v7590_v63  ;;  %v316_v63 = vpop.permute.xlu0 %315 }
 0x33b   :  { %1399 = vmatprep.mubr.f32.mxu1 %v7295_v50  ;;  %1723 = vmatprep.mubr.f32.mxu0 %v7295_v50 }
 0x33c   :  { %6962 = vmatprep.subr.bf16.mxu1 %v7374_v37  ;;  %6978 = vmatprep.subr.bf16.mxu0 %v7374_v37 }
 0x33d   :  { %6964 = vmatpush1.bf16.msra.mxu1 %v7376_v39  ;;  %6980 = vmatpush1.bf16.msra.mxu0 %v7376_v39 }
 0x33e   :  { %5884 = vmatmul.mubr.msk.f32.gmra.mrb[58].mxu1 %vm592_vm2, %v7605_v0  ;;  %5956 = vmatmul.mubr.msk.f32.gmra.mrb[58].mxu0 %vm592_vm2, %v7605_v0  ;;  %v257_v0 = vadd.f32 %v7534_v27, %v7440_v31 }
 0x33f   :  { %1405 = vmatprep.mubr.f32.mxu1 %v7295_v50  ;;  %1729 = vmatprep.mubr.f32.mxu0 %v7295_v50 }
 0x340   :  { %6021 = vmatprep.subr.msk.mxu1 %vm514_vm0, %v8199_v60  ;;  %6093 = vmatprep.subr.msk.mxu0 %vm514_vm0, %v8199_v60 }
 0x341   :  { %6022 = vmatpush1.msk.msra.mxu1 %vm514_vm0, %v8205_v61  ;;  %6094 = vmatpush1.msk.msra.mxu0 %vm514_vm0, %v8205_v61 }
 0x342   :  { %5885 = vmatmul.mubr.msk.f32.gmra.mrb[60].mxu1 %vm592_vm2, %v7620_v1  ;;  %5957 = vmatmul.mubr.msk.f32.gmra.mrb[60].mxu0 %vm592_vm2, %v7620_v1  ;;  %v258_v1 = vadd.f32 %v7534_v27, %v7443_v32 }
 0x343   :  { %1411 = vmatprep.mubr.f32.mxu1 %v7295_v50  ;;  %1735 = vmatprep.mubr.f32.mxu0 %v7295_v50 }
 0x346   :  { %5886 = vmatmul.mubr.msk.f32.gmra.mrb[62].mxu1 %vm592_vm2, %v7639_v45  ;;  %5958 = vmatmul.mubr.msk.f32.gmra.mrb[62].mxu0 %vm592_vm2, %v7639_v45  ;;  %v414_v45 = vpop.permute.xlu1 %413 }
 0x347   :  { %1417 = vmatprep.mubr.f32.mxu1 %v7295_v50  ;;  %1741 = vmatprep.mubr.f32.mxu0 %v7295_v50 }
 0x34a   :  { %5887 = vmatmul.mubr.msk.f32.gmra.mrb[64].mxu1 %vm592_vm2, %v7650_v46  ;;  %5959 = vmatmul.mubr.msk.f32.gmra.mrb[64].mxu0 %vm592_vm2, %v7650_v46  ;;  %v416_v46 = vpop.permute.xlu0 %415 }
 0x34b   :  { %1423 = vmatprep.mubr.f32.mxu1 %v7295_v50  ;;  %1747 = vmatprep.mubr.f32.mxu0 %v7295_v50 }
 0x34e   :  { %5888 = vmatmul.mubr.msk.f32.gmra.mrb[66].mxu1 %vm592_vm2, %v7661_v4  ;;  %5960 = vmatmul.mubr.msk.f32.gmra.mrb[66].mxu0 %vm592_vm2, %v7661_v4  ;;  %v357_v4 = vadd.f32 %v314_v62, %v257_v0 }
 0x34f   :  { %1429 = vmatprep.mubr.f32.mxu1 %v7295_v50  ;;  %1753 = vmatprep.mubr.f32.mxu0 %v7295_v50 }
 0x352   :  { %5889 = vmatmul.mubr.msk.f32.gmra.mrb[68].mxu1 %vm592_vm2, %v7672_v5  ;;  %5961 = vmatmul.mubr.msk.f32.gmra.mrb[68].mxu0 %vm592_vm2, %v7672_v5  ;;  %v358_v5 = vadd.f32 %v316_v63, %v258_v1 }
 0x353   :  { %1435 = vmatprep.mubr.f32.mxu1 %v7295_v50  ;;  %1759 = vmatprep.mubr.f32.mxu0 %v7295_v50 }
 0x356   :  { %5890 = vmatmul.mubr.msk.f32.gmra.mrb[70].mxu1 %vm592_vm2, %v7683_v6  ;;  %5962 = vmatmul.mubr.msk.f32.gmra.mrb[70].mxu0 %vm592_vm2, %v7683_v6  ;;  %v457_v6 = vadd.f32 %v414_v45, %v357_v4 }
 0x357   :  { %1441 = vmatprep.mubr.f32.mxu1 %v7295_v50  ;;  %1765 = vmatprep.mubr.f32.mxu0 %v7295_v50 }
 0x35a   :  { %5891 = vmatmul.mubr.msk.f32.gmra.mrb[72].mxu1 %vm592_vm2, %v7694_v9  ;;  %5963 = vmatmul.mubr.msk.f32.gmra.mrb[72].mxu0 %vm592_vm2, %v7694_v9  ;;  %v458_v9 = vadd.f32 %v416_v46, %v358_v5 }
 0x35b   :  { %1447 = vmatprep.mubr.f32.mxu1 %v7295_v50  ;;  %1771 = vmatprep.mubr.f32.mxu0 %v7295_v50 }
 0x35e   :  { %5892 = vmatmul.mubr.msk.f32.gmra.mrb[74].mxu1 %vm592_vm2, %v7705_v10  ;;  %5964 = vmatmul.mubr.msk.f32.gmra.mrb[74].mxu0 %vm592_vm2, %v7705_v10 }
 0x35f   :  { %1453 = vmatprep.mubr.f32.mxu1 %v7295_v50  ;;  %1777 = vmatprep.mubr.f32.mxu0 %v7295_v50 }
 0x362   :  { %5893 = vmatmul.mubr.msk.f32.gmra.mrb[76].mxu1 %vm592_vm2, %v7716_v11  ;;  %5965 = vmatmul.mubr.msk.f32.gmra.mrb[76].mxu0 %vm592_vm2, %v7716_v11 }
 0x363   :  { %1459 = vmatprep.mubr.f32.mxu1 %v7295_v50  ;;  %1783 = vmatprep.mubr.f32.mxu0 %v7295_v50 }
 0x366   :  { %5894 = vmatmul.mubr.msk.f32.gmra.mrb[78].mxu1 %vm592_vm2, %v7727_v14  ;;  %5966 = vmatmul.mubr.msk.f32.gmra.mrb[78].mxu0 %vm592_vm2, %v7727_v14 }
 0x367   :  { %1465 = vmatprep.mubr.f32.mxu1 %v7295_v50  ;;  %1789 = vmatprep.mubr.f32.mxu0 %v7295_v50 }
 0x36a   :  { %5895 = vmatmul.mubr.msk.f32.gmra.mrb[80].mxu1 %vm592_vm2, %v7738_v16  ;;  %5967 = vmatmul.mubr.msk.f32.gmra.mrb[80].mxu0 %vm592_vm2, %v7738_v16 }
 0x36b   :  { %1471 = vmatprep.mubr.f32.mxu1 %v7295_v50  ;;  %1795 = vmatprep.mubr.f32.mxu0 %v7295_v50 }
 0x36e   :  { %5896 = vmatmul.mubr.msk.f32.gmra.mrb[82].mxu1 %vm592_vm2, %v7749_v15  ;;  %5968 = vmatmul.mubr.msk.f32.gmra.mrb[82].mxu0 %vm592_vm2, %v7749_v15 }
 0x36f   :  { %1477 = vmatprep.mubr.f32.mxu1 %v7295_v50  ;;  %1801 = vmatprep.mubr.f32.mxu0 %v7295_v50 }
 0x372   :  { %5897 = vmatmul.mubr.msk.f32.gmra.mrb[84].mxu1 %vm592_vm2, %v7760_v17  ;;  %5969 = vmatmul.mubr.msk.f32.gmra.mrb[84].mxu0 %vm592_vm2, %v7760_v17 }
 0x373   :  { %1483 = vmatprep.mubr.f32.mxu1 %v7295_v50  ;;  %1807 = vmatprep.mubr.f32.mxu0 %v7295_v50 }
 0x376   :  { %5898 = vmatmul.mubr.msk.f32.gmra.mrb[86].mxu1 %vm592_vm2, %v7771_v20  ;;  %5970 = vmatmul.mubr.msk.f32.gmra.mrb[86].mxu0 %vm592_vm2, %v7771_v20 }
 0x377   :  { %1489 = vmatprep.mubr.f32.mxu1 %v7295_v50  ;;  %1813 = vmatprep.mubr.f32.mxu0 %v7295_v50 }
 0x37a   :  { %5899 = vmatmul.mubr.msk.f32.gmra.mrb[88].mxu1 %vm592_vm2, %v7782_v21  ;;  %5971 = vmatmul.mubr.msk.f32.gmra.mrb[88].mxu0 %vm592_vm2, %v7782_v21 }
 0x37b   :  { %1495 = vmatprep.mubr.f32.mxu1 %v7295_v50  ;;  %1819 = vmatprep.mubr.f32.mxu0 %v7295_v50 }
 0x37e   :  { %5900 = vmatmul.mubr.msk.f32.gmra.mrb[90].mxu1 %vm592_vm2, %v7793_v23  ;;  %5972 = vmatmul.mubr.msk.f32.gmra.mrb[90].mxu0 %vm592_vm2, %v7793_v23 }
 0x37f   :  { %1501 = vmatprep.mubr.f32.mxu1 %v7295_v50  ;;  %1825 = vmatprep.mubr.f32.mxu0 %v7295_v50 }
 0x382   :  { %5901 = vmatmul.mubr.msk.f32.gmra.mrb[92].mxu1 %vm592_vm2, %v7804_v26  ;;  %5973 = vmatmul.mubr.msk.f32.gmra.mrb[92].mxu0 %vm592_vm2, %v7804_v26 }
 0x383   :  { %1507 = vmatprep.mubr.f32.mxu1 %v7295_v50  ;;  %1831 = vmatprep.mubr.f32.mxu0 %v7295_v50 }
 0x386   :  { %5902 = vmatmul.mubr.msk.f32.gmra.mrb[94].mxu1 %vm592_vm2, %v7815_v28  ;;  %5974 = vmatmul.mubr.msk.f32.gmra.mrb[94].mxu0 %vm592_vm2, %v7815_v28 }
 0x387   :  { %1952 = vmatprep.mubr.f32.mxu1 %v7295_v50  ;;  %2276 = vmatprep.mubr.f32.mxu0 %v7295_v50 }
 0x38a   :  { %6023 = vmatmul.mubr.msk.f32.vlgmr.msra.gmra.mrb[96].mxu1 %vm510_vm1, %v457_v6  ;;  %6095 = vmatmul.mubr.msk.f32.vlgmr.msra.gmra.mrb[96].mxu0 %vm510_vm1, %v458_v9 }
 0x38b   :  { %2023 = vmatprep.mubr.f32.mxu1 %v7295_v50  ;;  %2347 = vmatprep.mubr.f32.mxu0 %v7295_v50 }
 0x401   :  { %v1377_v31 = vpop.f32.mrb[50].mxu1  ;;  %v1701_v32 = vpop.f32.mrb[50].mxu0 }
 0x402   :  { %5903 = vst [vmem:[%s11924_s4 + $0x2e0] sm:$0xff] %v1377_v31  ;;  %5975 = vst [vmem:[%s11924_s4 + $0x450] sm:$0xff] %v1701_v32  ;;  %v1379_v10 = vpop.f32.mrb[51].mxu1  ;;  %v1703_v11 = vpop.f32.mrb[51].mxu0 }
 0x403   :  { %5904 = vst.msk [vmem:[%s11924_s4 + $0x2e8] sm:$0xff] %vm866_vm3, %v1379_v10  ;;  %5976 = vst.msk [vmem:[%s11924_s4 + $0x458] sm:$0xff] %vm866_vm3, %v1703_v11 }
 0x405   :  { %v1383_v14 = vpop.f32.mrb[52].mxu1  ;;  %v1707_v16 = vpop.f32.mrb[52].mxu0 }
 0x406   :  { %5905 = vst [vmem:[%s11924_s4 + $0x2f0] sm:$0xff] %v1383_v14  ;;  %5977 = vst [vmem:[%s11924_s4 + $0x460] sm:$0xff] %v1707_v16  ;;  %v1385_v15 = vpop.f32.mrb[53].mxu1  ;;  %v1709_v17 = vpop.f32.mrb[53].mxu0 }
 0x407   :  { %5906 = vst.msk [vmem:[%s11924_s4 + $0x2f8] sm:$0xff] %vm866_vm3, %v1385_v15  ;;  %5978 = vst.msk [vmem:[%s11924_s4 + $0x468] sm:$0xff] %vm866_vm3, %v1709_v17 }
 0x409   :  { %v1389_v20 = vpop.f32.mrb[54].mxu1  ;;  %v1713_v21 = vpop.f32.mrb[54].mxu0 }
 0x40a   :  { %5907 = vst [vmem:[%s11924_s4 + $0x300] sm:$0xff] %v1389_v20  ;;  %5979 = vst [vmem:[%s11924_s4 + $0x470] sm:$0xff] %v1713_v21  ;;  %v1391_v23 = vpop.f32.mrb[55].mxu1  ;;  %v1715_v26 = vpop.f32.mrb[55].mxu0 }
 0x40b   :  { %5908 = vst.msk [vmem:[%s11924_s4 + $0x308] sm:$0xff] %vm866_vm3, %v1391_v23  ;;  %5980 = vst.msk [vmem:[%s11924_s4 + $0x478] sm:$0xff] %vm866_vm3, %v1715_v26 }
 0x40d   :  { %v1395_v28 = vpop.f32.mrb[56].mxu1  ;;  %v1719_v30 = vpop.f32.mrb[56].mxu0 }
 0x40e   :  { %5909 = vst [vmem:[%s11924_s4 + $0x310] sm:$0xff] %v1395_v28  ;;  %5981 = vst [vmem:[%s11924_s4 + $0x480] sm:$0xff] %v1719_v30  ;;  %v1397_v47 = vpop.f32.mrb[57].mxu1  ;;  %v1721_v51 = vpop.f32.mrb[57].mxu0 }
 0x40f   :  { %5910 = vst.msk [vmem:[%s11924_s4 + $0x318] sm:$0xff] %vm866_vm3, %v1397_v47  ;;  %5982 = vst.msk [vmem:[%s11924_s4 + $0x488] sm:$0xff] %vm866_vm3, %v1721_v51 }
 0x411   :  { %v1401_v58 = vpop.f32.mrb[58].mxu1  ;;  %v1725_v48 = vpop.f32.mrb[58].mxu0 }
 0x412   :  { %5911 = vst [vmem:[%s11924_s4 + $0x320] sm:$0xff] %v1401_v58  ;;  %5983 = vst [vmem:[%s11924_s4 + $0x490] sm:$0xff] %v1725_v48  ;;  %v1403_v49 = vpop.f32.mrb[59].mxu1  ;;  %v1727_v2 = vpop.f32.mrb[59].mxu0 }
 0x413   :  { %5912 = vst.msk [vmem:[%s11924_s4 + $0x328] sm:$0xff] %vm866_vm3, %v1403_v49  ;;  %5984 = vst.msk [vmem:[%s11924_s4 + $0x498] sm:$0xff] %vm866_vm3, %v1727_v2 }
 0x415   :  { %v1407_v59 = vpop.f32.mrb[60].mxu1  ;;  %v1731_v24 = vpop.f32.mrb[60].mxu0 }
 0x416   :  { %5913 = vst [vmem:[%s11924_s4 + $0x330] sm:$0xff] %v1407_v59  ;;  %5985 = vst [vmem:[%s11924_s4 + $0x4a0] sm:$0xff] %v1731_v24  ;;  %v1409_v25 = vpop.f32.mrb[61].mxu1  ;;  %v1733_v54 = vpop.f32.mrb[61].mxu0 }
 0x417   :  { %5914 = vst.msk [vmem:[%s11924_s4 + $0x338] sm:$0xff] %vm866_vm3, %v1409_v25  ;;  %5986 = vst.msk [vmem:[%s11924_s4 + $0x4a8] sm:$0xff] %vm866_vm3, %v1733_v54 }
 0x419   :  { %v1413_v29 = vpop.f32.mrb[62].mxu1  ;;  %v1737_v38 = vpop.f32.mrb[62].mxu0 }
 0x41a   :  { %5915 = vst [vmem:[%s11924_s4 + $0x340] sm:$0xff] %v1413_v29  ;;  %5987 = vst [vmem:[%s11924_s4 + $0x4b0] sm:$0xff] %v1737_v38  ;;  %v1415_v41 = vpop.f32.mrb[63].mxu1  ;;  %v1739_v42 = vpop.f32.mrb[63].mxu0 }
 0x41b   :  { %5916 = vst.msk [vmem:[%s11924_s4 + $0x348] sm:$0xff] %vm866_vm3, %v1415_v41  ;;  %5988 = vst.msk [vmem:[%s11924_s4 + $0x4b8] sm:$0xff] %vm866_vm3, %v1739_v42 }
 0x41d   :  { %v1419_v43 = vpop.f32.mrb[64].mxu1  ;;  %v1743_v3 = vpop.f32.mrb[64].mxu0 }
 0x41e   :  { %5917 = vst [vmem:[%s11924_s4 + $0x350] sm:$0xff] %v1419_v43  ;;  %5989 = vst [vmem:[%s11924_s4 + $0x4c0] sm:$0xff] %v1743_v3  ;;  %v1421_v44 = vpop.f32.mrb[65].mxu1  ;;  %v1745_v7 = vpop.f32.mrb[65].mxu0 }
 0x41f   :  { %5918 = vst.msk [vmem:[%s11924_s4 + $0x358] sm:$0xff] %vm866_vm3, %v1421_v44  ;;  %5990 = vst.msk [vmem:[%s11924_s4 + $0x4c8] sm:$0xff] %vm866_vm3, %v1745_v7 }
 0x421   :  { %v1425_v62 = vpop.f32.mrb[66].mxu1  ;;  %v1749_v63 = vpop.f32.mrb[66].mxu0 }
 0x422   :  { %5919 = vst [vmem:[%s11924_s4 + $0x360] sm:$0xff] %v1425_v62  ;;  %5991 = vst [vmem:[%s11924_s4 + $0x4d0] sm:$0xff] %v1749_v63  ;;  %v1427_v0 = vpop.f32.mrb[67].mxu1  ;;  %v1751_v1 = vpop.f32.mrb[67].mxu0 }
 0x423   :  { %5920 = vst.msk [vmem:[%s11924_s4 + $0x368] sm:$0xff] %vm866_vm3, %v1427_v0  ;;  %5992 = vst.msk [vmem:[%s11924_s4 + $0x4d8] sm:$0xff] %vm866_vm3, %v1751_v1 }
 0x425   :  { %v1431_v45 = vpop.f32.mrb[68].mxu1  ;;  %v1755_v46 = vpop.f32.mrb[68].mxu0 }
 0x426   :  { %5921 = vst [vmem:[%s11924_s4 + $0x370] sm:$0xff] %v1431_v45  ;;  %5993 = vst [vmem:[%s11924_s4 + $0x4e0] sm:$0xff] %v1755_v46  ;;  %v1433_v4 = vpop.f32.mrb[69].mxu1  ;;  %v1757_v5 = vpop.f32.mrb[69].mxu0 }
 0x427   :  { %5922 = vst.msk [vmem:[%s11924_s4 + $0x378] sm:$0xff] %vm866_vm3, %v1433_v4  ;;  %5994 = vst.msk [vmem:[%s11924_s4 + $0x4e8] sm:$0xff] %vm866_vm3, %v1757_v5 }
 0x429   :  { %v1437_v6 = vpop.f32.mrb[70].mxu1  ;;  %v1761_v9 = vpop.f32.mrb[70].mxu0 }
 0x42a   :  { %5923 = vst [vmem:[%s11924_s4 + $0x380] sm:$0xff] %v1437_v6  ;;  %5995 = vst [vmem:[%s11924_s4 + $0x4f0] sm:$0xff] %v1761_v9  ;;  %v1439_v31 = vpop.f32.mrb[71].mxu1  ;;  %v1763_v32 = vpop.f32.mrb[71].mxu0 }
 0x42b   :  { %5924 = vst.msk [vmem:[%s11924_s4 + $0x388] sm:$0xff] %vm866_vm3, %v1439_v31  ;;  %5996 = vst.msk [vmem:[%s11924_s4 + $0x4f8] sm:$0xff] %vm866_vm3, %v1763_v32 }
 0x42d   :  { %v1443_v10 = vpop.f32.mrb[72].mxu1  ;;  %v1767_v11 = vpop.f32.mrb[72].mxu0 }
 0x42e   :  { %5925 = vst [vmem:[%s11924_s4 + $0x390] sm:$0xff] %v1443_v10  ;;  %5997 = vst [vmem:[%s11924_s4 + $0x500] sm:$0xff] %v1767_v11  ;;  %v1445_v14 = vpop.f32.mrb[73].mxu1  ;;  %v1769_v16 = vpop.f32.mrb[73].mxu0 }
 0x42f   :  { %5926 = vst.msk [vmem:[%s11924_s4 + $0x398] sm:$0xff] %vm866_vm3, %v1445_v14  ;;  %5998 = vst.msk [vmem:[%s11924_s4 + $0x508] sm:$0xff] %vm866_vm3, %v1769_v16 }
 0x431   :  { %v1449_v15 = vpop.f32.mrb[74].mxu1  ;;  %v1773_v17 = vpop.f32.mrb[74].mxu0 }
 0x432   :  { %5927 = vst [vmem:[%s11924_s4 + $0x3a0] sm:$0xff] %v1449_v15  ;;  %5999 = vst [vmem:[%s11924_s4 + $0x510] sm:$0xff] %v1773_v17  ;;  %v1451_v20 = vpop.f32.mrb[75].mxu1  ;;  %v1775_v21 = vpop.f32.mrb[75].mxu0 }
 0x433   :  { %5928 = vst.msk [vmem:[%s11924_s4 + $0x3a8] sm:$0xff] %vm866_vm3, %v1451_v20  ;;  %6000 = vst.msk [vmem:[%s11924_s4 + $0x518] sm:$0xff] %vm866_vm3, %v1775_v21 }
 0x435   :  { %v1455_v23 = vpop.f32.mrb[76].mxu1  ;;  %v1779_v26 = vpop.f32.mrb[76].mxu0 }
 0x436   :  { %5929 = vst [vmem:[%s11924_s4 + $0x3b0] sm:$0xff] %v1455_v23  ;;  %6001 = vst [vmem:[%s11924_s4 + $0x520] sm:$0xff] %v1779_v26  ;;  %v1457_v28 = vpop.f32.mrb[77].mxu1  ;;  %v1781_v30 = vpop.f32.mrb[77].mxu0 }
 0x437   :  { %5930 = vst.msk [vmem:[%s11924_s4 + $0x3b8] sm:$0xff] %vm866_vm3, %v1457_v28  ;;  %6002 = vst.msk [vmem:[%s11924_s4 + $0x528] sm:$0xff] %vm866_vm3, %v1781_v30  ;;  %v8652_v28 = vld [vmem:[%s11922_s2] sm:$0xff]  ;;  %v8667_v30 = vld [vmem:[%s11922_s2 + $0x8] sm:$0xff] }
 0x439   :  { %v1461_v47 = vpop.f32.mrb[78].mxu1  ;;  %v1785_v51 = vpop.f32.mrb[78].mxu0 }
 0x43a   :  { %5931 = vst [vmem:[%s11924_s4 + $0x3c0] sm:$0xff] %v1461_v47  ;;  %6003 = vst [vmem:[%s11924_s4 + $0x530] sm:$0xff] %v1785_v51  ;;  %v1463_v58 = vpop.f32.mrb[79].mxu1  ;;  %v1787_v48 = vpop.f32.mrb[79].mxu0  ;;  %v8682_v47 = vld [vmem:[%s11922_s2 + $0x10] sm:$0xff]  ;;  %v8697_v51 = vld [vmem:[%s11922_s2 + $0x18] sm:$0xff] }
 0x43b   :  { %5932 = vst.msk [vmem:[%s11924_s4 + $0x3c8] sm:$0xff] %vm866_vm3, %v1463_v58  ;;  %6004 = vst.msk [vmem:[%s11924_s4 + $0x538] sm:$0xff] %vm866_vm3, %v1787_v48  ;;  %v8712_v58 = vld [vmem:[%s11922_s2 + $0x20] sm:$0xff]  ;;  %v8731_v48 = vld [vmem:[%s11922_s2 + $0x28] sm:$0xff] }
 0x43d   :  { %v1467_v49 = vpop.f32.mrb[80].mxu1  ;;  %v1791_v2 = vpop.f32.mrb[80].mxu0 }
 0x43e   :  { %5933 = vst [vmem:[%s11924_s4 + $0x3d0] sm:$0xff] %v1467_v49  ;;  %6005 = vst [vmem:[%s11924_s4 + $0x540] sm:$0xff] %v1791_v2  ;;  %v1469_v59 = vpop.f32.mrb[81].mxu1  ;;  %v1793_v24 = vpop.f32.mrb[81].mxu0  ;;  %v8764_v49 = vld [vmem:[%s11922_s2 + $0x40] sm:$0xff]  ;;  %v8775_v2 = vld [vmem:[%s11922_s2 + $0x48] sm:$0xff] }
 0x43f   :  { %5934 = vst.msk [vmem:[%s11924_s4 + $0x3d8] sm:$0xff] %vm866_vm3, %v1469_v59  ;;  %6006 = vst.msk [vmem:[%s11924_s4 + $0x548] sm:$0xff] %vm866_vm3, %v1793_v24  ;;  %v8786_v59 = vld [vmem:[%s11922_s2 + $0x50] sm:$0xff]  ;;  %v8797_v24 = vld [vmem:[%s11922_s2 + $0x58] sm:$0xff] }
 0x441   :  { %v1473_v25 = vpop.f32.mrb[82].mxu1  ;;  %v1797_v54 = vpop.f32.mrb[82].mxu0 }
 0x442   :  { %5935 = vst [vmem:[%s11924_s4 + $0x3e0] sm:$0xff] %v1473_v25  ;;  %6007 = vst [vmem:[%s11924_s4 + $0x550] sm:$0xff] %v1797_v54  ;;  %v1475_v29 = vpop.f32.mrb[83].mxu1  ;;  %v1799_v38 = vpop.f32.mrb[83].mxu0  ;;  %v8808_v25 = vld [vmem:[%s11922_s2 + $0x60] sm:$0xff]  ;;  %v8819_v54 = vld [vmem:[%s11922_s2 + $0x68] sm:$0xff] }
 0x443   :  { %5936 = vst.msk [vmem:[%s11924_s4 + $0x3e8] sm:$0xff] %vm866_vm3, %v1475_v29  ;;  %6008 = vst.msk [vmem:[%s11924_s4 + $0x558] sm:$0xff] %vm866_vm3, %v1799_v38  ;;  %v8830_v29 = vld [vmem:[%s11922_s2 + $0x70] sm:$0xff]  ;;  %v8841_v38 = vld [vmem:[%s11922_s2 + $0x78] sm:$0xff] }
 0x445   :  { %v1479_v41 = vpop.f32.mrb[84].mxu1  ;;  %v1803_v42 = vpop.f32.mrb[84].mxu0 }
 0x446   :  { %5937 = vst [vmem:[%s11924_s4 + $0x3f0] sm:$0xff] %v1479_v41  ;;  %6009 = vst [vmem:[%s11924_s4 + $0x560] sm:$0xff] %v1803_v42  ;;  %v1481_v43 = vpop.f32.mrb[85].mxu1  ;;  %v1805_v3 = vpop.f32.mrb[85].mxu0  ;;  %v8852_v41 = vld [vmem:[%s11922_s2 + $0x80] sm:$0xff]  ;;  %v8863_v42 = vld [vmem:[%s11922_s2 + $0x88] sm:$0xff] }
 0x447   :  { %5938 = vst.msk [vmem:[%s11924_s4 + $0x3f8] sm:$0xff] %vm866_vm3, %v1481_v43  ;;  %6010 = vst.msk [vmem:[%s11924_s4 + $0x568] sm:$0xff] %vm866_vm3, %v1805_v3  ;;  %v8874_v43 = vld [vmem:[%s11922_s2 + $0x90] sm:$0xff]  ;;  %v8885_v3 = vld [vmem:[%s11922_s2 + $0x98] sm:$0xff] }
 0x449   :  { %v1485_v44 = vpop.f32.mrb[86].mxu1  ;;  %v1809_v7 = vpop.f32.mrb[86].mxu0 }
 0x44a   :  { %5939 = vst [vmem:[%s11924_s4 + $0x400] sm:$0xff] %v1485_v44  ;;  %6011 = vst [vmem:[%s11924_s4 + $0x570] sm:$0xff] %v1809_v7  ;;  %v1487_v62 = vpop.f32.mrb[87].mxu1  ;;  %v1811_v63 = vpop.f32.mrb[87].mxu0  ;;  %v8896_v44 = vld [vmem:[%s11922_s2 + $0xa0] sm:$0xff] }
 0x44b   :  { %5940 = vst.msk [vmem:[%s11924_s4 + $0x408] sm:$0xff] %vm866_vm3, %v1487_v62  ;;  %6012 = vst.msk [vmem:[%s11924_s4 + $0x578] sm:$0xff] %vm866_vm3, %v1811_v63  ;;  %v318_v7 = vpop.permute.xlu1 %317  ;;  %v320_v62 = vpop.permute.xlu0 %319  ;;  %v8907_v63 = vld [vmem:[%s11922_s2 + $0xa8] sm:$0xff] }
 0x44d   :  { %v1491_v0 = vpop.f32.mrb[88].mxu1  ;;  %v1815_v1 = vpop.f32.mrb[88].mxu0 }
 0x44e   :  { %5941 = vst [vmem:[%s11924_s4 + $0x410] sm:$0xff] %v1491_v0  ;;  %6013 = vst [vmem:[%s11924_s4 + $0x580] sm:$0xff] %v1815_v1  ;;  %v1493_v45 = vpop.f32.mrb[89].mxu1  ;;  %v1817_v46 = vpop.f32.mrb[89].mxu0  ;;  %v259_v0 = vadd.f32 %v7534_v27, %v7446_v33  ;;  %v260_v1 = vadd.f32 %v7534_v27, %v7451_v34 }
 0x44f   :  { %5942 = vst.msk [vmem:[%s11924_s4 + $0x418] sm:$0xff] %vm866_vm3, %v1493_v45  ;;  %6014 = vst.msk [vmem:[%s11924_s4 + $0x588] sm:$0xff] %vm866_vm3, %v1817_v46  ;;  %v418_v45 = vpop.permute.xlu1 %417  ;;  %v420_v46 = vpop.permute.xlu0 %419 }
 0x451   :  { %v1497_v4 = vpop.f32.mrb[90].mxu1  ;;  %v1821_v5 = vpop.f32.mrb[90].mxu0 }
 0x452   :  { %5943 = vst [vmem:[%s11924_s4 + $0x420] sm:$0xff] %v1497_v4  ;;  %6015 = vst [vmem:[%s11924_s4 + $0x590] sm:$0xff] %v1821_v5  ;;  %v1499_v6 = vpop.f32.mrb[91].mxu1  ;;  %v1823_v9 = vpop.f32.mrb[91].mxu0  ;;  %v359_v4 = vadd.f32 %v318_v7, %v259_v0  ;;  %v360_v5 = vadd.f32 %v320_v62, %v260_v1 }
 0x453   :  { %5944 = vst.msk [vmem:[%s11924_s4 + $0x428] sm:$0xff] %vm866_vm3, %v1499_v6  ;;  %6016 = vst.msk [vmem:[%s11924_s4 + $0x598] sm:$0xff] %vm866_vm3, %v1823_v9  ;;  %v8922_v6 = vld [vmem:[%s11922_s2 + $0xb0] sm:$0x3] }
 0x454   :  { %v459_v33 = vadd.f32 %v418_v45, %v359_v4  ;;  %v460_v34 = vadd.f32 %v420_v46, %v360_v5 }
 0x455   :  { %v1503_v31 = vpop.f32.mrb[92].mxu1  ;;  %v1827_v32 = vpop.f32.mrb[92].mxu0 }
 0x456   :  { %5945 = vst [vmem:[%s11924_s4 + $0x430] sm:$0xff] %v1503_v31  ;;  %6017 = vst [vmem:[%s11924_s4 + $0x5a0] sm:$0xff] %v1827_v32  ;;  %v1505_v10 = vpop.f32.mrb[93].mxu1  ;;  %v1829_v11 = vpop.f32.mrb[93].mxu0 }
 0x457   :  { %5946 = vst.msk [vmem:[%s11924_s4 + $0x438] sm:$0xff] %vm866_vm3, %v1505_v10  ;;  %6018 = vst.msk [vmem:[%s11924_s4 + $0x5a8] sm:$0xff] %vm866_vm3, %v1829_v11 }
 0x459   :  { %v1509_v14 = vpop.f32.mrb[94].mxu1  ;;  %v1833_v16 = vpop.f32.mrb[94].mxu0 }
 0x45a   :  { %5947 = vst [vmem:[%s11924_s4 + $0x440] sm:$0x3] %v1509_v14  ;;  %6019 = vst [vmem:[%s11924_s4 + $0x5b0] sm:$0x3] %v1833_v16  ;;  %v1511_v15 = vpop.f32.mrb[95].mxu1  ;;  %v1835_v17 = vpop.f32.mrb[95].mxu0 }
 0x45b   :  { %5948 = vst.msk [vmem:[%s11924_s4 + $0x448] sm:$0x3] %vm911_vm4, %v1511_v15  ;;  %6020 = vst.msk [vmem:[%s11924_s4 + $0x5b8] sm:$0x3] %vm911_vm4, %v1835_v17 }
 0x45d   :  { %v1954_v20 = vpop.f32.mrb[96].mxu1  ;;  %v2278_v21 = vpop.f32.mrb[96].mxu0 }
 0x45e   :  { %v1956_v23 = vpop.f32.mrb[97].mxu1  ;;  %v2280_v26 = vpop.f32.mrb[97].mxu0 }
 0x45f   :  { %1959 = vmatprep.subr.mxu1 %v1956_v23  ;;  %2283 = vmatprep.subr.mxu0 %v2280_v26 }
 0x460   :  { %1960 = vmatpush1.msra.mxu1 %v1954_v20  ;;  %2284 = vmatpush1.msra.mxu0 %v2278_v21 }
 0x461   :  { %6024 = vmatmul.mubr.msk.f32.vlgmr.msra.gmra.mrb[98].mxu1 %vm592_vm2, %v8652_v28  ;;  %6096 = vmatmul.mubr.msk.f32.vlgmr.msra.gmra.mrb[98].mxu0 %vm592_vm2, %v8652_v28 }
 0x462   :  { %6982 = vmatprep.subr.bf16.mxu1 %v7350_v8  ;;  %6998 = vmatprep.subr.bf16.mxu0 %v7350_v8 }
 0x463   :  { %2029 = vmatprep.mubr.f32.mxu1 %v7295_v50  ;;  %2353 = vmatprep.mubr.f32.mxu0 %v7295_v50 }
 0x464   :  { %6984 = vmatpush1.bf16.msra.mxu1 %v7352_v12  ;;  %7000 = vmatpush1.bf16.msra.mxu0 %v7352_v12 }
 0x465   :  { %6025 = vmatmul.mubr.msk.f32.gmra.mrb[100].mxu1 %vm592_vm2, %v8667_v30  ;;  %6097 = vmatmul.mubr.msk.f32.gmra.mrb[100].mxu0 %vm592_vm2, %v8667_v30 }
 0x466   :  { %2035 = vmatprep.mubr.f32.mxu1 %v7295_v50  ;;  %2359 = vmatprep.mubr.f32.mxu0 %v7295_v50 }
 0x467   :  { %6986 = vmatprep.subr.bf16.mxu1 %v7354_v13  ;;  %7002 = vmatprep.subr.bf16.mxu0 %v7354_v13 }
 0x468   :  { %6988 = vmatpush1.bf16.msra.mxu1 %v7360_v18  ;;  %7004 = vmatpush1.bf16.msra.mxu0 %v7360_v18 }
 0x469   :  { %6026 = vmatmul.mubr.msk.f32.gmra.mrb[102].mxu1 %vm592_vm2, %v8682_v47  ;;  %6098 = vmatmul.mubr.msk.f32.gmra.mrb[102].mxu0 %vm592_vm2, %v8682_v47 }
 0x46a   :  { %2041 = vmatprep.mubr.f32.mxu1 %v7295_v50  ;;  %2365 = vmatprep.mubr.f32.mxu0 %v7295_v50 }
 0x46b   :  { %6990 = vmatprep.subr.bf16.mxu1 %v7364_v19  ;;  %7006 = vmatprep.subr.bf16.mxu0 %v7364_v19 }
 0x46c   :  { %6992 = vmatpush1.bf16.msra.mxu1 %v7368_v22  ;;  %7008 = vmatpush1.bf16.msra.mxu0 %v7368_v22 }
 0x46d   :  { %6027 = vmatmul.mubr.msk.f32.gmra.mrb[104].mxu1 %vm592_vm2, %v8697_v51  ;;  %6099 = vmatmul.mubr.msk.f32.gmra.mrb[104].mxu0 %vm592_vm2, %v8697_v51 }
 0x46e   :  { %2047 = vmatprep.mubr.f32.mxu1 %v7295_v50  ;;  %2371 = vmatprep.mubr.f32.mxu0 %v7295_v50 }
 0x46f   :  { %6994 = vmatprep.subr.bf16.mxu1 %v7374_v37  ;;  %7010 = vmatprep.subr.bf16.mxu0 %v7374_v37 }
 0x470   :  { %6996 = vmatpush1.bf16.msra.mxu1 %v7376_v39  ;;  %7012 = vmatpush1.bf16.msra.mxu0 %v7376_v39 }
 0x471   :  { %6028 = vmatmul.mubr.msk.f32.gmra.mrb[106].mxu1 %vm592_vm2, %v8712_v58  ;;  %6100 = vmatmul.mubr.msk.f32.gmra.mrb[106].mxu0 %vm592_vm2, %v8712_v58 }
 0x472   :  { %2053 = vmatprep.mubr.f32.mxu1 %v7295_v50  ;;  %2377 = vmatprep.mubr.f32.mxu0 %v7295_v50 }
 0x473   :  { %6165 = vmatprep.subr.msk.mxu1 %vm514_vm0, %v8199_v60  ;;  %6237 = vmatprep.subr.msk.mxu0 %vm514_vm0, %v8199_v60  ;;  %v8742_v60 = vld [vmem:[%s11922_s2 + $0x30] sm:$0xff] }
 0x474   :  { %6166 = vmatpush1.msk.msra.mxu1 %vm514_vm0, %v8205_v61  ;;  %6238 = vmatpush1.msk.msra.mxu0 %vm514_vm0, %v8205_v61  ;;  %v8753_v61 = vld [vmem:[%s11922_s2 + $0x38] sm:$0xff] }
 0x475   :  { %6029 = vmatmul.mubr.msk.f32.gmra.mrb[108].mxu1 %vm592_vm2, %v8731_v48  ;;  %6101 = vmatmul.mubr.msk.f32.gmra.mrb[108].mxu0 %vm592_vm2, %v8731_v48 }
 0x476   :  { %2059 = vmatprep.mubr.f32.mxu1 %v7295_v50  ;;  %2383 = vmatprep.mubr.f32.mxu0 %v7295_v50 }
 0x479   :  { %6030 = vmatmul.mubr.msk.f32.gmra.mrb[110].mxu1 %vm592_vm2, %v8742_v60  ;;  %6102 = vmatmul.mubr.msk.f32.gmra.mrb[110].mxu0 %vm592_vm2, %v8742_v60 }
 0x47a   :  { %2065 = vmatprep.mubr.f32.mxu1 %v7295_v50  ;;  %2389 = vmatprep.mubr.f32.mxu0 %v7295_v50 }
 0x47d   :  { %6031 = vmatmul.mubr.msk.f32.gmra.mrb[112].mxu1 %vm592_vm2, %v8753_v61  ;;  %6103 = vmatmul.mubr.msk.f32.gmra.mrb[112].mxu0 %vm592_vm2, %v8753_v61 }
 0x47e   :  { %2071 = vmatprep.mubr.f32.mxu1 %v7295_v50  ;;  %2395 = vmatprep.mubr.f32.mxu0 %v7295_v50 }
 0x481   :  { %6032 = vmatmul.mubr.msk.f32.gmra.mrb[114].mxu1 %vm592_vm2, %v8764_v49  ;;  %6104 = vmatmul.mubr.msk.f32.gmra.mrb[114].mxu0 %vm592_vm2, %v8764_v49 }
 0x482   :  { %2077 = vmatprep.mubr.f32.mxu1 %v7295_v50  ;;  %2401 = vmatprep.mubr.f32.mxu0 %v7295_v50 }
 0x485   :  { %6033 = vmatmul.mubr.msk.f32.gmra.mrb[116].mxu1 %vm592_vm2, %v8775_v2  ;;  %6105 = vmatmul.mubr.msk.f32.gmra.mrb[116].mxu0 %vm592_vm2, %v8775_v2 }
 0x486   :  { %2083 = vmatprep.mubr.f32.mxu1 %v7295_v50  ;;  %2407 = vmatprep.mubr.f32.mxu0 %v7295_v50 }
 0x489   :  { %6034 = vmatmul.mubr.msk.f32.gmra.mrb[118].mxu1 %vm592_vm2, %v8786_v59  ;;  %6106 = vmatmul.mubr.msk.f32.gmra.mrb[118].mxu0 %vm592_vm2, %v8786_v59 }
 0x48a   :  { %2089 = vmatprep.mubr.f32.mxu1 %v7295_v50  ;;  %2413 = vmatprep.mubr.f32.mxu0 %v7295_v50 }
 0x48d   :  { %6035 = vmatmul.mubr.msk.f32.gmra.mrb[120].mxu1 %vm592_vm2, %v8797_v24  ;;  %6107 = vmatmul.mubr.msk.f32.gmra.mrb[120].mxu0 %vm592_vm2, %v8797_v24 }
 0x48e   :  { %2095 = vmatprep.mubr.f32.mxu1 %v7295_v50  ;;  %2419 = vmatprep.mubr.f32.mxu0 %v7295_v50 }
 0x491   :  { %6036 = vmatmul.mubr.msk.f32.gmra.mrb[122].mxu1 %vm592_vm2, %v8808_v25  ;;  %6108 = vmatmul.mubr.msk.f32.gmra.mrb[122].mxu0 %vm592_vm2, %v8808_v25 }
 0x492   :  { %2101 = vmatprep.mubr.f32.mxu1 %v7295_v50  ;;  %2425 = vmatprep.mubr.f32.mxu0 %v7295_v50 }
 0x495   :  { %6037 = vmatmul.mubr.msk.f32.gmra.mrb[124].mxu1 %vm592_vm2, %v8819_v54  ;;  %6109 = vmatmul.mubr.msk.f32.gmra.mrb[124].mxu0 %vm592_vm2, %v8819_v54 }
 0x496   :  { %2107 = vmatprep.mubr.f32.mxu1 %v7295_v50  ;;  %2431 = vmatprep.mubr.f32.mxu0 %v7295_v50 }
 0x499   :  { %6038 = vmatmul.mubr.msk.f32.gmra.mrb[126].mxu1 %vm592_vm2, %v8830_v29  ;;  %6110 = vmatmul.mubr.msk.f32.gmra.mrb[126].mxu0 %vm592_vm2, %v8830_v29 }
 0x49a   :  { %2113 = vmatprep.mubr.f32.mxu1 %v7295_v50  ;;  %2437 = vmatprep.mubr.f32.mxu0 %v7295_v50 }
 0x49d   :  { %6039 = vmatmul.mubr.msk.f32.gmra.mrb[128].mxu1 %vm592_vm2, %v8841_v38  ;;  %6111 = vmatmul.mubr.msk.f32.gmra.mrb[128].mxu0 %vm592_vm2, %v8841_v38 }
 0x49e   :  { %2119 = vmatprep.mubr.f32.mxu1 %v7295_v50  ;;  %2443 = vmatprep.mubr.f32.mxu0 %v7295_v50 }
 0x4a1   :  { %6040 = vmatmul.mubr.msk.f32.gmra.mrb[130].mxu1 %vm592_vm2, %v8852_v41  ;;  %6112 = vmatmul.mubr.msk.f32.gmra.mrb[130].mxu0 %vm592_vm2, %v8852_v41 }
 0x4a2   :  { %2125 = vmatprep.mubr.f32.mxu1 %v7295_v50  ;;  %2449 = vmatprep.mubr.f32.mxu0 %v7295_v50 }
 0x4a5   :  { %6041 = vmatmul.mubr.msk.f32.gmra.mrb[132].mxu1 %vm592_vm2, %v8863_v42  ;;  %6113 = vmatmul.mubr.msk.f32.gmra.mrb[132].mxu0 %vm592_vm2, %v8863_v42 }
 0x4a6   :  { %2131 = vmatprep.mubr.f32.mxu1 %v7295_v50  ;;  %2455 = vmatprep.mubr.f32.mxu0 %v7295_v50 }
 0x4a9   :  { %6042 = vmatmul.mubr.msk.f32.gmra.mrb[134].mxu1 %vm592_vm2, %v8874_v43  ;;  %6114 = vmatmul.mubr.msk.f32.gmra.mrb[134].mxu0 %vm592_vm2, %v8874_v43 }
 0x4aa   :  { %2137 = vmatprep.mubr.f32.mxu1 %v7295_v50  ;;  %2461 = vmatprep.mubr.f32.mxu0 %v7295_v50 }
 0x4ad   :  { %6043 = vmatmul.mubr.msk.f32.gmra.mrb[136].mxu1 %vm592_vm2, %v8885_v3  ;;  %6115 = vmatmul.mubr.msk.f32.gmra.mrb[136].mxu0 %vm592_vm2, %v8885_v3 }
 0x4ae   :  { %2143 = vmatprep.mubr.f32.mxu1 %v7295_v50  ;;  %2467 = vmatprep.mubr.f32.mxu0 %v7295_v50 }
 0x4b1   :  { %6044 = vmatmul.mubr.msk.f32.gmra.mrb[138].mxu1 %vm592_vm2, %v8896_v44  ;;  %6116 = vmatmul.mubr.msk.f32.gmra.mrb[138].mxu0 %vm592_vm2, %v8896_v44 }
 0x4b2   :  { %2149 = vmatprep.mubr.f32.mxu1 %v7295_v50  ;;  %2473 = vmatprep.mubr.f32.mxu0 %v7295_v50 }
 0x4b5   :  { %6045 = vmatmul.mubr.msk.f32.gmra.mrb[140].mxu1 %vm592_vm2, %v8907_v63  ;;  %6117 = vmatmul.mubr.msk.f32.gmra.mrb[140].mxu0 %vm592_vm2, %v8907_v63 }
 0x4b6   :  { %2155 = vmatprep.mubr.f32.mxu1 %v7295_v50  ;;  %2479 = vmatprep.mubr.f32.mxu0 %v7295_v50 }
 0x4b9   :  { %6046 = vmatmul.mubr.msk.f32.gmra.mrb[142].mxu1 %vm592_vm2, %v8922_v6  ;;  %6118 = vmatmul.mubr.msk.f32.gmra.mrb[142].mxu0 %vm592_vm2, %v8922_v6 }
 0x4ba   :  { %2600 = vmatprep.mubr.f32.mxu1 %v7295_v50  ;;  %2924 = vmatprep.mubr.f32.mxu0 %v7295_v50 }
 0x4bd   :  { %6167 = vmatmul.mubr.msk.f32.vlgmr.msra.gmra.mrb[144].mxu1 %vm510_vm1, %v459_v33  ;;  %6239 = vmatmul.mubr.msk.f32.vlgmr.msra.gmra.mrb[144].mxu0 %vm510_vm1, %v460_v34 }
 0x4be   :  { %2671 = vmatprep.mubr.f32.mxu1 %v7295_v50  ;;  %2995 = vmatprep.mubr.f32.mxu0 %v7295_v50 }
 0x534   :  { %v2025_v9 = vpop.f32.mrb[98].mxu1  ;;  %v2349_v31 = vpop.f32.mrb[98].mxu0 }
 0x535   :  { %6047 = vst [vmem:[%s11924_s4 + $0x5c0] sm:$0xff] %v2025_v9  ;;  %6119 = vst [vmem:[%s11924_s4 + $0x730] sm:$0xff] %v2349_v31  ;;  %v2027_v32 = vpop.f32.mrb[99].mxu1  ;;  %v2351_v10 = vpop.f32.mrb[99].mxu0 }
 0x536   :  { %6048 = vst.msk [vmem:[%s11924_s4 + $0x5c8] sm:$0xff] %vm866_vm3, %v2027_v32  ;;  %6120 = vst.msk [vmem:[%s11924_s4 + $0x738] sm:$0xff] %vm866_vm3, %v2351_v10 }
 0x538   :  { %v2031_v11 = vpop.f32.mrb[100].mxu1  ;;  %v2355_v14 = vpop.f32.mrb[100].mxu0 }
 0x539   :  { %6049 = vst [vmem:[%s11924_s4 + $0x5d0] sm:$0xff] %v2031_v11  ;;  %6121 = vst [vmem:[%s11924_s4 + $0x740] sm:$0xff] %v2355_v14  ;;  %v2033_v16 = vpop.f32.mrb[101].mxu1  ;;  %v2357_v15 = vpop.f32.mrb[101].mxu0 }
 0x53a   :  { %6050 = vst.msk [vmem:[%s11924_s4 + $0x5d8] sm:$0xff] %vm866_vm3, %v2033_v16  ;;  %6122 = vst.msk [vmem:[%s11924_s4 + $0x748] sm:$0xff] %vm866_vm3, %v2357_v15 }
 0x53c   :  { %v2037_v17 = vpop.f32.mrb[102].mxu1  ;;  %v2361_v20 = vpop.f32.mrb[102].mxu0 }
 0x53d   :  { %6051 = vst [vmem:[%s11924_s4 + $0x5e0] sm:$0xff] %v2037_v17  ;;  %6123 = vst [vmem:[%s11924_s4 + $0x750] sm:$0xff] %v2361_v20  ;;  %v2039_v21 = vpop.f32.mrb[103].mxu1  ;;  %v2363_v23 = vpop.f32.mrb[103].mxu0 }
 0x53e   :  { %6052 = vst.msk [vmem:[%s11924_s4 + $0x5e8] sm:$0xff] %vm866_vm3, %v2039_v21  ;;  %6124 = vst.msk [vmem:[%s11924_s4 + $0x758] sm:$0xff] %vm866_vm3, %v2363_v23 }
 0x540   :  { %v2043_v26 = vpop.f32.mrb[104].mxu1  ;;  %v2367_v7 = vpop.f32.mrb[104].mxu0 }
 0x541   :  { %6053 = vst [vmem:[%s11924_s4 + $0x5f0] sm:$0xff] %v2043_v26  ;;  %6125 = vst [vmem:[%s11924_s4 + $0x760] sm:$0xff] %v2367_v7  ;;  %v2045_v62 = vpop.f32.mrb[105].mxu1  ;;  %v2369_v0 = vpop.f32.mrb[105].mxu0 }
 0x542   :  { %6054 = vst.msk [vmem:[%s11924_s4 + $0x5f8] sm:$0xff] %vm866_vm3, %v2045_v62  ;;  %6126 = vst.msk [vmem:[%s11924_s4 + $0x768] sm:$0xff] %vm866_vm3, %v2369_v0 }
 0x544   :  { %v2049_v1 = vpop.f32.mrb[106].mxu1  ;;  %v2373_v45 = vpop.f32.mrb[106].mxu0 }
 0x545   :  { %6055 = vst [vmem:[%s11924_s4 + $0x600] sm:$0xff] %v2049_v1  ;;  %6127 = vst [vmem:[%s11924_s4 + $0x770] sm:$0xff] %v2373_v45  ;;  %v2051_v46 = vpop.f32.mrb[107].mxu1  ;;  %v2375_v4 = vpop.f32.mrb[107].mxu0 }
 0x546   :  { %6056 = vst.msk [vmem:[%s11924_s4 + $0x608] sm:$0xff] %vm866_vm3, %v2051_v46  ;;  %6128 = vst.msk [vmem:[%s11924_s4 + $0x778] sm:$0xff] %vm866_vm3, %v2375_v4 }
 0x548   :  { %v2055_v5 = vpop.f32.mrb[108].mxu1  ;;  %v2379_v33 = vpop.f32.mrb[108].mxu0 }
 0x549   :  { %6057 = vst [vmem:[%s11924_s4 + $0x610] sm:$0xff] %v2055_v5  ;;  %6129 = vst [vmem:[%s11924_s4 + $0x780] sm:$0xff] %v2379_v33  ;;  %v2057_v34 = vpop.f32.mrb[109].mxu1  ;;  %v2381_v9 = vpop.f32.mrb[109].mxu0 }
 0x54a   :  { %6058 = vst.msk [vmem:[%s11924_s4 + $0x618] sm:$0xff] %vm866_vm3, %v2057_v34  ;;  %6130 = vst.msk [vmem:[%s11924_s4 + $0x788] sm:$0xff] %vm866_vm3, %v2381_v9 }
 0x54c   :  { %v2061_v31 = vpop.f32.mrb[110].mxu1  ;;  %v2385_v32 = vpop.f32.mrb[110].mxu0 }
 0x54d   :  { %6059 = vst [vmem:[%s11924_s4 + $0x620] sm:$0xff] %v2061_v31  ;;  %6131 = vst [vmem:[%s11924_s4 + $0x790] sm:$0xff] %v2385_v32  ;;  %v2063_v10 = vpop.f32.mrb[111].mxu1  ;;  %v2387_v11 = vpop.f32.mrb[111].mxu0 }
 0x54e   :  { %6060 = vst.msk [vmem:[%s11924_s4 + $0x628] sm:$0xff] %vm866_vm3, %v2063_v10  ;;  %6132 = vst.msk [vmem:[%s11924_s4 + $0x798] sm:$0xff] %vm866_vm3, %v2387_v11 }
 0x550   :  { %v2067_v14 = vpop.f32.mrb[112].mxu1  ;;  %v2391_v16 = vpop.f32.mrb[112].mxu0 }
 0x551   :  { %6061 = vst [vmem:[%s11924_s4 + $0x630] sm:$0xff] %v2067_v14  ;;  %6133 = vst [vmem:[%s11924_s4 + $0x7a0] sm:$0xff] %v2391_v16  ;;  %v2069_v15 = vpop.f32.mrb[113].mxu1  ;;  %v2393_v17 = vpop.f32.mrb[113].mxu0 }
 0x552   :  { %6062 = vst.msk [vmem:[%s11924_s4 + $0x638] sm:$0xff] %vm866_vm3, %v2069_v15  ;;  %6134 = vst.msk [vmem:[%s11924_s4 + $0x7a8] sm:$0xff] %vm866_vm3, %v2393_v17 }
 0x554   :  { %v2073_v20 = vpop.f32.mrb[114].mxu1  ;;  %v2397_v21 = vpop.f32.mrb[114].mxu0 }
 0x555   :  { %6063 = vst [vmem:[%s11924_s4 + $0x640] sm:$0xff] %v2073_v20  ;;  %6135 = vst [vmem:[%s11924_s4 + $0x7b0] sm:$0xff] %v2397_v21  ;;  %v2075_v23 = vpop.f32.mrb[115].mxu1  ;;  %v2399_v26 = vpop.f32.mrb[115].mxu0 }
 0x556   :  { %6064 = vst.msk [vmem:[%s11924_s4 + $0x648] sm:$0xff] %vm866_vm3, %v2075_v23  ;;  %6136 = vst.msk [vmem:[%s11924_s4 + $0x7b8] sm:$0xff] %vm866_vm3, %v2399_v26 }
 0x558   :  { %v2079_v7 = vpop.f32.mrb[116].mxu1  ;;  %v2403_v62 = vpop.f32.mrb[116].mxu0 }
 0x559   :  { %6065 = vst [vmem:[%s11924_s4 + $0x650] sm:$0xff] %v2079_v7  ;;  %6137 = vst [vmem:[%s11924_s4 + $0x7c0] sm:$0xff] %v2403_v62  ;;  %v2081_v0 = vpop.f32.mrb[117].mxu1  ;;  %v2405_v1 = vpop.f32.mrb[117].mxu0 }
 0x55a   :  { %6066 = vst.msk [vmem:[%s11924_s4 + $0x658] sm:$0xff] %vm866_vm3, %v2081_v0  ;;  %6138 = vst.msk [vmem:[%s11924_s4 + $0x7c8] sm:$0xff] %vm866_vm3, %v2405_v1 }
 0x55c   :  { %v2085_v45 = vpop.f32.mrb[118].mxu1  ;;  %v2409_v46 = vpop.f32.mrb[118].mxu0 }
 0x55d   :  { %6067 = vst [vmem:[%s11924_s4 + $0x660] sm:$0xff] %v2085_v45  ;;  %6139 = vst [vmem:[%s11924_s4 + $0x7d0] sm:$0xff] %v2409_v46  ;;  %v2087_v4 = vpop.f32.mrb[119].mxu1  ;;  %v2411_v5 = vpop.f32.mrb[119].mxu0 }
 0x55e   :  { %6068 = vst.msk [vmem:[%s11924_s4 + $0x668] sm:$0xff] %vm866_vm3, %v2087_v4  ;;  %6140 = vst.msk [vmem:[%s11924_s4 + $0x7d8] sm:$0xff] %vm866_vm3, %v2411_v5 }
 0x560   :  { %v2091_v33 = vpop.f32.mrb[120].mxu1  ;;  %v2415_v34 = vpop.f32.mrb[120].mxu0 }
 0x561   :  { %6069 = vst [vmem:[%s11924_s4 + $0x670] sm:$0xff] %v2091_v33  ;;  %6141 = vst [vmem:[%s11924_s4 + $0x7e0] sm:$0xff] %v2415_v34  ;;  %v2093_v9 = vpop.f32.mrb[121].mxu1  ;;  %v2417_v31 = vpop.f32.mrb[121].mxu0 }
 0x562   :  { %6070 = vst.msk [vmem:[%s11924_s4 + $0x678] sm:$0xff] %vm866_vm3, %v2093_v9  ;;  %6142 = vst.msk [vmem:[%s11924_s4 + $0x7e8] sm:$0xff] %vm866_vm3, %v2417_v31 }
 0x564   :  { %v2097_v32 = vpop.f32.mrb[122].mxu1  ;;  %v2421_v10 = vpop.f32.mrb[122].mxu0 }
 0x565   :  { %6071 = vst [vmem:[%s11924_s4 + $0x680] sm:$0xff] %v2097_v32  ;;  %6143 = vst [vmem:[%s11924_s4 + $0x7f0] sm:$0xff] %v2421_v10  ;;  %v2099_v11 = vpop.f32.mrb[123].mxu1  ;;  %v2423_v14 = vpop.f32.mrb[123].mxu0 }
 0x566   :  { %6072 = vst.msk [vmem:[%s11924_s4 + $0x688] sm:$0xff] %vm866_vm3, %v2099_v11  ;;  %6144 = vst.msk [vmem:[%s11924_s4 + $0x7f8] sm:$0xff] %vm866_vm3, %v2423_v14 }
 0x568   :  { %v2103_v16 = vpop.f32.mrb[124].mxu1  ;;  %v2427_v15 = vpop.f32.mrb[124].mxu0 }
 0x569   :  { %6073 = vst [vmem:[%s11924_s4 + $0x690] sm:$0xff] %v2103_v16  ;;  %6145 = vst [vmem:[%s11924_s4 + $0x800] sm:$0xff] %v2427_v15  ;;  %v2105_v17 = vpop.f32.mrb[125].mxu1  ;;  %v2429_v20 = vpop.f32.mrb[125].mxu0 }
 0x56a   :  { %6074 = vst.msk [vmem:[%s11924_s4 + $0x698] sm:$0xff] %vm866_vm3, %v2105_v17  ;;  %6146 = vst.msk [vmem:[%s11924_s4 + $0x808] sm:$0xff] %vm866_vm3, %v2429_v20 }
 0x56c   :  { %v2109_v21 = vpop.f32.mrb[126].mxu1  ;;  %v2433_v23 = vpop.f32.mrb[126].mxu0 }
 0x56d   :  { %6075 = vst [vmem:[%s11924_s4 + $0x6a0] sm:$0xff] %v2109_v21  ;;  %6147 = vst [vmem:[%s11924_s4 + $0x810] sm:$0xff] %v2433_v23  ;;  %v2111_v26 = vpop.f32.mrb[127].mxu1  ;;  %v2435_v7 = vpop.f32.mrb[127].mxu0 }
 0x56e   :  { %6076 = vst.msk [vmem:[%s11924_s4 + $0x6a8] sm:$0xff] %vm866_vm3, %v2111_v26  ;;  %6148 = vst.msk [vmem:[%s11924_s4 + $0x818] sm:$0xff] %vm866_vm3, %v2435_v7 }
 0x570   :  { %v2115_v62 = vpop.f32.mrb[128].mxu1  ;;  %v2439_v0 = vpop.f32.mrb[128].mxu0 }
 0x571   :  { %6077 = vst [vmem:[%s11924_s4 + $0x6b0] sm:$0xff] %v2115_v62  ;;  %6149 = vst [vmem:[%s11924_s4 + $0x820] sm:$0xff] %v2439_v0  ;;  %v2117_v1 = vpop.f32.mrb[129].mxu1  ;;  %v2441_v45 = vpop.f32.mrb[129].mxu0 }
 0x572   :  { %6078 = vst.msk [vmem:[%s11924_s4 + $0x6b8] sm:$0xff] %vm866_vm3, %v2117_v1  ;;  %6150 = vst.msk [vmem:[%s11924_s4 + $0x828] sm:$0xff] %vm866_vm3, %v2441_v45 }
 0x574   :  { %v2121_v46 = vpop.f32.mrb[130].mxu1  ;;  %v2445_v4 = vpop.f32.mrb[130].mxu0 }
 0x575   :  { %6079 = vst [vmem:[%s11924_s4 + $0x6c0] sm:$0xff] %v2121_v46  ;;  %6151 = vst [vmem:[%s11924_s4 + $0x830] sm:$0xff] %v2445_v4  ;;  %v2123_v5 = vpop.f32.mrb[131].mxu1  ;;  %v2447_v33 = vpop.f32.mrb[131].mxu0 }
 0x576   :  { %6080 = vst.msk [vmem:[%s11924_s4 + $0x6c8] sm:$0xff] %vm866_vm3, %v2123_v5  ;;  %6152 = vst.msk [vmem:[%s11924_s4 + $0x838] sm:$0xff] %vm866_vm3, %v2447_v33 }
 0x578   :  { %v2127_v34 = vpop.f32.mrb[132].mxu1  ;;  %v2451_v9 = vpop.f32.mrb[132].mxu0 }
 0x579   :  { %6081 = vst [vmem:[%s11924_s4 + $0x6d0] sm:$0xff] %v2127_v34  ;;  %6153 = vst [vmem:[%s11924_s4 + $0x840] sm:$0xff] %v2451_v9  ;;  %v2129_v31 = vpop.f32.mrb[133].mxu1  ;;  %v2453_v32 = vpop.f32.mrb[133].mxu0 }
 0x57a   :  { %6082 = vst.msk [vmem:[%s11924_s4 + $0x6d8] sm:$0xff] %vm866_vm3, %v2129_v31  ;;  %6154 = vst.msk [vmem:[%s11924_s4 + $0x848] sm:$0xff] %vm866_vm3, %v2453_v32 }
 0x57c   :  { %v2133_v10 = vpop.f32.mrb[134].mxu1  ;;  %v2457_v11 = vpop.f32.mrb[134].mxu0 }
 0x57d   :  { %6083 = vst [vmem:[%s11924_s4 + $0x6e0] sm:$0xff] %v2133_v10  ;;  %6155 = vst [vmem:[%s11924_s4 + $0x850] sm:$0xff] %v2457_v11  ;;  %v2135_v14 = vpop.f32.mrb[135].mxu1  ;;  %v2459_v16 = vpop.f32.mrb[135].mxu0 }
 0x57e   :  { %6084 = vst.msk [vmem:[%s11924_s4 + $0x6e8] sm:$0xff] %vm866_vm3, %v2135_v14  ;;  %6156 = vst.msk [vmem:[%s11924_s4 + $0x858] sm:$0xff] %vm866_vm3, %v2459_v16 }
 0x580   :  { %v2139_v15 = vpop.f32.mrb[136].mxu1  ;;  %v2463_v17 = vpop.f32.mrb[136].mxu0 }
 0x581   :  { %6085 = vst [vmem:[%s11924_s4 + $0x6f0] sm:$0xff] %v2139_v15  ;;  %6157 = vst [vmem:[%s11924_s4 + $0x860] sm:$0xff] %v2463_v17  ;;  %v2141_v20 = vpop.f32.mrb[137].mxu1  ;;  %v2465_v21 = vpop.f32.mrb[137].mxu0 }
 0x582   :  { %6086 = vst.msk [vmem:[%s11924_s4 + $0x6f8] sm:$0xff] %vm866_vm3, %v2141_v20  ;;  %6158 = vst.msk [vmem:[%s11924_s4 + $0x868] sm:$0xff] %vm866_vm3, %v2465_v21 }
 0x584   :  { %v2145_v23 = vpop.f32.mrb[138].mxu1  ;;  %v2469_v26 = vpop.f32.mrb[138].mxu0 }
 0x585   :  { %6087 = vst [vmem:[%s11924_s4 + $0x700] sm:$0xff] %v2145_v23  ;;  %6159 = vst [vmem:[%s11924_s4 + $0x870] sm:$0xff] %v2469_v26  ;;  %v2147_v7 = vpop.f32.mrb[139].mxu1  ;;  %v2471_v62 = vpop.f32.mrb[139].mxu0 }
 0x586   :  { %6088 = vst.msk [vmem:[%s11924_s4 + $0x708] sm:$0xff] %vm866_vm3, %v2147_v7  ;;  %6160 = vst.msk [vmem:[%s11924_s4 + $0x878] sm:$0xff] %vm866_vm3, %v2471_v62 }
 0x588   :  { %v2151_v0 = vpop.f32.mrb[140].mxu1  ;;  %v2475_v1 = vpop.f32.mrb[140].mxu0 }
 0x589   :  { %6089 = vst [vmem:[%s11924_s4 + $0x710] sm:$0xff] %v2151_v0  ;;  %6161 = vst [vmem:[%s11924_s4 + $0x880] sm:$0xff] %v2475_v1  ;;  %v2153_v45 = vpop.f32.mrb[141].mxu1  ;;  %v2477_v46 = vpop.f32.mrb[141].mxu0 }
 0x58a   :  { %6090 = vst.msk [vmem:[%s11924_s4 + $0x718] sm:$0xff] %vm866_vm3, %v2153_v45  ;;  %6162 = vst.msk [vmem:[%s11924_s4 + $0x888] sm:$0xff] %vm866_vm3, %v2477_v46 }
 0x58c   :  { %v2157_v4 = vpop.f32.mrb[142].mxu1  ;;  %v2481_v5 = vpop.f32.mrb[142].mxu0 }
 0x58d   :  { %6091 = vst [vmem:[%s11924_s4 + $0x720] sm:$0x3] %v2157_v4  ;;  %6163 = vst [vmem:[%s11924_s4 + $0x890] sm:$0x3] %v2481_v5  ;;  %v2159_v33 = vpop.f32.mrb[143].mxu1  ;;  %v2483_v34 = vpop.f32.mrb[143].mxu0 }
 0x58e   :  { %6092 = vst.msk [vmem:[%s11924_s4 + $0x728] sm:$0x3] %vm911_vm4, %v2159_v33  ;;  %6164 = vst.msk [vmem:[%s11924_s4 + $0x898] sm:$0x3] %vm911_vm4, %v2483_v34 }
 0x590   :  { %v2602_v9 = vpop.f32.mrb[144].mxu1  ;;  %v2926_v31 = vpop.f32.mrb[144].mxu0 }
 0x591   :  { %v2604_v32 = vpop.f32.mrb[145].mxu1  ;;  %v2928_v10 = vpop.f32.mrb[145].mxu0 }
 0x592   :  { %2607 = vmatprep.subr.mxu1 %v2604_v32  ;;  %2931 = vmatprep.subr.mxu0 %v2928_v10 }
 0x593   :  { %2608 = vmatpush1.msra.mxu1 %v2602_v9  ;;  %2932 = vmatpush1.msra.mxu0 %v2926_v31 }
 0x594   :  { %6168 = vmatmul.mubr.msk.f32.vlgmr.msra.gmra.mrb[146].mxu1 %vm592_vm2, %v8652_v28  ;;  %6240 = vmatmul.mubr.msk.f32.vlgmr.msra.gmra.mrb[146].mxu0 %vm592_vm2, %v8652_v28  ;;  %v9302_v28 = vld [vmem:[#allocation4 + $0x88] sm:$0x3] }
 0x595   :  { %7014 = vmatprep.subr.bf16.mxu1 %v7350_v8  ;;  %7030 = vmatprep.subr.bf16.mxu0 %v7350_v8 }
 0x596   :  { %2677 = vmatprep.mubr.f32.mxu1 %v7295_v50  ;;  %3001 = vmatprep.mubr.f32.mxu0 %v7295_v50 }
 0x597   :  { %7016 = vmatpush1.bf16.msra.mxu1 %v7352_v12  ;;  %7032 = vmatpush1.bf16.msra.mxu0 %v7352_v12 }
 0x598   :  { %6169 = vmatmul.mubr.msk.f32.gmra.mrb[148].mxu1 %vm592_vm2, %v8667_v30  ;;  %6241 = vmatmul.mubr.msk.f32.gmra.mrb[148].mxu0 %vm592_vm2, %v8667_v30  ;;  %v9308_v30 = vld [vmem:[#allocation4 + $0x80] sm:$0x3] }
 0x599   :  { %2683 = vmatprep.mubr.f32.mxu1 %v7295_v50  ;;  %3007 = vmatprep.mubr.f32.mxu0 %v7295_v50 }
 0x59a   :  { %7018 = vmatprep.subr.bf16.mxu1 %v7354_v13  ;;  %7034 = vmatprep.subr.bf16.mxu0 %v7354_v13 }
 0x59b   :  { %7020 = vmatpush1.bf16.msra.mxu1 %v7360_v18  ;;  %7036 = vmatpush1.bf16.msra.mxu0 %v7360_v18 }
 0x59c   :  { %6170 = vmatmul.mubr.msk.f32.gmra.mrb[150].mxu1 %vm592_vm2, %v8682_v47  ;;  %6242 = vmatmul.mubr.msk.f32.gmra.mrb[150].mxu0 %vm592_vm2, %v8682_v47  ;;  %v322_v47 = vpop.permute.xlu1 %321 }
 0x59d   :  { %2689 = vmatprep.mubr.f32.mxu1 %v7295_v50  ;;  %3013 = vmatprep.mubr.f32.mxu0 %v7295_v50 }
 0x59e   :  { %7022 = vmatprep.subr.bf16.mxu1 %v7364_v19  ;;  %7038 = vmatprep.subr.bf16.mxu0 %v7364_v19 }
 0x59f   :  { %7024 = vmatpush1.bf16.msra.mxu1 %v7368_v22  ;;  %7040 = vmatpush1.bf16.msra.mxu0 %v7368_v22 }
 0x5a0   :  { %6171 = vmatmul.mubr.msk.f32.gmra.mrb[152].mxu1 %vm592_vm2, %v8697_v51  ;;  %6243 = vmatmul.mubr.msk.f32.gmra.mrb[152].mxu0 %vm592_vm2, %v8697_v51  ;;  %v324_v51 = vpop.permute.xlu0 %323 }
 0x5a1   :  { %2695 = vmatprep.mubr.f32.mxu1 %v7295_v50  ;;  %3019 = vmatprep.mubr.f32.mxu0 %v7295_v50 }
 0x5a2   :  { %7026 = vmatprep.subr.bf16.mxu1 %v7374_v37  ;;  %7042 = vmatprep.subr.bf16.mxu0 %v7374_v37 }
 0x5a3   :  { %7028 = vmatpush1.bf16.msra.mxu1 %v7376_v39  ;;  %7044 = vmatpush1.bf16.msra.mxu0 %v7376_v39 }
 0x5a4   :  { %6172 = vmatmul.mubr.msk.f32.gmra.mrb[154].mxu1 %vm592_vm2, %v8712_v58  ;;  %6244 = vmatmul.mubr.msk.f32.gmra.mrb[154].mxu0 %vm592_vm2, %v8712_v58  ;;  %v261_v58 = vadd.f32 %v7534_v27, %v7454_v35 }
 0x5a5   :  { %2701 = vmatprep.mubr.f32.mxu1 %v7295_v50  ;;  %3025 = vmatprep.mubr.f32.mxu0 %v7295_v50 }
 0x5a6   :  { %6309 = vmatprep.subr.msk.mxu1 %vm514_vm0, %v9302_v28  ;;  %6381 = vmatprep.subr.msk.mxu0 %vm514_vm0, %v9302_v28 }
 0x5a7   :  { %6310 = vmatpush1.msk.msra.mxu1 %vm514_vm0, %v9308_v30  ;;  %6382 = vmatpush1.msk.msra.mxu0 %vm514_vm0, %v9308_v30 }
 0x5a8   :  { %6173 = vmatmul.mubr.msk.f32.gmra.mrb[156].mxu1 %vm592_vm2, %v8731_v48  ;;  %6245 = vmatmul.mubr.msk.f32.gmra.mrb[156].mxu0 %vm592_vm2, %v8731_v48  ;;  %v262_v48 = vadd.f32 %v7534_v27, %v7457_v36 }
 0x5a9   :  { %2707 = vmatprep.mubr.f32.mxu1 %v7295_v50  ;;  %3031 = vmatprep.mubr.f32.mxu0 %v7295_v50 }
 0x5ac   :  { %6174 = vmatmul.mubr.msk.f32.gmra.mrb[158].mxu1 %vm592_vm2, %v8742_v60  ;;  %6246 = vmatmul.mubr.msk.f32.gmra.mrb[158].mxu0 %vm592_vm2, %v8742_v60  ;;  %v422_v60 = vpop.permute.xlu1 %421 }
 0x5ad   :  { %2713 = vmatprep.mubr.f32.mxu1 %v7295_v50  ;;  %3037 = vmatprep.mubr.f32.mxu0 %v7295_v50 }
 0x5b0   :  { %6175 = vmatmul.mubr.msk.f32.gmra.mrb[160].mxu1 %vm592_vm2, %v8753_v61  ;;  %6247 = vmatmul.mubr.msk.f32.gmra.mrb[160].mxu0 %vm592_vm2, %v8753_v61  ;;  %v424_v61 = vpop.permute.xlu0 %423 }
 0x5b1   :  { %2719 = vmatprep.mubr.f32.mxu1 %v7295_v50  ;;  %3043 = vmatprep.mubr.f32.mxu0 %v7295_v50 }
 0x5b4   :  { %6176 = vmatmul.mubr.msk.f32.gmra.mrb[162].mxu1 %vm592_vm2, %v8764_v49  ;;  %6248 = vmatmul.mubr.msk.f32.gmra.mrb[162].mxu0 %vm592_vm2, %v8764_v49  ;;  %v361_v49 = vadd.f32 %v322_v47, %v261_v58 }
 0x5b5   :  { %2725 = vmatprep.mubr.f32.mxu1 %v7295_v50  ;;  %3049 = vmatprep.mubr.f32.mxu0 %v7295_v50 }
 0x5b8   :  { %6177 = vmatmul.mubr.msk.f32.gmra.mrb[164].mxu1 %vm592_vm2, %v8775_v2  ;;  %6249 = vmatmul.mubr.msk.f32.gmra.mrb[164].mxu0 %vm592_vm2, %v8775_v2  ;;  %v362_v2 = vadd.f32 %v324_v51, %v262_v48 }
 0x5b9   :  { %2731 = vmatprep.mubr.f32.mxu1 %v7295_v50  ;;  %3055 = vmatprep.mubr.f32.mxu0 %v7295_v50 }
 0x5bc   :  { %6178 = vmatmul.mubr.msk.f32.gmra.mrb[166].mxu1 %vm592_vm2, %v8786_v59  ;;  %6250 = vmatmul.mubr.msk.f32.gmra.mrb[166].mxu0 %vm592_vm2, %v8786_v59  ;;  %v461_v59 = vadd.f32 %v422_v60, %v361_v49 }
 0x5bd   :  { %2737 = vmatprep.mubr.f32.mxu1 %v7295_v50  ;;  %3061 = vmatprep.mubr.f32.mxu0 %v7295_v50 }
 0x5c0   :  { %6179 = vmatmul.mubr.msk.f32.gmra.mrb[168].mxu1 %vm592_vm2, %v8797_v24  ;;  %6251 = vmatmul.mubr.msk.f32.gmra.mrb[168].mxu0 %vm592_vm2, %v8797_v24  ;;  %v462_v24 = vadd.f32 %v424_v61, %v362_v2 }
 0x5c1   :  { %2743 = vmatprep.mubr.f32.mxu1 %v7295_v50  ;;  %3067 = vmatprep.mubr.f32.mxu0 %v7295_v50 }
 0x5c4   :  { %6180 = vmatmul.mubr.msk.f32.gmra.mrb[170].mxu1 %vm592_vm2, %v8808_v25  ;;  %6252 = vmatmul.mubr.msk.f32.gmra.mrb[170].mxu0 %vm592_vm2, %v8808_v25 }
 0x5c5   :  { %2749 = vmatprep.mubr.f32.mxu1 %v7295_v50  ;;  %3073 = vmatprep.mubr.f32.mxu0 %v7295_v50 }
 0x5c8   :  { %6181 = vmatmul.mubr.msk.f32.gmra.mrb[172].mxu1 %vm592_vm2, %v8819_v54  ;;  %6253 = vmatmul.mubr.msk.f32.gmra.mrb[172].mxu0 %vm592_vm2, %v8819_v54 }
 0x5c9   :  { %2755 = vmatprep.mubr.f32.mxu1 %v7295_v50  ;;  %3079 = vmatprep.mubr.f32.mxu0 %v7295_v50 }
 0x5cc   :  { %6182 = vmatmul.mubr.msk.f32.gmra.mrb[174].mxu1 %vm592_vm2, %v8830_v29  ;;  %6254 = vmatmul.mubr.msk.f32.gmra.mrb[174].mxu0 %vm592_vm2, %v8830_v29 }
 0x5cd   :  { %2761 = vmatprep.mubr.f32.mxu1 %v7295_v50  ;;  %3085 = vmatprep.mubr.f32.mxu0 %v7295_v50 }
 0x5d0   :  { %6183 = vmatmul.mubr.msk.f32.gmra.mrb[176].mxu1 %vm592_vm2, %v8841_v38  ;;  %6255 = vmatmul.mubr.msk.f32.gmra.mrb[176].mxu0 %vm592_vm2, %v8841_v38 }
 0x5d1   :  { %2767 = vmatprep.mubr.f32.mxu1 %v7295_v50  ;;  %3091 = vmatprep.mubr.f32.mxu0 %v7295_v50 }
 0x5d4   :  { %6184 = vmatmul.mubr.msk.f32.gmra.mrb[178].mxu1 %vm592_vm2, %v8852_v41  ;;  %6256 = vmatmul.mubr.msk.f32.gmra.mrb[178].mxu0 %vm592_vm2, %v8852_v41 }
 0x5d5   :  { %2773 = vmatprep.mubr.f32.mxu1 %v7295_v50  ;;  %3097 = vmatprep.mubr.f32.mxu0 %v7295_v50 }
 0x5d8   :  { %6185 = vmatmul.mubr.msk.f32.gmra.mrb[180].mxu1 %vm592_vm2, %v8863_v42  ;;  %6257 = vmatmul.mubr.msk.f32.gmra.mrb[180].mxu0 %vm592_vm2, %v8863_v42 }
 0x5d9   :  { %2779 = vmatprep.mubr.f32.mxu1 %v7295_v50  ;;  %3103 = vmatprep.mubr.f32.mxu0 %v7295_v50 }
 0x5dc   :  { %6186 = vmatmul.mubr.msk.f32.gmra.mrb[182].mxu1 %vm592_vm2, %v8874_v43  ;;  %6258 = vmatmul.mubr.msk.f32.gmra.mrb[182].mxu0 %vm592_vm2, %v8874_v43 }
 0x5dd   :  { %2785 = vmatprep.mubr.f32.mxu1 %v7295_v50  ;;  %3109 = vmatprep.mubr.f32.mxu0 %v7295_v50 }
 0x5e0   :  { %6187 = vmatmul.mubr.msk.f32.gmra.mrb[184].mxu1 %vm592_vm2, %v8885_v3  ;;  %6259 = vmatmul.mubr.msk.f32.gmra.mrb[184].mxu0 %vm592_vm2, %v8885_v3 }
 0x5e1   :  { %2791 = vmatprep.mubr.f32.mxu1 %v7295_v50  ;;  %3115 = vmatprep.mubr.f32.mxu0 %v7295_v50 }
 0x5e4   :  { %6188 = vmatmul.mubr.msk.f32.gmra.mrb[186].mxu1 %vm592_vm2, %v8896_v44  ;;  %6260 = vmatmul.mubr.msk.f32.gmra.mrb[186].mxu0 %vm592_vm2, %v8896_v44 }
 0x5e5   :  { %2797 = vmatprep.mubr.f32.mxu1 %v7295_v50  ;;  %3121 = vmatprep.mubr.f32.mxu0 %v7295_v50 }
 0x5e8   :  { %6189 = vmatmul.mubr.msk.f32.gmra.mrb[188].mxu1 %vm592_vm2, %v8907_v63  ;;  %6261 = vmatmul.mubr.msk.f32.gmra.mrb[188].mxu0 %vm592_vm2, %v8907_v63 }
 0x5e9   :  { %2803 = vmatprep.mubr.f32.mxu1 %v7295_v50  ;;  %3127 = vmatprep.mubr.f32.mxu0 %v7295_v50 }
 0x5ec   :  { %6190 = vmatmul.mubr.msk.f32.gmra.mrb[190].mxu1 %vm592_vm2, %v8922_v6  ;;  %6262 = vmatmul.mubr.msk.f32.gmra.mrb[190].mxu0 %vm592_vm2, %v8922_v6 }
 0x5ed   :  { %3248 = vmatprep.mubr.f32.mxu1 %v7295_v50  ;;  %3572 = vmatprep.mubr.f32.mxu0 %v7295_v50 }
 0x5f0   :  { %6311 = vmatmul.mubr.msk.f32.vlgmr.msra.gmra.mrb[192].mxu1 %vm510_vm1, %v461_v59  ;;  %6383 = vmatmul.mubr.msk.f32.vlgmr.msra.gmra.mrb[192].mxu0 %vm510_vm1, %v462_v24 }
 0x5f1   :  { %3319 = vmatprep.mubr.f32.mxu1 %v7295_v50  ;;  %3643 = vmatprep.mubr.f32.mxu0 %v7295_v50 }
 0x667   :  { %v2673_v35 = vpop.f32.mrb[146].mxu1  ;;  %v2997_v36 = vpop.f32.mrb[146].mxu0 }
 0x668   :  { %6191 = vst [vmem:[%s11924_s4 + $0x8a0] sm:$0xff] %v2673_v35  ;;  %6263 = vst [vmem:[%s11924_s4 + $0xa10] sm:$0xff] %v2997_v36  ;;  %v2675_v25 = vpop.f32.mrb[147].mxu1  ;;  %v2999_v54 = vpop.f32.mrb[147].mxu0 }
 0x669   :  { %6192 = vst.msk [vmem:[%s11924_s4 + $0x8a8] sm:$0xff] %vm866_vm3, %v2675_v25  ;;  %6264 = vst.msk [vmem:[%s11924_s4 + $0xa18] sm:$0xff] %vm866_vm3, %v2999_v54 }
 0x66b   :  { %v2679_v29 = vpop.f32.mrb[148].mxu1  ;;  %v3003_v38 = vpop.f32.mrb[148].mxu0 }
 0x66c   :  { %6193 = vst [vmem:[%s11924_s4 + $0x8b0] sm:$0xff] %v2679_v29  ;;  %6265 = vst [vmem:[%s11924_s4 + $0xa20] sm:$0xff] %v3003_v38  ;;  %v2681_v41 = vpop.f32.mrb[149].mxu1  ;;  %v3005_v42 = vpop.f32.mrb[149].mxu0 }
 0x66d   :  { %6194 = vst.msk [vmem:[%s11924_s4 + $0x8b8] sm:$0xff] %vm866_vm3, %v2681_v41  ;;  %6266 = vst.msk [vmem:[%s11924_s4 + $0xa28] sm:$0xff] %vm866_vm3, %v3005_v42 }
 0x66f   :  { %v2685_v43 = vpop.f32.mrb[150].mxu1  ;;  %v3009_v3 = vpop.f32.mrb[150].mxu0 }
 0x670   :  { %6195 = vst [vmem:[%s11924_s4 + $0x8c0] sm:$0xff] %v2685_v43  ;;  %6267 = vst [vmem:[%s11924_s4 + $0xa30] sm:$0xff] %v3009_v3  ;;  %v2687_v44 = vpop.f32.mrb[151].mxu1  ;;  %v3011_v63 = vpop.f32.mrb[151].mxu0 }
 0x671   :  { %6196 = vst.msk [vmem:[%s11924_s4 + $0x8c8] sm:$0xff] %vm866_vm3, %v2687_v44  ;;  %6268 = vst.msk [vmem:[%s11924_s4 + $0xa38] sm:$0xff] %vm866_vm3, %v3011_v63 }
 0x673   :  { %v2691_v6 = vpop.f32.mrb[152].mxu1  ;;  %v3015_v11 = vpop.f32.mrb[152].mxu0 }
 0x674   :  { %6197 = vst [vmem:[%s11924_s4 + $0x8d0] sm:$0xff] %v2691_v6  ;;  %6269 = vst [vmem:[%s11924_s4 + $0xa40] sm:$0xff] %v3015_v11  ;;  %v2693_v14 = vpop.f32.mrb[153].mxu1  ;;  %v3017_v16 = vpop.f32.mrb[153].mxu0 }
 0x675   :  { %6198 = vst.msk [vmem:[%s11924_s4 + $0x8d8] sm:$0xff] %vm866_vm3, %v2693_v14  ;;  %6270 = vst.msk [vmem:[%s11924_s4 + $0xa48] sm:$0xff] %vm866_vm3, %v3017_v16 }
 0x677   :  { %v2697_v15 = vpop.f32.mrb[154].mxu1  ;;  %v3021_v17 = vpop.f32.mrb[154].mxu0 }
 0x678   :  { %6199 = vst [vmem:[%s11924_s4 + $0x8e0] sm:$0xff] %v2697_v15  ;;  %6271 = vst [vmem:[%s11924_s4 + $0xa50] sm:$0xff] %v3021_v17  ;;  %v2699_v20 = vpop.f32.mrb[155].mxu1  ;;  %v3023_v21 = vpop.f32.mrb[155].mxu0 }
 0x679   :  { %6200 = vst.msk [vmem:[%s11924_s4 + $0x8e8] sm:$0xff] %vm866_vm3, %v2699_v20  ;;  %6272 = vst.msk [vmem:[%s11924_s4 + $0xa58] sm:$0xff] %vm866_vm3, %v3023_v21 }
 0x67b   :  { %v2703_v23 = vpop.f32.mrb[156].mxu1  ;;  %v3027_v26 = vpop.f32.mrb[156].mxu0 }
 0x67c   :  { %6201 = vst [vmem:[%s11924_s4 + $0x8f0] sm:$0xff] %v2703_v23  ;;  %6273 = vst [vmem:[%s11924_s4 + $0xa60] sm:$0xff] %v3027_v26  ;;  %v2705_v7 = vpop.f32.mrb[157].mxu1  ;;  %v3029_v62 = vpop.f32.mrb[157].mxu0 }
 0x67d   :  { %6202 = vst.msk [vmem:[%s11924_s4 + $0x8f8] sm:$0xff] %vm866_vm3, %v2705_v7  ;;  %6274 = vst.msk [vmem:[%s11924_s4 + $0xa68] sm:$0xff] %vm866_vm3, %v3029_v62 }
 0x67f   :  { %v2709_v0 = vpop.f32.mrb[158].mxu1  ;;  %v3033_v1 = vpop.f32.mrb[158].mxu0 }
 0x680   :  { %6203 = vst [vmem:[%s11924_s4 + $0x900] sm:$0xff] %v2709_v0  ;;  %6275 = vst [vmem:[%s11924_s4 + $0xa70] sm:$0xff] %v3033_v1  ;;  %v2711_v45 = vpop.f32.mrb[159].mxu1  ;;  %v3035_v46 = vpop.f32.mrb[159].mxu0 }
 0x681   :  { %6204 = vst.msk [vmem:[%s11924_s4 + $0x908] sm:$0xff] %vm866_vm3, %v2711_v45  ;;  %6276 = vst.msk [vmem:[%s11924_s4 + $0xa78] sm:$0xff] %vm866_vm3, %v3035_v46 }
 0x683   :  { %v2715_v4 = vpop.f32.mrb[160].mxu1  ;;  %v3039_v5 = vpop.f32.mrb[160].mxu0 }
 0x684   :  { %6205 = vst [vmem:[%s11924_s4 + $0x910] sm:$0xff] %v2715_v4  ;;  %6277 = vst [vmem:[%s11924_s4 + $0xa80] sm:$0xff] %v3039_v5  ;;  %v2717_v33 = vpop.f32.mrb[161].mxu1  ;;  %v3041_v34 = vpop.f32.mrb[161].mxu0 }
 0x685   :  { %6206 = vst.msk [vmem:[%s11924_s4 + $0x918] sm:$0xff] %vm866_vm3, %v2717_v33  ;;  %6278 = vst.msk [vmem:[%s11924_s4 + $0xa88] sm:$0xff] %vm866_vm3, %v3041_v34 }
 0x687   :  { %v2721_v9 = vpop.f32.mrb[162].mxu1  ;;  %v3045_v31 = vpop.f32.mrb[162].mxu0 }
 0x688   :  { %6207 = vst [vmem:[%s11924_s4 + $0x920] sm:$0xff] %v2721_v9  ;;  %6279 = vst [vmem:[%s11924_s4 + $0xa90] sm:$0xff] %v3045_v31  ;;  %v2723_v32 = vpop.f32.mrb[163].mxu1  ;;  %v3047_v10 = vpop.f32.mrb[163].mxu0 }
 0x689   :  { %6208 = vst.msk [vmem:[%s11924_s4 + $0x928] sm:$0xff] %vm866_vm3, %v2723_v32  ;;  %6280 = vst.msk [vmem:[%s11924_s4 + $0xa98] sm:$0xff] %vm866_vm3, %v3047_v10 }
 0x68b   :  { %v2727_v47 = vpop.f32.mrb[164].mxu1  ;;  %v3051_v51 = vpop.f32.mrb[164].mxu0 }
 0x68c   :  { %6209 = vst [vmem:[%s11924_s4 + $0x930] sm:$0xff] %v2727_v47  ;;  %6281 = vst [vmem:[%s11924_s4 + $0xaa0] sm:$0xff] %v3051_v51  ;;  %v2729_v58 = vpop.f32.mrb[165].mxu1  ;;  %v3053_v48 = vpop.f32.mrb[165].mxu0 }
 0x68d   :  { %6210 = vst.msk [vmem:[%s11924_s4 + $0x938] sm:$0xff] %vm866_vm3, %v2729_v58  ;;  %6282 = vst.msk [vmem:[%s11924_s4 + $0xaa8] sm:$0xff] %vm866_vm3, %v3053_v48 }
 0x68f   :  { %v2733_v60 = vpop.f32.mrb[166].mxu1  ;;  %v3057_v61 = vpop.f32.mrb[166].mxu0 }
 0x690   :  { %6211 = vst [vmem:[%s11924_s4 + $0x940] sm:$0xff] %v2733_v60  ;;  %6283 = vst [vmem:[%s11924_s4 + $0xab0] sm:$0xff] %v3057_v61  ;;  %v2735_v49 = vpop.f32.mrb[167].mxu1  ;;  %v3059_v2 = vpop.f32.mrb[167].mxu0 }
 0x691   :  { %6212 = vst.msk [vmem:[%s11924_s4 + $0x948] sm:$0xff] %vm866_vm3, %v2735_v49  ;;  %6284 = vst.msk [vmem:[%s11924_s4 + $0xab8] sm:$0xff] %vm866_vm3, %v3059_v2 }
 0x693   :  { %v2739_v59 = vpop.f32.mrb[168].mxu1  ;;  %v3063_v24 = vpop.f32.mrb[168].mxu0 }
 0x694   :  { %6213 = vst [vmem:[%s11924_s4 + $0x950] sm:$0xff] %v2739_v59  ;;  %6285 = vst [vmem:[%s11924_s4 + $0xac0] sm:$0xff] %v3063_v24  ;;  %v2741_v35 = vpop.f32.mrb[169].mxu1  ;;  %v3065_v36 = vpop.f32.mrb[169].mxu0 }
 0x695   :  { %6214 = vst.msk [vmem:[%s11924_s4 + $0x958] sm:$0xff] %vm866_vm3, %v2741_v35  ;;  %6286 = vst.msk [vmem:[%s11924_s4 + $0xac8] sm:$0xff] %vm866_vm3, %v3065_v36 }
 0x697   :  { %v2745_v25 = vpop.f32.mrb[170].mxu1  ;;  %v3069_v54 = vpop.f32.mrb[170].mxu0 }
 0x698   :  { %6215 = vst [vmem:[%s11924_s4 + $0x960] sm:$0xff] %v2745_v25  ;;  %6287 = vst [vmem:[%s11924_s4 + $0xad0] sm:$0xff] %v3069_v54  ;;  %v2747_v29 = vpop.f32.mrb[171].mxu1  ;;  %v3071_v38 = vpop.f32.mrb[171].mxu0 }
 0x699   :  { %6216 = vst.msk [vmem:[%s11924_s4 + $0x968] sm:$0xff] %vm866_vm3, %v2747_v29  ;;  %6288 = vst.msk [vmem:[%s11924_s4 + $0xad8] sm:$0xff] %vm866_vm3, %v3071_v38  ;;  %v9755_v29 = vld [vmem:[%s11922_s2] sm:$0xff]  ;;  %v9770_v38 = vld [vmem:[%s11922_s2 + $0x8] sm:$0xff] }
 0x69b   :  { %v2751_v41 = vpop.f32.mrb[172].mxu1  ;;  %v3075_v42 = vpop.f32.mrb[172].mxu0 }
 0x69c   :  { %6217 = vst [vmem:[%s11924_s4 + $0x970] sm:$0xff] %v2751_v41  ;;  %6289 = vst [vmem:[%s11924_s4 + $0xae0] sm:$0xff] %v3075_v42  ;;  %v2753_v43 = vpop.f32.mrb[173].mxu1  ;;  %v3077_v3 = vpop.f32.mrb[173].mxu0  ;;  %v9785_v41 = vld [vmem:[%s11922_s2 + $0x10] sm:$0xff]  ;;  %v9800_v42 = vld [vmem:[%s11922_s2 + $0x18] sm:$0xff] }
 0x69d   :  { %6218 = vst.msk [vmem:[%s11924_s4 + $0x978] sm:$0xff] %vm866_vm3, %v2753_v43  ;;  %6290 = vst.msk [vmem:[%s11924_s4 + $0xae8] sm:$0xff] %vm866_vm3, %v3077_v3  ;;  %v9815_v43 = vld [vmem:[%s11922_s2 + $0x20] sm:$0xff]  ;;  %v9834_v3 = vld [vmem:[%s11922_s2 + $0x28] sm:$0xff] }
 0x69f   :  { %v2757_v44 = vpop.f32.mrb[174].mxu1  ;;  %v3081_v63 = vpop.f32.mrb[174].mxu0 }
 0x6a0   :  { %6219 = vst [vmem:[%s11924_s4 + $0x980] sm:$0xff] %v2757_v44  ;;  %6291 = vst [vmem:[%s11924_s4 + $0xaf0] sm:$0xff] %v3081_v63  ;;  %v2759_v6 = vpop.f32.mrb[175].mxu1  ;;  %v3083_v11 = vpop.f32.mrb[175].mxu0  ;;  %v9867_v44 = vld [vmem:[%s11922_s2 + $0x40] sm:$0xff]  ;;  %v9878_v63 = vld [vmem:[%s11922_s2 + $0x48] sm:$0xff] }
 0x6a1   :  { %6220 = vst.msk [vmem:[%s11924_s4 + $0x988] sm:$0xff] %vm866_vm3, %v2759_v6  ;;  %6292 = vst.msk [vmem:[%s11924_s4 + $0xaf8] sm:$0xff] %vm866_vm3, %v3083_v11  ;;  %v9889_v6 = vld [vmem:[%s11922_s2 + $0x50] sm:$0xff]  ;;  %v9900_v11 = vld [vmem:[%s11922_s2 + $0x58] sm:$0xff] }
 0x6a3   :  { %v2763_v14 = vpop.f32.mrb[176].mxu1  ;;  %v3087_v16 = vpop.f32.mrb[176].mxu0 }
 0x6a4   :  { %6221 = vst [vmem:[%s11924_s4 + $0x990] sm:$0xff] %v2763_v14  ;;  %6293 = vst [vmem:[%s11924_s4 + $0xb00] sm:$0xff] %v3087_v16  ;;  %v2765_v15 = vpop.f32.mrb[177].mxu1  ;;  %v3089_v17 = vpop.f32.mrb[177].mxu0  ;;  %v9911_v14 = vld [vmem:[%s11922_s2 + $0x60] sm:$0xff]  ;;  %v9922_v16 = vld [vmem:[%s11922_s2 + $0x68] sm:$0xff] }
 0x6a5   :  { %6222 = vst.msk [vmem:[%s11924_s4 + $0x998] sm:$0xff] %vm866_vm3, %v2765_v15  ;;  %6294 = vst.msk [vmem:[%s11924_s4 + $0xb08] sm:$0xff] %vm866_vm3, %v3089_v17  ;;  %v9933_v15 = vld [vmem:[%s11922_s2 + $0x70] sm:$0xff]  ;;  %v9944_v17 = vld [vmem:[%s11922_s2 + $0x78] sm:$0xff] }
 0x6a7   :  { %v2769_v20 = vpop.f32.mrb[178].mxu1  ;;  %v3093_v21 = vpop.f32.mrb[178].mxu0 }
 0x6a8   :  { %6223 = vst [vmem:[%s11924_s4 + $0x9a0] sm:$0xff] %v2769_v20  ;;  %6295 = vst [vmem:[%s11924_s4 + $0xb10] sm:$0xff] %v3093_v21  ;;  %v2771_v23 = vpop.f32.mrb[179].mxu1  ;;  %v3095_v26 = vpop.f32.mrb[179].mxu0  ;;  %v9955_v20 = vld [vmem:[%s11922_s2 + $0x80] sm:$0xff]  ;;  %v9966_v21 = vld [vmem:[%s11922_s2 + $0x88] sm:$0xff] }
 0x6a9   :  { %6224 = vst.msk [vmem:[%s11924_s4 + $0x9a8] sm:$0xff] %vm866_vm3, %v2771_v23  ;;  %6296 = vst.msk [vmem:[%s11924_s4 + $0xb18] sm:$0xff] %vm866_vm3, %v3095_v26  ;;  %v9977_v23 = vld [vmem:[%s11922_s2 + $0x90] sm:$0xff]  ;;  %v9988_v26 = vld [vmem:[%s11922_s2 + $0x98] sm:$0xff] }
 0x6ab   :  { %v2775_v7 = vpop.f32.mrb[180].mxu1  ;;  %v3099_v62 = vpop.f32.mrb[180].mxu0 }
 0x6ac   :  { %6225 = vst [vmem:[%s11924_s4 + $0x9b0] sm:$0xff] %v2775_v7  ;;  %6297 = vst [vmem:[%s11924_s4 + $0xb20] sm:$0xff] %v3099_v62  ;;  %v2777_v0 = vpop.f32.mrb[181].mxu1  ;;  %v3101_v1 = vpop.f32.mrb[181].mxu0  ;;  %v9999_v7 = vld [vmem:[%s11922_s2 + $0xa0] sm:$0xff] }
 0x6ad   :  { %6226 = vst.msk [vmem:[%s11924_s4 + $0x9b8] sm:$0xff] %vm866_vm3, %v2777_v0  ;;  %6298 = vst.msk [vmem:[%s11924_s4 + $0xb28] sm:$0xff] %vm866_vm3, %v3101_v1  ;;  %v326_v62 = vpop.permute.xlu1 %325  ;;  %v328_v0 = vpop.permute.xlu0 %327  ;;  %v10010_v1 = vld [vmem:[%s11922_s2 + $0xa8] sm:$0xff] }
 0x6af   :  { %v2781_v45 = vpop.f32.mrb[182].mxu1  ;;  %v3105_v46 = vpop.f32.mrb[182].mxu0 }
 0x6b0   :  { %6227 = vst [vmem:[%s11924_s4 + $0x9c0] sm:$0xff] %v2781_v45  ;;  %6299 = vst [vmem:[%s11924_s4 + $0xb30] sm:$0xff] %v3105_v46  ;;  %v2783_v4 = vpop.f32.mrb[183].mxu1  ;;  %v3107_v5 = vpop.f32.mrb[183].mxu0  ;;  %v263_v45 = vadd.f32 %v7534_v27, %v7467_v52  ;;  %v264_v46 = vadd.f32 %v7534_v27, %v7470_v53 }
 0x6b1   :  { %6228 = vst.msk [vmem:[%s11924_s4 + $0x9c8] sm:$0xff] %vm866_vm3, %v2783_v4  ;;  %6300 = vst.msk [vmem:[%s11924_s4 + $0xb38] sm:$0xff] %vm866_vm3, %v3107_v5  ;;  %v426_v4 = vpop.permute.xlu1 %425  ;;  %v428_v5 = vpop.permute.xlu0 %427 }
 0x6b3   :  { %v2787_v33 = vpop.f32.mrb[184].mxu1  ;;  %v3111_v34 = vpop.f32.mrb[184].mxu0 }
 0x6b4   :  { %6229 = vst [vmem:[%s11924_s4 + $0x9d0] sm:$0xff] %v2787_v33  ;;  %6301 = vst [vmem:[%s11924_s4 + $0xb40] sm:$0xff] %v3111_v34  ;;  %v2789_v9 = vpop.f32.mrb[185].mxu1  ;;  %v3113_v31 = vpop.f32.mrb[185].mxu0  ;;  %v363_v33 = vadd.f32 %v326_v62, %v263_v45  ;;  %v364_v34 = vadd.f32 %v328_v0, %v264_v46 }
 0x6b5   :  { %6230 = vst.msk [vmem:[%s11924_s4 + $0x9d8] sm:$0xff] %vm866_vm3, %v2789_v9  ;;  %6302 = vst.msk [vmem:[%s11924_s4 + $0xb48] sm:$0xff] %vm866_vm3, %v3113_v31  ;;  %v10025_v9 = vld [vmem:[%s11922_s2 + $0xb0] sm:$0x3] }
 0x6b6   :  { %v463_v52 = vadd.f32 %v426_v4, %v363_v33  ;;  %v464_v53 = vadd.f32 %v428_v5, %v364_v34 }
 0x6b7   :  { %v2793_v32 = vpop.f32.mrb[186].mxu1  ;;  %v3117_v10 = vpop.f32.mrb[186].mxu0 }
 0x6b8   :  { %6231 = vst [vmem:[%s11924_s4 + $0x9e0] sm:$0xff] %v2793_v32  ;;  %6303 = vst [vmem:[%s11924_s4 + $0xb50] sm:$0xff] %v3117_v10  ;;  %v2795_v47 = vpop.f32.mrb[187].mxu1  ;;  %v3119_v51 = vpop.f32.mrb[187].mxu0 }
 0x6b9   :  { %6232 = vst.msk [vmem:[%s11924_s4 + $0x9e8] sm:$0xff] %vm866_vm3, %v2795_v47  ;;  %6304 = vst.msk [vmem:[%s11924_s4 + $0xb58] sm:$0xff] %vm866_vm3, %v3119_v51 }
 0x6bb   :  { %v2799_v58 = vpop.f32.mrb[188].mxu1  ;;  %v3123_v48 = vpop.f32.mrb[188].mxu0 }
 0x6bc   :  { %6233 = vst [vmem:[%s11924_s4 + $0x9f0] sm:$0xff] %v2799_v58  ;;  %6305 = vst [vmem:[%s11924_s4 + $0xb60] sm:$0xff] %v3123_v48  ;;  %v2801_v60 = vpop.f32.mrb[189].mxu1  ;;  %v3125_v61 = vpop.f32.mrb[189].mxu0 }
 0x6bd   :  { %6234 = vst.msk [vmem:[%s11924_s4 + $0x9f8] sm:$0xff] %vm866_vm3, %v2801_v60  ;;  %6306 = vst.msk [vmem:[%s11924_s4 + $0xb68] sm:$0xff] %vm866_vm3, %v3125_v61 }
 0x6bf   :  { %v2805_v49 = vpop.f32.mrb[190].mxu1  ;;  %v3129_v2 = vpop.f32.mrb[190].mxu0 }
 0x6c0   :  { %6235 = vst [vmem:[%s11924_s4 + $0xa00] sm:$0x3] %v2805_v49  ;;  %6307 = vst [vmem:[%s11924_s4 + $0xb70] sm:$0x3] %v3129_v2  ;;  %v2807_v59 = vpop.f32.mrb[191].mxu1  ;;  %v3131_v24 = vpop.f32.mrb[191].mxu0 }
 0x6c1   :  { %6236 = vst.msk [vmem:[%s11924_s4 + $0xa08] sm:$0x3] %vm911_vm4, %v2807_v59  ;;  %6308 = vst.msk [vmem:[%s11924_s4 + $0xb78] sm:$0x3] %vm911_vm4, %v3131_v24 }
 0x6c3   :  { %v3250_v35 = vpop.f32.mrb[192].mxu1  ;;  %v3574_v36 = vpop.f32.mrb[192].mxu0 }
 0x6c4   :  { %v3252_v25 = vpop.f32.mrb[193].mxu1  ;;  %v3576_v54 = vpop.f32.mrb[193].mxu0 }
 0x6c5   :  { %3255 = vmatprep.subr.mxu1 %v3252_v25  ;;  %3579 = vmatprep.subr.mxu0 %v3576_v54 }
 0x6c6   :  { %3256 = vmatpush1.msra.mxu1 %v3250_v35  ;;  %3580 = vmatpush1.msra.mxu0 %v3574_v36 }
 0x6c7   :  { %6312 = vmatmul.mubr.msk.f32.vlgmr.msra.gmra.mrb[194].mxu1 %vm592_vm2, %v9755_v29  ;;  %6384 = vmatmul.mubr.msk.f32.vlgmr.msra.gmra.mrb[194].mxu0 %vm592_vm2, %v9755_v29 }
 0x6c8   :  { %7046 = vmatprep.subr.bf16.mxu1 %v7350_v8  ;;  %7062 = vmatprep.subr.bf16.mxu0 %v7350_v8 }
 0x6c9   :  { %3325 = vmatprep.mubr.f32.mxu1 %v7295_v50  ;;  %3649 = vmatprep.mubr.f32.mxu0 %v7295_v50 }
 0x6ca   :  { %7048 = vmatpush1.bf16.msra.mxu1 %v7352_v12  ;;  %7064 = vmatpush1.bf16.msra.mxu0 %v7352_v12 }
 0x6cb   :  { %6313 = vmatmul.mubr.msk.f32.gmra.mrb[196].mxu1 %vm592_vm2, %v9770_v38  ;;  %6385 = vmatmul.mubr.msk.f32.gmra.mrb[196].mxu0 %vm592_vm2, %v9770_v38 }
 0x6cc   :  { %3331 = vmatprep.mubr.f32.mxu1 %v7295_v50  ;;  %3655 = vmatprep.mubr.f32.mxu0 %v7295_v50 }
 0x6cd   :  { %7050 = vmatprep.subr.bf16.mxu1 %v7354_v13  ;;  %7066 = vmatprep.subr.bf16.mxu0 %v7354_v13 }
 0x6ce   :  { %7052 = vmatpush1.bf16.msra.mxu1 %v7360_v18  ;;  %7068 = vmatpush1.bf16.msra.mxu0 %v7360_v18 }
 0x6cf   :  { %6314 = vmatmul.mubr.msk.f32.gmra.mrb[198].mxu1 %vm592_vm2, %v9785_v41  ;;  %6386 = vmatmul.mubr.msk.f32.gmra.mrb[198].mxu0 %vm592_vm2, %v9785_v41 }
 0x6d0   :  { %3337 = vmatprep.mubr.f32.mxu1 %v7295_v50  ;;  %3661 = vmatprep.mubr.f32.mxu0 %v7295_v50 }
 0x6d1   :  { %7054 = vmatprep.subr.bf16.mxu1 %v7364_v19  ;;  %7070 = vmatprep.subr.bf16.mxu0 %v7364_v19 }
 0x6d2   :  { %7056 = vmatpush1.bf16.msra.mxu1 %v7368_v22  ;;  %7072 = vmatpush1.bf16.msra.mxu0 %v7368_v22 }
 0x6d3   :  { %6315 = vmatmul.mubr.msk.f32.gmra.mrb[200].mxu1 %vm592_vm2, %v9800_v42  ;;  %6387 = vmatmul.mubr.msk.f32.gmra.mrb[200].mxu0 %vm592_vm2, %v9800_v42 }
 0x6d4   :  { %3343 = vmatprep.mubr.f32.mxu1 %v7295_v50  ;;  %3667 = vmatprep.mubr.f32.mxu0 %v7295_v50 }
 0x6d5   :  { %7058 = vmatprep.subr.bf16.mxu1 %v7374_v37  ;;  %7074 = vmatprep.subr.bf16.mxu0 %v7374_v37 }
 0x6d6   :  { %7060 = vmatpush1.bf16.msra.mxu1 %v7376_v39  ;;  %7076 = vmatpush1.bf16.msra.mxu0 %v7376_v39 }
 0x6d7   :  { %6316 = vmatmul.mubr.msk.f32.gmra.mrb[202].mxu1 %vm592_vm2, %v9815_v43  ;;  %6388 = vmatmul.mubr.msk.f32.gmra.mrb[202].mxu0 %vm592_vm2, %v9815_v43 }
 0x6d8   :  { %3349 = vmatprep.mubr.f32.mxu1 %v7295_v50  ;;  %3673 = vmatprep.mubr.f32.mxu0 %v7295_v50 }
 0x6d9   :  { %6453 = vmatprep.subr.msk.mxu1 %vm514_vm0, %v9302_v28  ;;  %6525 = vmatprep.subr.msk.mxu0 %vm514_vm0, %v9302_v28  ;;  %v9845_v28 = vld [vmem:[%s11922_s2 + $0x30] sm:$0xff] }
 0x6da   :  { %6454 = vmatpush1.msk.msra.mxu1 %vm514_vm0, %v9308_v30  ;;  %6526 = vmatpush1.msk.msra.mxu0 %vm514_vm0, %v9308_v30  ;;  %v9856_v30 = vld [vmem:[%s11922_s2 + $0x38] sm:$0xff] }
 0x6db   :  { %6317 = vmatmul.mubr.msk.f32.gmra.mrb[204].mxu1 %vm592_vm2, %v9834_v3  ;;  %6389 = vmatmul.mubr.msk.f32.gmra.mrb[204].mxu0 %vm592_vm2, %v9834_v3 }
 0x6dc   :  { %3355 = vmatprep.mubr.f32.mxu1 %v7295_v50  ;;  %3679 = vmatprep.mubr.f32.mxu0 %v7295_v50 }
 0x6df   :  { %6318 = vmatmul.mubr.msk.f32.gmra.mrb[206].mxu1 %vm592_vm2, %v9845_v28  ;;  %6390 = vmatmul.mubr.msk.f32.gmra.mrb[206].mxu0 %vm592_vm2, %v9845_v28 }
 0x6e0   :  { %3361 = vmatprep.mubr.f32.mxu1 %v7295_v50  ;;  %3685 = vmatprep.mubr.f32.mxu0 %v7295_v50 }
 0x6e3   :  { %6319 = vmatmul.mubr.msk.f32.gmra.mrb[208].mxu1 %vm592_vm2, %v9856_v30  ;;  %6391 = vmatmul.mubr.msk.f32.gmra.mrb[208].mxu0 %vm592_vm2, %v9856_v30 }
 0x6e4   :  { %3367 = vmatprep.mubr.f32.mxu1 %v7295_v50  ;;  %3691 = vmatprep.mubr.f32.mxu0 %v7295_v50 }
 0x6e7   :  { %6320 = vmatmul.mubr.msk.f32.gmra.mrb[210].mxu1 %vm592_vm2, %v9867_v44  ;;  %6392 = vmatmul.mubr.msk.f32.gmra.mrb[210].mxu0 %vm592_vm2, %v9867_v44 }
 0x6e8   :  { %3373 = vmatprep.mubr.f32.mxu1 %v7295_v50  ;;  %3697 = vmatprep.mubr.f32.mxu0 %v7295_v50 }
 0x6eb   :  { %6321 = vmatmul.mubr.msk.f32.gmra.mrb[212].mxu1 %vm592_vm2, %v9878_v63  ;;  %6393 = vmatmul.mubr.msk.f32.gmra.mrb[212].mxu0 %vm592_vm2, %v9878_v63 }
 0x6ec   :  { %3379 = vmatprep.mubr.f32.mxu1 %v7295_v50  ;;  %3703 = vmatprep.mubr.f32.mxu0 %v7295_v50 }
 0x6ef   :  { %6322 = vmatmul.mubr.msk.f32.gmra.mrb[214].mxu1 %vm592_vm2, %v9889_v6  ;;  %6394 = vmatmul.mubr.msk.f32.gmra.mrb[214].mxu0 %vm592_vm2, %v9889_v6 }
 0x6f0   :  { %3385 = vmatprep.mubr.f32.mxu1 %v7295_v50  ;;  %3709 = vmatprep.mubr.f32.mxu0 %v7295_v50 }
 0x6f3   :  { %6323 = vmatmul.mubr.msk.f32.gmra.mrb[216].mxu1 %vm592_vm2, %v9900_v11  ;;  %6395 = vmatmul.mubr.msk.f32.gmra.mrb[216].mxu0 %vm592_vm2, %v9900_v11 }
 0x6f4   :  { %3391 = vmatprep.mubr.f32.mxu1 %v7295_v50  ;;  %3715 = vmatprep.mubr.f32.mxu0 %v7295_v50 }
 0x6f7   :  { %6324 = vmatmul.mubr.msk.f32.gmra.mrb[218].mxu1 %vm592_vm2, %v9911_v14  ;;  %6396 = vmatmul.mubr.msk.f32.gmra.mrb[218].mxu0 %vm592_vm2, %v9911_v14 }
 0x6f8   :  { %3397 = vmatprep.mubr.f32.mxu1 %v7295_v50  ;;  %3721 = vmatprep.mubr.f32.mxu0 %v7295_v50 }
 0x6fb   :  { %6325 = vmatmul.mubr.msk.f32.gmra.mrb[220].mxu1 %vm592_vm2, %v9922_v16  ;;  %6397 = vmatmul.mubr.msk.f32.gmra.mrb[220].mxu0 %vm592_vm2, %v9922_v16 }
 0x6fc   :  { %3403 = vmatprep.mubr.f32.mxu1 %v7295_v50  ;;  %3727 = vmatprep.mubr.f32.mxu0 %v7295_v50 }
 0x6ff   :  { %6326 = vmatmul.mubr.msk.f32.gmra.mrb[222].mxu1 %vm592_vm2, %v9933_v15  ;;  %6398 = vmatmul.mubr.msk.f32.gmra.mrb[222].mxu0 %vm592_vm2, %v9933_v15 }
 0x700   :  { %3409 = vmatprep.mubr.f32.mxu1 %v7295_v50  ;;  %3733 = vmatprep.mubr.f32.mxu0 %v7295_v50 }
 0x703   :  { %6327 = vmatmul.mubr.msk.f32.gmra.mrb[224].mxu1 %vm592_vm2, %v9944_v17  ;;  %6399 = vmatmul.mubr.msk.f32.gmra.mrb[224].mxu0 %vm592_vm2, %v9944_v17 }
 0x704   :  { %3415 = vmatprep.mubr.f32.mxu1 %v7295_v50  ;;  %3739 = vmatprep.mubr.f32.mxu0 %v7295_v50 }
 0x707   :  { %6328 = vmatmul.mubr.msk.f32.gmra.mrb[226].mxu1 %vm592_vm2, %v9955_v20  ;;  %6400 = vmatmul.mubr.msk.f32.gmra.mrb[226].mxu0 %vm592_vm2, %v9955_v20 }
 0x708   :  { %3421 = vmatprep.mubr.f32.mxu1 %v7295_v50  ;;  %3745 = vmatprep.mubr.f32.mxu0 %v7295_v50 }
 0x70b   :  { %6329 = vmatmul.mubr.msk.f32.gmra.mrb[228].mxu1 %vm592_vm2, %v9966_v21  ;;  %6401 = vmatmul.mubr.msk.f32.gmra.mrb[228].mxu0 %vm592_vm2, %v9966_v21 }
 0x70c   :  { %3427 = vmatprep.mubr.f32.mxu1 %v7295_v50  ;;  %3751 = vmatprep.mubr.f32.mxu0 %v7295_v50 }
 0x70f   :  { %6330 = vmatmul.mubr.msk.f32.gmra.mrb[230].mxu1 %vm592_vm2, %v9977_v23  ;;  %6402 = vmatmul.mubr.msk.f32.gmra.mrb[230].mxu0 %vm592_vm2, %v9977_v23 }
 0x710   :  { %3433 = vmatprep.mubr.f32.mxu1 %v7295_v50  ;;  %3757 = vmatprep.mubr.f32.mxu0 %v7295_v50 }
 0x713   :  { %6331 = vmatmul.mubr.msk.f32.gmra.mrb[232].mxu1 %vm592_vm2, %v9988_v26  ;;  %6403 = vmatmul.mubr.msk.f32.gmra.mrb[232].mxu0 %vm592_vm2, %v9988_v26 }
 0x714   :  { %3439 = vmatprep.mubr.f32.mxu1 %v7295_v50  ;;  %3763 = vmatprep.mubr.f32.mxu0 %v7295_v50 }
 0x717   :  { %6332 = vmatmul.mubr.msk.f32.gmra.mrb[234].mxu1 %vm592_vm2, %v9999_v7  ;;  %6404 = vmatmul.mubr.msk.f32.gmra.mrb[234].mxu0 %vm592_vm2, %v9999_v7 }
 0x718   :  { %3445 = vmatprep.mubr.f32.mxu1 %v7295_v50  ;;  %3769 = vmatprep.mubr.f32.mxu0 %v7295_v50 }
 0x71b   :  { %6333 = vmatmul.mubr.msk.f32.gmra.mrb[236].mxu1 %vm592_vm2, %v10010_v1  ;;  %6405 = vmatmul.mubr.msk.f32.gmra.mrb[236].mxu0 %vm592_vm2, %v10010_v1 }
 0x71c   :  { %3451 = vmatprep.mubr.f32.mxu1 %v7295_v50  ;;  %3775 = vmatprep.mubr.f32.mxu0 %v7295_v50 }
 0x71f   :  { %6334 = vmatmul.mubr.msk.f32.gmra.mrb[238].mxu1 %vm592_vm2, %v10025_v9  ;;  %6406 = vmatmul.mubr.msk.f32.gmra.mrb[238].mxu0 %vm592_vm2, %v10025_v9 }
 0x720   :  { %3896 = vmatprep.mubr.f32.mxu1 %v7295_v50  ;;  %4220 = vmatprep.mubr.f32.mxu0 %v7295_v50 }
 0x723   :  { %6455 = vmatmul.mubr.msk.f32.vlgmr.msra.gmra.mrb[240].mxu1 %vm510_vm1, %v463_v52  ;;  %6527 = vmatmul.mubr.msk.f32.vlgmr.msra.gmra.mrb[240].mxu0 %vm510_vm1, %v464_v53 }
 0x724   :  { %3967 = vmatprep.mubr.f32.mxu1 %v7295_v50  ;;  %4291 = vmatprep.mubr.f32.mxu0 %v7295_v50 }
 0x79a   :  { %v3321_v31 = vpop.f32.mrb[194].mxu1  ;;  %v3645_v32 = vpop.f32.mrb[194].mxu0 }
 0x79b   :  { %6335 = vst [vmem:[%s11924_s4 + $0xb80] sm:$0xff] %v3321_v31  ;;  %6407 = vst [vmem:[%s11924_s4 + $0xcf0] sm:$0xff] %v3645_v32  ;;  %v3323_v10 = vpop.f32.mrb[195].mxu1  ;;  %v3647_v47 = vpop.f32.mrb[195].mxu0 }
 0x79c   :  { %6336 = vst.msk [vmem:[%s11924_s4 + $0xb88] sm:$0xff] %vm866_vm3, %v3323_v10  ;;  %6408 = vst.msk [vmem:[%s11924_s4 + $0xcf8] sm:$0xff] %vm866_vm3, %v3647_v47 }
 0x79e   :  { %v3327_v51 = vpop.f32.mrb[196].mxu1  ;;  %v3651_v58 = vpop.f32.mrb[196].mxu0 }
 0x79f   :  { %6337 = vst [vmem:[%s11924_s4 + $0xb90] sm:$0xff] %v3327_v51  ;;  %6409 = vst [vmem:[%s11924_s4 + $0xd00] sm:$0xff] %v3651_v58  ;;  %v3329_v48 = vpop.f32.mrb[197].mxu1  ;;  %v3653_v60 = vpop.f32.mrb[197].mxu0 }
 0x7a0   :  { %6338 = vst.msk [vmem:[%s11924_s4 + $0xb98] sm:$0xff] %vm866_vm3, %v3329_v48  ;;  %6410 = vst.msk [vmem:[%s11924_s4 + $0xd08] sm:$0xff] %vm866_vm3, %v3653_v60 }
 0x7a2   :  { %v3333_v61 = vpop.f32.mrb[198].mxu1  ;;  %v3657_v49 = vpop.f32.mrb[198].mxu0 }
 0x7a3   :  { %6339 = vst [vmem:[%s11924_s4 + $0xba0] sm:$0xff] %v3333_v61  ;;  %6411 = vst [vmem:[%s11924_s4 + $0xd10] sm:$0xff] %v3657_v49  ;;  %v3335_v2 = vpop.f32.mrb[199].mxu1  ;;  %v3659_v59 = vpop.f32.mrb[199].mxu0 }
 0x7a4   :  { %6340 = vst.msk [vmem:[%s11924_s4 + $0xba8] sm:$0xff] %vm866_vm3, %v3335_v2  ;;  %6412 = vst.msk [vmem:[%s11924_s4 + $0xd18] sm:$0xff] %vm866_vm3, %v3659_v59 }
 0x7a6   :  { %v3339_v24 = vpop.f32.mrb[200].mxu1  ;;  %v3663_v35 = vpop.f32.mrb[200].mxu0 }
 0x7a7   :  { %6341 = vst [vmem:[%s11924_s4 + $0xbb0] sm:$0xff] %v3339_v24  ;;  %6413 = vst [vmem:[%s11924_s4 + $0xd20] sm:$0xff] %v3663_v35  ;;  %v3341_v36 = vpop.f32.mrb[201].mxu1  ;;  %v3665_v25 = vpop.f32.mrb[201].mxu0 }
 0x7a8   :  { %6342 = vst.msk [vmem:[%s11924_s4 + $0xbb8] sm:$0xff] %vm866_vm3, %v3341_v36  ;;  %6414 = vst.msk [vmem:[%s11924_s4 + $0xd28] sm:$0xff] %vm866_vm3, %v3665_v25 }
 0x7aa   :  { %v3345_v54 = vpop.f32.mrb[202].mxu1  ;;  %v3669_v62 = vpop.f32.mrb[202].mxu0 }
 0x7ab   :  { %6343 = vst [vmem:[%s11924_s4 + $0xbc0] sm:$0xff] %v3345_v54  ;;  %6415 = vst [vmem:[%s11924_s4 + $0xd30] sm:$0xff] %v3669_v62  ;;  %v3347_v0 = vpop.f32.mrb[203].mxu1  ;;  %v3671_v45 = vpop.f32.mrb[203].mxu0 }
 0x7ac   :  { %6344 = vst.msk [vmem:[%s11924_s4 + $0xbc8] sm:$0xff] %vm866_vm3, %v3347_v0  ;;  %6416 = vst.msk [vmem:[%s11924_s4 + $0xd38] sm:$0xff] %vm866_vm3, %v3671_v45 }
 0x7ae   :  { %v3351_v46 = vpop.f32.mrb[204].mxu1  ;;  %v3675_v4 = vpop.f32.mrb[204].mxu0 }
 0x7af   :  { %6345 = vst [vmem:[%s11924_s4 + $0xbd0] sm:$0xff] %v3351_v46  ;;  %6417 = vst [vmem:[%s11924_s4 + $0xd40] sm:$0xff] %v3675_v4  ;;  %v3353_v5 = vpop.f32.mrb[205].mxu1  ;;  %v3677_v33 = vpop.f32.mrb[205].mxu0 }
 0x7b0   :  { %6346 = vst.msk [vmem:[%s11924_s4 + $0xbd8] sm:$0xff] %vm866_vm3, %v3353_v5  ;;  %6418 = vst.msk [vmem:[%s11924_s4 + $0xd48] sm:$0xff] %vm866_vm3, %v3677_v33 }
 0x7b2   :  { %v3357_v34 = vpop.f32.mrb[206].mxu1  ;;  %v3681_v52 = vpop.f32.mrb[206].mxu0 }
 0x7b3   :  { %6347 = vst [vmem:[%s11924_s4 + $0xbe0] sm:$0xff] %v3357_v34  ;;  %6419 = vst [vmem:[%s11924_s4 + $0xd50] sm:$0xff] %v3681_v52  ;;  %v3359_v53 = vpop.f32.mrb[207].mxu1  ;;  %v3683_v31 = vpop.f32.mrb[207].mxu0 }
 0x7b4   :  { %6348 = vst.msk [vmem:[%s11924_s4 + $0xbe8] sm:$0xff] %vm866_vm3, %v3359_v53  ;;  %6420 = vst.msk [vmem:[%s11924_s4 + $0xd58] sm:$0xff] %vm866_vm3, %v3683_v31 }
 0x7b6   :  { %v3363_v32 = vpop.f32.mrb[208].mxu1  ;;  %v3687_v10 = vpop.f32.mrb[208].mxu0 }
 0x7b7   :  { %6349 = vst [vmem:[%s11924_s4 + $0xbf0] sm:$0xff] %v3363_v32  ;;  %6421 = vst [vmem:[%s11924_s4 + $0xd60] sm:$0xff] %v3687_v10  ;;  %v3365_v47 = vpop.f32.mrb[209].mxu1  ;;  %v3689_v51 = vpop.f32.mrb[209].mxu0 }
 0x7b8   :  { %6350 = vst.msk [vmem:[%s11924_s4 + $0xbf8] sm:$0xff] %vm866_vm3, %v3365_v47  ;;  %6422 = vst.msk [vmem:[%s11924_s4 + $0xd68] sm:$0xff] %vm866_vm3, %v3689_v51 }
 0x7ba   :  { %v3369_v58 = vpop.f32.mrb[210].mxu1  ;;  %v3693_v48 = vpop.f32.mrb[210].mxu0 }
 0x7bb   :  { %6351 = vst [vmem:[%s11924_s4 + $0xc00] sm:$0xff] %v3369_v58  ;;  %6423 = vst [vmem:[%s11924_s4 + $0xd70] sm:$0xff] %v3693_v48  ;;  %v3371_v60 = vpop.f32.mrb[211].mxu1  ;;  %v3695_v61 = vpop.f32.mrb[211].mxu0 }
 0x7bc   :  { %6352 = vst.msk [vmem:[%s11924_s4 + $0xc08] sm:$0xff] %vm866_vm3, %v3371_v60  ;;  %6424 = vst.msk [vmem:[%s11924_s4 + $0xd78] sm:$0xff] %vm866_vm3, %v3695_v61 }
 0x7be   :  { %v3375_v49 = vpop.f32.mrb[212].mxu1  ;;  %v3699_v2 = vpop.f32.mrb[212].mxu0 }
 0x7bf   :  { %6353 = vst [vmem:[%s11924_s4 + $0xc10] sm:$0xff] %v3375_v49  ;;  %6425 = vst [vmem:[%s11924_s4 + $0xd80] sm:$0xff] %v3699_v2  ;;  %v3377_v59 = vpop.f32.mrb[213].mxu1  ;;  %v3701_v24 = vpop.f32.mrb[213].mxu0 }
 0x7c0   :  { %6354 = vst.msk [vmem:[%s11924_s4 + $0xc18] sm:$0xff] %vm866_vm3, %v3377_v59  ;;  %6426 = vst.msk [vmem:[%s11924_s4 + $0xd88] sm:$0xff] %vm866_vm3, %v3701_v24 }
 0x7c2   :  { %v3381_v35 = vpop.f32.mrb[214].mxu1  ;;  %v3705_v36 = vpop.f32.mrb[214].mxu0 }
 0x7c3   :  { %6355 = vst [vmem:[%s11924_s4 + $0xc20] sm:$0xff] %v3381_v35  ;;  %6427 = vst [vmem:[%s11924_s4 + $0xd90] sm:$0xff] %v3705_v36  ;;  %v3383_v25 = vpop.f32.mrb[215].mxu1  ;;  %v3707_v54 = vpop.f32.mrb[215].mxu0 }
 0x7c4   :  { %6356 = vst.msk [vmem:[%s11924_s4 + $0xc28] sm:$0xff] %vm866_vm3, %v3383_v25  ;;  %6428 = vst.msk [vmem:[%s11924_s4 + $0xd98] sm:$0xff] %vm866_vm3, %v3707_v54 }
 0x7c6   :  { %v3387_v62 = vpop.f32.mrb[216].mxu1  ;;  %v3711_v0 = vpop.f32.mrb[216].mxu0 }
 0x7c7   :  { %6357 = vst [vmem:[%s11924_s4 + $0xc30] sm:$0xff] %v3387_v62  ;;  %6429 = vst [vmem:[%s11924_s4 + $0xda0] sm:$0xff] %v3711_v0  ;;  %v3389_v45 = vpop.f32.mrb[217].mxu1  ;;  %v3713_v46 = vpop.f32.mrb[217].mxu0 }
 0x7c8   :  { %6358 = vst.msk [vmem:[%s11924_s4 + $0xc38] sm:$0xff] %vm866_vm3, %v3389_v45  ;;  %6430 = vst.msk [vmem:[%s11924_s4 + $0xda8] sm:$0xff] %vm866_vm3, %v3713_v46 }
 0x7ca   :  { %v3393_v4 = vpop.f32.mrb[218].mxu1  ;;  %v3717_v5 = vpop.f32.mrb[218].mxu0 }
 0x7cb   :  { %6359 = vst [vmem:[%s11924_s4 + $0xc40] sm:$0xff] %v3393_v4  ;;  %6431 = vst [vmem:[%s11924_s4 + $0xdb0] sm:$0xff] %v3717_v5  ;;  %v3395_v33 = vpop.f32.mrb[219].mxu1  ;;  %v3719_v34 = vpop.f32.mrb[219].mxu0 }
 0x7cc   :  { %6360 = vst.msk [vmem:[%s11924_s4 + $0xc48] sm:$0xff] %vm866_vm3, %v3395_v33  ;;  %6432 = vst.msk [vmem:[%s11924_s4 + $0xdb8] sm:$0xff] %vm866_vm3, %v3719_v34 }
 0x7ce   :  { %v3399_v52 = vpop.f32.mrb[220].mxu1  ;;  %v3723_v53 = vpop.f32.mrb[220].mxu0 }
 0x7cf   :  { %6361 = vst [vmem:[%s11924_s4 + $0xc50] sm:$0xff] %v3399_v52  ;;  %6433 = vst [vmem:[%s11924_s4 + $0xdc0] sm:$0xff] %v3723_v53  ;;  %v3401_v31 = vpop.f32.mrb[221].mxu1  ;;  %v3725_v32 = vpop.f32.mrb[221].mxu0 }
 0x7d0   :  { %6362 = vst.msk [vmem:[%s11924_s4 + $0xc58] sm:$0xff] %vm866_vm3, %v3401_v31  ;;  %6434 = vst.msk [vmem:[%s11924_s4 + $0xdc8] sm:$0xff] %vm866_vm3, %v3725_v32 }
 0x7d2   :  { %v3405_v10 = vpop.f32.mrb[222].mxu1  ;;  %v3729_v47 = vpop.f32.mrb[222].mxu0 }
 0x7d3   :  { %6363 = vst [vmem:[%s11924_s4 + $0xc60] sm:$0xff] %v3405_v10  ;;  %6435 = vst [vmem:[%s11924_s4 + $0xdd0] sm:$0xff] %v3729_v47  ;;  %v3407_v51 = vpop.f32.mrb[223].mxu1  ;;  %v3731_v58 = vpop.f32.mrb[223].mxu0 }
 0x7d4   :  { %6364 = vst.msk [vmem:[%s11924_s4 + $0xc68] sm:$0xff] %vm866_vm3, %v3407_v51  ;;  %6436 = vst.msk [vmem:[%s11924_s4 + $0xdd8] sm:$0xff] %vm866_vm3, %v3731_v58 }
 0x7d6   :  { %v3411_v48 = vpop.f32.mrb[224].mxu1  ;;  %v3735_v60 = vpop.f32.mrb[224].mxu0 }
 0x7d7   :  { %6365 = vst [vmem:[%s11924_s4 + $0xc70] sm:$0xff] %v3411_v48  ;;  %6437 = vst [vmem:[%s11924_s4 + $0xde0] sm:$0xff] %v3735_v60  ;;  %v3413_v61 = vpop.f32.mrb[225].mxu1  ;;  %v3737_v49 = vpop.f32.mrb[225].mxu0 }
 0x7d8   :  { %6366 = vst.msk [vmem:[%s11924_s4 + $0xc78] sm:$0xff] %vm866_vm3, %v3413_v61  ;;  %6438 = vst.msk [vmem:[%s11924_s4 + $0xde8] sm:$0xff] %vm866_vm3, %v3737_v49 }
 0x7da   :  { %v3417_v2 = vpop.f32.mrb[226].mxu1  ;;  %v3741_v59 = vpop.f32.mrb[226].mxu0 }
 0x7db   :  { %6367 = vst [vmem:[%s11924_s4 + $0xc80] sm:$0xff] %v3417_v2  ;;  %6439 = vst [vmem:[%s11924_s4 + $0xdf0] sm:$0xff] %v3741_v59  ;;  %v3419_v24 = vpop.f32.mrb[227].mxu1  ;;  %v3743_v35 = vpop.f32.mrb[227].mxu0 }
 0x7dc   :  { %6368 = vst.msk [vmem:[%s11924_s4 + $0xc88] sm:$0xff] %vm866_vm3, %v3419_v24  ;;  %6440 = vst.msk [vmem:[%s11924_s4 + $0xdf8] sm:$0xff] %vm866_vm3, %v3743_v35 }
 0x7de   :  { %v3423_v36 = vpop.f32.mrb[228].mxu1  ;;  %v3747_v25 = vpop.f32.mrb[228].mxu0 }
 0x7df   :  { %6369 = vst [vmem:[%s11924_s4 + $0xc90] sm:$0xff] %v3423_v36  ;;  %6441 = vst [vmem:[%s11924_s4 + $0xe00] sm:$0xff] %v3747_v25  ;;  %v3425_v54 = vpop.f32.mrb[229].mxu1  ;;  %v3749_v62 = vpop.f32.mrb[229].mxu0 }
 0x7e0   :  { %6370 = vst.msk [vmem:[%s11924_s4 + $0xc98] sm:$0xff] %vm866_vm3, %v3425_v54  ;;  %6442 = vst.msk [vmem:[%s11924_s4 + $0xe08] sm:$0xff] %vm866_vm3, %v3749_v62 }
 0x7e2   :  { %v3429_v0 = vpop.f32.mrb[230].mxu1  ;;  %v3753_v45 = vpop.f32.mrb[230].mxu0 }
 0x7e3   :  { %6371 = vst [vmem:[%s11924_s4 + $0xca0] sm:$0xff] %v3429_v0  ;;  %6443 = vst [vmem:[%s11924_s4 + $0xe10] sm:$0xff] %v3753_v45  ;;  %v3431_v46 = vpop.f32.mrb[231].mxu1  ;;  %v3755_v4 = vpop.f32.mrb[231].mxu0 }
 0x7e4   :  { %6372 = vst.msk [vmem:[%s11924_s4 + $0xca8] sm:$0xff] %vm866_vm3, %v3431_v46  ;;  %6444 = vst.msk [vmem:[%s11924_s4 + $0xe18] sm:$0xff] %vm866_vm3, %v3755_v4 }
 0x7e6   :  { %v3435_v5 = vpop.f32.mrb[232].mxu1  ;;  %v3759_v33 = vpop.f32.mrb[232].mxu0 }
 0x7e7   :  { %6373 = vst [vmem:[%s11924_s4 + $0xcb0] sm:$0xff] %v3435_v5  ;;  %6445 = vst [vmem:[%s11924_s4 + $0xe20] sm:$0xff] %v3759_v33  ;;  %v3437_v34 = vpop.f32.mrb[233].mxu1  ;;  %v3761_v52 = vpop.f32.mrb[233].mxu0 }
 0x7e8   :  { %6374 = vst.msk [vmem:[%s11924_s4 + $0xcb8] sm:$0xff] %vm866_vm3, %v3437_v34  ;;  %6446 = vst.msk [vmem:[%s11924_s4 + $0xe28] sm:$0xff] %vm866_vm3, %v3761_v52 }
 0x7ea   :  { %v3441_v53 = vpop.f32.mrb[234].mxu1  ;;  %v3765_v31 = vpop.f32.mrb[234].mxu0 }
 0x7eb   :  { %6375 = vst [vmem:[%s11924_s4 + $0xcc0] sm:$0xff] %v3441_v53  ;;  %6447 = vst [vmem:[%s11924_s4 + $0xe30] sm:$0xff] %v3765_v31  ;;  %v3443_v32 = vpop.f32.mrb[235].mxu1  ;;  %v3767_v10 = vpop.f32.mrb[235].mxu0 }
 0x7ec   :  { %6376 = vst.msk [vmem:[%s11924_s4 + $0xcc8] sm:$0xff] %vm866_vm3, %v3443_v32  ;;  %6448 = vst.msk [vmem:[%s11924_s4 + $0xe38] sm:$0xff] %vm866_vm3, %v3767_v10 }
 0x7ee   :  { %v3447_v47 = vpop.f32.mrb[236].mxu1  ;;  %v3771_v51 = vpop.f32.mrb[236].mxu0 }
 0x7ef   :  { %6377 = vst [vmem:[%s11924_s4 + $0xcd0] sm:$0xff] %v3447_v47  ;;  %6449 = vst [vmem:[%s11924_s4 + $0xe40] sm:$0xff] %v3771_v51  ;;  %v3449_v58 = vpop.f32.mrb[237].mxu1  ;;  %v3773_v48 = vpop.f32.mrb[237].mxu0 }
 0x7f0   :  { %6378 = vst.msk [vmem:[%s11924_s4 + $0xcd8] sm:$0xff] %vm866_vm3, %v3449_v58  ;;  %6450 = vst.msk [vmem:[%s11924_s4 + $0xe48] sm:$0xff] %vm866_vm3, %v3773_v48 }
 0x7f2   :  { %v3453_v60 = vpop.f32.mrb[238].mxu1  ;;  %v3777_v61 = vpop.f32.mrb[238].mxu0 }
 0x7f3   :  { %6379 = vst [vmem:[%s11924_s4 + $0xce0] sm:$0x3] %v3453_v60  ;;  %6451 = vst [vmem:[%s11924_s4 + $0xe50] sm:$0x3] %v3777_v61  ;;  %v3455_v49 = vpop.f32.mrb[239].mxu1  ;;  %v3779_v2 = vpop.f32.mrb[239].mxu0 }
 0x7f4   :  { %6380 = vst.msk [vmem:[%s11924_s4 + $0xce8] sm:$0x3] %vm911_vm4, %v3455_v49  ;;  %6452 = vst.msk [vmem:[%s11924_s4 + $0xe58] sm:$0x3] %vm911_vm4, %v3779_v2 }
 0x7f6   :  { %v3898_v59 = vpop.f32.mrb[240].mxu1  ;;  %v4222_v24 = vpop.f32.mrb[240].mxu0 }
 0x7f7   :  { %v3900_v35 = vpop.f32.mrb[241].mxu1  ;;  %v4224_v36 = vpop.f32.mrb[241].mxu0 }
 0x7f8   :  { %3903 = vmatprep.subr.mxu1 %v3900_v35  ;;  %4227 = vmatprep.subr.mxu0 %v4224_v36 }
 0x7f9   :  { %3904 = vmatpush1.msra.mxu1 %v3898_v59  ;;  %4228 = vmatpush1.msra.mxu0 %v4222_v24 }
 0x7fa   :  { %6456 = vmatmul.mubr.msk.f32.vlgmr.msra.gmra.mrb[242].mxu1 %vm592_vm2, %v9755_v29  ;;  %6528 = vmatmul.mubr.msk.f32.vlgmr.msra.gmra.mrb[242].mxu0 %vm592_vm2, %v9755_v29  ;;  %v10405_v29 = vld [vmem:[#allocation4 + $0x88] sm:$0x3] }
 0x7fb   :  { %7078 = vmatprep.subr.bf16.mxu1 %v7350_v8  ;;  %7094 = vmatprep.subr.bf16.mxu0 %v7350_v8 }
 0x7fc   :  { %3973 = vmatprep.mubr.f32.mxu1 %v7295_v50  ;;  %4297 = vmatprep.mubr.f32.mxu0 %v7295_v50 }
 0x7fd   :  { %7080 = vmatpush1.bf16.msra.mxu1 %v7352_v12  ;;  %7096 = vmatpush1.bf16.msra.mxu0 %v7352_v12 }
 0x7fe   :  { %6457 = vmatmul.mubr.msk.f32.gmra.mrb[244].mxu1 %vm592_vm2, %v9770_v38  ;;  %6529 = vmatmul.mubr.msk.f32.gmra.mrb[244].mxu0 %vm592_vm2, %v9770_v38  ;;  %v10411_v38 = vld [vmem:[#allocation4 + $0x80] sm:$0x3] }
 0x7ff   :  { %3979 = vmatprep.mubr.f32.mxu1 %v7295_v50  ;;  %4303 = vmatprep.mubr.f32.mxu0 %v7295_v50 }
 0x800   :  { %7082 = vmatprep.subr.bf16.mxu1 %v7354_v13  ;;  %7098 = vmatprep.subr.bf16.mxu0 %v7354_v13 }
 0x801   :  { %7084 = vmatpush1.bf16.msra.mxu1 %v7360_v18  ;;  %7100 = vmatpush1.bf16.msra.mxu0 %v7360_v18 }
 0x802   :  { %6458 = vmatmul.mubr.msk.f32.gmra.mrb[246].mxu1 %vm592_vm2, %v9785_v41  ;;  %6530 = vmatmul.mubr.msk.f32.gmra.mrb[246].mxu0 %vm592_vm2, %v9785_v41  ;;  %v330_v41 = vpop.permute.xlu1 %329 }
 0x803   :  { %3985 = vmatprep.mubr.f32.mxu1 %v7295_v50  ;;  %4309 = vmatprep.mubr.f32.mxu0 %v7295_v50 }
 0x804   :  { %7086 = vmatprep.subr.bf16.mxu1 %v7364_v19  ;;  %7102 = vmatprep.subr.bf16.mxu0 %v7364_v19 }
 0x805   :  { %7088 = vmatpush1.bf16.msra.mxu1 %v7368_v22  ;;  %7104 = vmatpush1.bf16.msra.mxu0 %v7368_v22 }
 0x806   :  { %6459 = vmatmul.mubr.msk.f32.gmra.mrb[248].mxu1 %vm592_vm2, %v9800_v42  ;;  %6531 = vmatmul.mubr.msk.f32.gmra.mrb[248].mxu0 %vm592_vm2, %v9800_v42  ;;  %v332_v42 = vpop.permute.xlu0 %331 }
 0x807   :  { %3991 = vmatprep.mubr.f32.mxu1 %v7295_v50  ;;  %4315 = vmatprep.mubr.f32.mxu0 %v7295_v50 }
 0x808   :  { %7090 = vmatprep.subr.bf16.mxu1 %v7374_v37  ;;  %7106 = vmatprep.subr.bf16.mxu0 %v7374_v37 }
 0x809   :  { %7092 = vmatpush1.bf16.msra.mxu1 %v7376_v39  ;;  %7108 = vmatpush1.bf16.msra.mxu0 %v7376_v39 }
 0x80a   :  { %6460 = vmatmul.mubr.msk.f32.gmra.mrb[250].mxu1 %vm592_vm2, %v9815_v43  ;;  %6532 = vmatmul.mubr.msk.f32.gmra.mrb[250].mxu0 %vm592_vm2, %v9815_v43  ;;  %v265_v43 = vadd.f32 %v7534_v27, %v7473_v55 }
 0x80b   :  { %3997 = vmatprep.mubr.f32.mxu1 %v7295_v50  ;;  %4321 = vmatprep.mubr.f32.mxu0 %v7295_v50 }
 0x80c   :  { %6597 = vmatprep.subr.msk.mxu1 %vm514_vm0, %v10405_v29  ;;  %6669 = vmatprep.subr.msk.mxu0 %vm514_vm0, %v10405_v29 }
 0x80d   :  { %6598 = vmatpush1.msk.msra.mxu1 %vm514_vm0, %v10411_v38  ;;  %6670 = vmatpush1.msk.msra.mxu0 %vm514_vm0, %v10411_v38 }
 0x80e   :  { %6461 = vmatmul.mubr.msk.f32.gmra.mrb[252].mxu1 %vm592_vm2, %v9834_v3  ;;  %6533 = vmatmul.mubr.msk.f32.gmra.mrb[252].mxu0 %vm592_vm2, %v9834_v3  ;;  %v266_v3 = vadd.f32 %v7534_v27, %v7476_v56 }
 0x80f   :  { %4003 = vmatprep.mubr.f32.mxu1 %v7295_v50  ;;  %4327 = vmatprep.mubr.f32.mxu0 %v7295_v50 }
 0x812   :  { %6462 = vmatmul.mubr.msk.f32.gmra.mrb[254].mxu1 %vm592_vm2, %v9845_v28  ;;  %6534 = vmatmul.mubr.msk.f32.gmra.mrb[254].mxu0 %vm592_vm2, %v9845_v28  ;;  %v430_v28 = vpop.permute.xlu1 %429 }
 0x813   :  { %4009 = vmatprep.mubr.f32.mxu1 %v7295_v50  ;;  %4333 = vmatprep.mubr.f32.mxu0 %v7295_v50 }
 0x816   :  { %6463 = vmatmul.mubr.msk.f32.gmra.mrb[0].mxu1 %vm592_vm2, %v9856_v30  ;;  %6535 = vmatmul.mubr.msk.f32.gmra.mrb[0].mxu0 %vm592_vm2, %v9856_v30  ;;  %v432_v30 = vpop.permute.xlu0 %431 }
 0x817   :  { %4015 = vmatprep.mubr.f32.mxu1 %v7295_v50  ;;  %4339 = vmatprep.mubr.f32.mxu0 %v7295_v50 }
 0x81a   :  { %6464 = vmatmul.mubr.msk.f32.gmra.mrb[2].mxu1 %vm592_vm2, %v9867_v44  ;;  %6536 = vmatmul.mubr.msk.f32.gmra.mrb[2].mxu0 %vm592_vm2, %v9867_v44  ;;  %v365_v44 = vadd.f32 %v330_v41, %v265_v43 }
 0x81b   :  { %4021 = vmatprep.mubr.f32.mxu1 %v7295_v50  ;;  %4345 = vmatprep.mubr.f32.mxu0 %v7295_v50 }
 0x81e   :  { %6465 = vmatmul.mubr.msk.f32.gmra.mrb[4].mxu1 %vm592_vm2, %v9878_v63  ;;  %6537 = vmatmul.mubr.msk.f32.gmra.mrb[4].mxu0 %vm592_vm2, %v9878_v63  ;;  %v366_v63 = vadd.f32 %v332_v42, %v266_v3 }
 0x81f   :  { %4027 = vmatprep.mubr.f32.mxu1 %v7295_v50  ;;  %4351 = vmatprep.mubr.f32.mxu0 %v7295_v50 }
 0x822   :  { %6466 = vmatmul.mubr.msk.f32.gmra.mrb[6].mxu1 %vm592_vm2, %v9889_v6  ;;  %6538 = vmatmul.mubr.msk.f32.gmra.mrb[6].mxu0 %vm592_vm2, %v9889_v6  ;;  %v465_v6 = vadd.f32 %v430_v28, %v365_v44 }
 0x823   :  { %4033 = vmatprep.mubr.f32.mxu1 %v7295_v50  ;;  %4357 = vmatprep.mubr.f32.mxu0 %v7295_v50 }
 0x826   :  { %6467 = vmatmul.mubr.msk.f32.gmra.mrb[8].mxu1 %vm592_vm2, %v9900_v11  ;;  %6539 = vmatmul.mubr.msk.f32.gmra.mrb[8].mxu0 %vm592_vm2, %v9900_v11  ;;  %v466_v11 = vadd.f32 %v432_v30, %v366_v63 }
 0x827   :  { %4039 = vmatprep.mubr.f32.mxu1 %v7295_v50  ;;  %4363 = vmatprep.mubr.f32.mxu0 %v7295_v50 }
 0x82a   :  { %6468 = vmatmul.mubr.msk.f32.gmra.mrb[10].mxu1 %vm592_vm2, %v9911_v14  ;;  %6540 = vmatmul.mubr.msk.f32.gmra.mrb[10].mxu0 %vm592_vm2, %v9911_v14 }
 0x82b   :  { %4045 = vmatprep.mubr.f32.mxu1 %v7295_v50  ;;  %4369 = vmatprep.mubr.f32.mxu0 %v7295_v50 }
 0x82e   :  { %6469 = vmatmul.mubr.msk.f32.gmra.mrb[12].mxu1 %vm592_vm2, %v9922_v16  ;;  %6541 = vmatmul.mubr.msk.f32.gmra.mrb[12].mxu0 %vm592_vm2, %v9922_v16 }
 0x82f   :  { %4051 = vmatprep.mubr.f32.mxu1 %v7295_v50  ;;  %4375 = vmatprep.mubr.f32.mxu0 %v7295_v50 }
 0x832   :  { %6470 = vmatmul.mubr.msk.f32.gmra.mrb[14].mxu1 %vm592_vm2, %v9933_v15  ;;  %6542 = vmatmul.mubr.msk.f32.gmra.mrb[14].mxu0 %vm592_vm2, %v9933_v15 }
 0x833   :  { %4057 = vmatprep.mubr.f32.mxu1 %v7295_v50  ;;  %4381 = vmatprep.mubr.f32.mxu0 %v7295_v50 }
 0x836   :  { %6471 = vmatmul.mubr.msk.f32.gmra.mrb[16].mxu1 %vm592_vm2, %v9944_v17  ;;  %6543 = vmatmul.mubr.msk.f32.gmra.mrb[16].mxu0 %vm592_vm2, %v9944_v17 }
 0x837   :  { %4063 = vmatprep.mubr.f32.mxu1 %v7295_v50  ;;  %4387 = vmatprep.mubr.f32.mxu0 %v7295_v50 }
 0x83a   :  { %6472 = vmatmul.mubr.msk.f32.gmra.mrb[18].mxu1 %vm592_vm2, %v9955_v20  ;;  %6544 = vmatmul.mubr.msk.f32.gmra.mrb[18].mxu0 %vm592_vm2, %v9955_v20 }
 0x83b   :  { %4069 = vmatprep.mubr.f32.mxu1 %v7295_v50  ;;  %4393 = vmatprep.mubr.f32.mxu0 %v7295_v50 }
 0x83e   :  { %6473 = vmatmul.mubr.msk.f32.gmra.mrb[20].mxu1 %vm592_vm2, %v9966_v21  ;;  %6545 = vmatmul.mubr.msk.f32.gmra.mrb[20].mxu0 %vm592_vm2, %v9966_v21 }
 0x83f   :  { %4075 = vmatprep.mubr.f32.mxu1 %v7295_v50  ;;  %4399 = vmatprep.mubr.f32.mxu0 %v7295_v50 }
 0x842   :  { %6474 = vmatmul.mubr.msk.f32.gmra.mrb[22].mxu1 %vm592_vm2, %v9977_v23  ;;  %6546 = vmatmul.mubr.msk.f32.gmra.mrb[22].mxu0 %vm592_vm2, %v9977_v23 }
 0x843   :  { %4081 = vmatprep.mubr.f32.mxu1 %v7295_v50  ;;  %4405 = vmatprep.mubr.f32.mxu0 %v7295_v50 }
 0x846   :  { %6475 = vmatmul.mubr.msk.f32.gmra.mrb[24].mxu1 %vm592_vm2, %v9988_v26  ;;  %6547 = vmatmul.mubr.msk.f32.gmra.mrb[24].mxu0 %vm592_vm2, %v9988_v26 }
 0x847   :  { %4087 = vmatprep.mubr.f32.mxu1 %v7295_v50  ;;  %4411 = vmatprep.mubr.f32.mxu0 %v7295_v50 }
 0x84a   :  { %6476 = vmatmul.mubr.msk.f32.gmra.mrb[26].mxu1 %vm592_vm2, %v9999_v7  ;;  %6548 = vmatmul.mubr.msk.f32.gmra.mrb[26].mxu0 %vm592_vm2, %v9999_v7 }
 0x84b   :  { %4093 = vmatprep.mubr.f32.mxu1 %v7295_v50  ;;  %4417 = vmatprep.mubr.f32.mxu0 %v7295_v50 }
 0x84e   :  { %6477 = vmatmul.mubr.msk.f32.gmra.mrb[28].mxu1 %vm592_vm2, %v10010_v1  ;;  %6549 = vmatmul.mubr.msk.f32.gmra.mrb[28].mxu0 %vm592_vm2, %v10010_v1 }
 0x84f   :  { %4099 = vmatprep.mubr.f32.mxu1 %v7295_v50  ;;  %4423 = vmatprep.mubr.f32.mxu0 %v7295_v50 }
 0x852   :  { %6478 = vmatmul.mubr.msk.f32.gmra.mrb[30].mxu1 %vm592_vm2, %v10025_v9  ;;  %6550 = vmatmul.mubr.msk.f32.gmra.mrb[30].mxu0 %vm592_vm2, %v10025_v9 }
 0x853   :  { %4544 = vmatprep.mubr.f32.mxu1 %v7295_v50  ;;  %4868 = vmatprep.mubr.f32.mxu0 %v7295_v50 }
 0x856   :  { %6599 = vmatmul.mubr.msk.f32.vlgmr.msra.gmra.mrb[32].mxu1 %vm510_vm1, %v465_v6  ;;  %6671 = vmatmul.mubr.msk.f32.vlgmr.msra.gmra.mrb[32].mxu0 %vm510_vm1, %v466_v11 }
 0x857   :  { %4615 = vmatprep.mubr.f32.mxu1 %v7295_v50  ;;  %4939 = vmatprep.mubr.f32.mxu0 %v7295_v50 }
 0x8cd   :  { %v3969_v55 = vpop.f32.mrb[242].mxu1  ;;  %v4293_v56 = vpop.f32.mrb[242].mxu0 }
 0x8ce   :  { %6479 = vst [vmem:[%s11924_s4 + $0xe60] sm:$0xff] %v3969_v55  ;;  %6551 = vst [vmem:[%s11924_s4 + $0xfd0] sm:$0xff] %v4293_v56  ;;  %v3971_v14 = vpop.f32.mrb[243].mxu1  ;;  %v4295_v16 = vpop.f32.mrb[243].mxu0 }
 0x8cf   :  { %6480 = vst.msk [vmem:[%s11924_s4 + $0xe68] sm:$0xff] %vm866_vm3, %v3971_v14  ;;  %6552 = vst.msk [vmem:[%s11924_s4 + $0xfd8] sm:$0xff] %vm866_vm3, %v4295_v16 }
 0x8d1   :  { %v3975_v15 = vpop.f32.mrb[244].mxu1  ;;  %v4299_v17 = vpop.f32.mrb[244].mxu0 }
 0x8d2   :  { %6481 = vst [vmem:[%s11924_s4 + $0xe70] sm:$0xff] %v3975_v15  ;;  %6553 = vst [vmem:[%s11924_s4 + $0xfe0] sm:$0xff] %v4299_v17  ;;  %v3977_v20 = vpop.f32.mrb[245].mxu1  ;;  %v4301_v21 = vpop.f32.mrb[245].mxu0 }
 0x8d3   :  { %6482 = vst.msk [vmem:[%s11924_s4 + $0xe78] sm:$0xff] %vm866_vm3, %v3977_v20  ;;  %6554 = vst.msk [vmem:[%s11924_s4 + $0xfe8] sm:$0xff] %vm866_vm3, %v4301_v21 }
 0x8d5   :  { %v3981_v23 = vpop.f32.mrb[246].mxu1  ;;  %v4305_v26 = vpop.f32.mrb[246].mxu0 }
 0x8d6   :  { %6483 = vst [vmem:[%s11924_s4 + $0xe80] sm:$0xff] %v3981_v23  ;;  %6555 = vst [vmem:[%s11924_s4 + $0xff0] sm:$0xff] %v4305_v26  ;;  %v3983_v7 = vpop.f32.mrb[247].mxu1  ;;  %v4307_v1 = vpop.f32.mrb[247].mxu0 }
 0x8d7   :  { %6484 = vst.msk [vmem:[%s11924_s4 + $0xe88] sm:$0xff] %vm866_vm3, %v3983_v7  ;;  %6556 = vst.msk [vmem:[%s11924_s4 + $0xff8] sm:$0xff] %vm866_vm3, %v4307_v1 }
 0x8d9   :  { %v3987_v9 = vpop.f32.mrb[248].mxu1  ;;  %v4311_v25 = vpop.f32.mrb[248].mxu0 }
 0x8da   :  { %6485 = vst [vmem:[%s11924_s4 + $0xe90] sm:$0xff] %v3987_v9  ;;  %6557 = vst [vmem:[%s11924_s4 + $0x1000] sm:$0xff] %v4311_v25  ;;  %v3989_v54 = vpop.f32.mrb[249].mxu1  ;;  %v4313_v62 = vpop.f32.mrb[249].mxu0 }
 0x8db   :  { %6486 = vst.msk [vmem:[%s11924_s4 + $0xe98] sm:$0xff] %vm866_vm3, %v3989_v54  ;;  %6558 = vst.msk [vmem:[%s11924_s4 + $0x1008] sm:$0xff] %vm866_vm3, %v4313_v62 }
 0x8dd   :  { %v3993_v0 = vpop.f32.mrb[250].mxu1  ;;  %v4317_v45 = vpop.f32.mrb[250].mxu0 }
 0x8de   :  { %6487 = vst [vmem:[%s11924_s4 + $0xea0] sm:$0xff] %v3993_v0  ;;  %6559 = vst [vmem:[%s11924_s4 + $0x1010] sm:$0xff] %v4317_v45  ;;  %v3995_v46 = vpop.f32.mrb[251].mxu1  ;;  %v4319_v4 = vpop.f32.mrb[251].mxu0 }
 0x8df   :  { %6488 = vst.msk [vmem:[%s11924_s4 + $0xea8] sm:$0xff] %vm866_vm3, %v3995_v46  ;;  %6560 = vst.msk [vmem:[%s11924_s4 + $0x1018] sm:$0xff] %vm866_vm3, %v4319_v4 }
 0x8e1   :  { %v3999_v5 = vpop.f32.mrb[252].mxu1  ;;  %v4323_v33 = vpop.f32.mrb[252].mxu0 }
 0x8e2   :  { %6489 = vst [vmem:[%s11924_s4 + $0xeb0] sm:$0xff] %v3999_v5  ;;  %6561 = vst [vmem:[%s11924_s4 + $0x1020] sm:$0xff] %v4323_v33  ;;  %v4001_v34 = vpop.f32.mrb[253].mxu1  ;;  %v4325_v52 = vpop.f32.mrb[253].mxu0 }
 0x8e3   :  { %6490 = vst.msk [vmem:[%s11924_s4 + $0xeb8] sm:$0xff] %vm866_vm3, %v4001_v34  ;;  %6562 = vst.msk [vmem:[%s11924_s4 + $0x1028] sm:$0xff] %vm866_vm3, %v4325_v52 }
 0x8e5   :  { %v4005_v53 = vpop.f32.mrb[254].mxu1  ;;  %v4329_v31 = vpop.f32.mrb[254].mxu0 }
 0x8e6   :  { %6491 = vst [vmem:[%s11924_s4 + $0xec0] sm:$0xff] %v4005_v53  ;;  %6563 = vst [vmem:[%s11924_s4 + $0x1030] sm:$0xff] %v4329_v31  ;;  %v4007_v32 = vpop.f32.mrb[255].mxu1  ;;  %v4331_v10 = vpop.f32.mrb[255].mxu0 }
 0x8e7   :  { %6492 = vst.msk [vmem:[%s11924_s4 + $0xec8] sm:$0xff] %vm866_vm3, %v4007_v32  ;;  %6564 = vst.msk [vmem:[%s11924_s4 + $0x1038] sm:$0xff] %vm866_vm3, %v4331_v10 }
 0x8e9   :  { %v4011_v47 = vpop.f32.mrb[0].mxu1  ;;  %v4335_v51 = vpop.f32.mrb[0].mxu0 }
 0x8ea   :  { %6493 = vst [vmem:[%s11924_s4 + $0xed0] sm:$0xff] %v4011_v47  ;;  %6565 = vst [vmem:[%s11924_s4 + $0x1040] sm:$0xff] %v4335_v51  ;;  %v4013_v58 = vpop.f32.mrb[1].mxu1  ;;  %v4337_v48 = vpop.f32.mrb[1].mxu0 }
 0x8eb   :  { %6494 = vst.msk [vmem:[%s11924_s4 + $0xed8] sm:$0xff] %vm866_vm3, %v4013_v58  ;;  %6566 = vst.msk [vmem:[%s11924_s4 + $0x1048] sm:$0xff] %vm866_vm3, %v4337_v48 }
 0x8ed   :  { %v4017_v60 = vpop.f32.mrb[2].mxu1  ;;  %v4341_v61 = vpop.f32.mrb[2].mxu0 }
 0x8ee   :  { %6495 = vst [vmem:[%s11924_s4 + $0xee0] sm:$0xff] %v4017_v60  ;;  %6567 = vst [vmem:[%s11924_s4 + $0x1050] sm:$0xff] %v4341_v61  ;;  %v4019_v49 = vpop.f32.mrb[3].mxu1  ;;  %v4343_v2 = vpop.f32.mrb[3].mxu0 }
 0x8ef   :  { %6496 = vst.msk [vmem:[%s11924_s4 + $0xee8] sm:$0xff] %vm866_vm3, %v4019_v49  ;;  %6568 = vst.msk [vmem:[%s11924_s4 + $0x1058] sm:$0xff] %vm866_vm3, %v4343_v2 }
 0x8f1   :  { %v4023_v59 = vpop.f32.mrb[4].mxu1  ;;  %v4347_v24 = vpop.f32.mrb[4].mxu0 }
 0x8f2   :  { %6497 = vst [vmem:[%s11924_s4 + $0xef0] sm:$0xff] %v4023_v59  ;;  %6569 = vst [vmem:[%s11924_s4 + $0x1060] sm:$0xff] %v4347_v24  ;;  %v4025_v35 = vpop.f32.mrb[5].mxu1  ;;  %v4349_v36 = vpop.f32.mrb[5].mxu0 }
 0x8f3   :  { %6498 = vst.msk [vmem:[%s11924_s4 + $0xef8] sm:$0xff] %vm866_vm3, %v4025_v35  ;;  %6570 = vst.msk [vmem:[%s11924_s4 + $0x1068] sm:$0xff] %vm866_vm3, %v4349_v36 }
 0x8f5   :  { %v4029_v41 = vpop.f32.mrb[6].mxu1  ;;  %v4353_v42 = vpop.f32.mrb[6].mxu0 }
 0x8f6   :  { %6499 = vst [vmem:[%s11924_s4 + $0xf00] sm:$0xff] %v4029_v41  ;;  %6571 = vst [vmem:[%s11924_s4 + $0x1070] sm:$0xff] %v4353_v42  ;;  %v4031_v43 = vpop.f32.mrb[7].mxu1  ;;  %v4355_v3 = vpop.f32.mrb[7].mxu0 }
 0x8f7   :  { %6500 = vst.msk [vmem:[%s11924_s4 + $0xf08] sm:$0xff] %vm866_vm3, %v4031_v43  ;;  %6572 = vst.msk [vmem:[%s11924_s4 + $0x1078] sm:$0xff] %vm866_vm3, %v4355_v3 }
 0x8f9   :  { %v4035_v28 = vpop.f32.mrb[8].mxu1  ;;  %v4359_v30 = vpop.f32.mrb[8].mxu0 }
 0x8fa   :  { %6501 = vst [vmem:[%s11924_s4 + $0xf10] sm:$0xff] %v4035_v28  ;;  %6573 = vst [vmem:[%s11924_s4 + $0x1080] sm:$0xff] %v4359_v30  ;;  %v4037_v44 = vpop.f32.mrb[9].mxu1  ;;  %v4361_v63 = vpop.f32.mrb[9].mxu0 }
 0x8fb   :  { %6502 = vst.msk [vmem:[%s11924_s4 + $0xf18] sm:$0xff] %vm866_vm3, %v4037_v44  ;;  %6574 = vst.msk [vmem:[%s11924_s4 + $0x1088] sm:$0xff] %vm866_vm3, %v4361_v63  ;;  %v10858_v44 = vld [vmem:[%s11922_s2] sm:$0xff]  ;;  %v10873_v63 = vld [vmem:[%s11922_s2 + $0x8] sm:$0xff] }
 0x8fd   :  { %v4041_v6 = vpop.f32.mrb[10].mxu1  ;;  %v4365_v11 = vpop.f32.mrb[10].mxu0 }
 0x8fe   :  { %6503 = vst [vmem:[%s11924_s4 + $0xf20] sm:$0xff] %v4041_v6  ;;  %6575 = vst [vmem:[%s11924_s4 + $0x1090] sm:$0xff] %v4365_v11  ;;  %v4043_v55 = vpop.f32.mrb[11].mxu1  ;;  %v4367_v56 = vpop.f32.mrb[11].mxu0  ;;  %v11014_v6 = vld [vmem:[%s11922_s2 + $0x60] sm:$0xff]  ;;  %v11025_v11 = vld [vmem:[%s11922_s2 + $0x68] sm:$0xff] }
 0x8ff   :  { %6504 = vst.msk [vmem:[%s11924_s4 + $0xf28] sm:$0xff] %vm866_vm3, %v4043_v55  ;;  %6576 = vst.msk [vmem:[%s11924_s4 + $0x1098] sm:$0xff] %vm866_vm3, %v4367_v56  ;;  %v11036_v55 = vld [vmem:[%s11922_s2 + $0x70] sm:$0xff]  ;;  %v11047_v56 = vld [vmem:[%s11922_s2 + $0x78] sm:$0xff] }
 0x901   :  { %v4047_v14 = vpop.f32.mrb[12].mxu1  ;;  %v4371_v16 = vpop.f32.mrb[12].mxu0 }
 0x902   :  { %6505 = vst [vmem:[%s11924_s4 + $0xf30] sm:$0xff] %v4047_v14  ;;  %6577 = vst [vmem:[%s11924_s4 + $0x10a0] sm:$0xff] %v4371_v16  ;;  %v4049_v15 = vpop.f32.mrb[13].mxu1  ;;  %v4373_v17 = vpop.f32.mrb[13].mxu0  ;;  %v11058_v14 = vld [vmem:[%s11922_s2 + $0x80] sm:$0xff]  ;;  %v11069_v16 = vld [vmem:[%s11922_s2 + $0x88] sm:$0xff] }
 0x903   :  { %6506 = vst.msk [vmem:[%s11924_s4 + $0xf38] sm:$0xff] %vm866_vm3, %v4049_v15  ;;  %6578 = vst.msk [vmem:[%s11924_s4 + $0x10a8] sm:$0xff] %vm866_vm3, %v4373_v17  ;;  %v11080_v15 = vld [vmem:[%s11922_s2 + $0x90] sm:$0xff]  ;;  %v11091_v17 = vld [vmem:[%s11922_s2 + $0x98] sm:$0xff] }
 0x905   :  { %v4053_v20 = vpop.f32.mrb[14].mxu1  ;;  %v4377_v21 = vpop.f32.mrb[14].mxu0 }
 0x906   :  { %6507 = vst [vmem:[%s11924_s4 + $0xf40] sm:$0xff] %v4053_v20  ;;  %6579 = vst [vmem:[%s11924_s4 + $0x10b0] sm:$0xff] %v4377_v21  ;;  %v4055_v23 = vpop.f32.mrb[15].mxu1  ;;  %v4379_v26 = vpop.f32.mrb[15].mxu0  ;;  %v11102_v20 = vld [vmem:[%s11922_s2 + $0xa0] sm:$0xff] }
 0x907   :  { %6508 = vst.msk [vmem:[%s11924_s4 + $0xf48] sm:$0xff] %vm866_vm3, %v4055_v23  ;;  %6580 = vst.msk [vmem:[%s11924_s4 + $0x10b8] sm:$0xff] %vm866_vm3, %v4379_v26  ;;  %v334_v21 = vpop.permute.xlu1 %333  ;;  %v336_v23 = vpop.permute.xlu0 %335  ;;  %v11113_v26 = vld [vmem:[%s11922_s2 + $0xa8] sm:$0xff] }
 0x909   :  { %v4059_v7 = vpop.f32.mrb[16].mxu1  ;;  %v4383_v1 = vpop.f32.mrb[16].mxu0 }
 0x90a   :  { %6509 = vst [vmem:[%s11924_s4 + $0xf50] sm:$0xff] %v4059_v7  ;;  %6581 = vst [vmem:[%s11924_s4 + $0x10c0] sm:$0xff] %v4383_v1  ;;  %v4061_v9 = vpop.f32.mrb[17].mxu1  ;;  %v4385_v25 = vpop.f32.mrb[17].mxu0  ;;  %v267_v7 = vadd.f32 %v7534_v27, %v7479_v57  ;;  %v268_v1 = vadd.f32 %v7534_v27, %v7484_v40 }
 0x90b   :  { %6510 = vst.msk [vmem:[%s11924_s4 + $0xf58] sm:$0xff] %vm866_vm3, %v4061_v9  ;;  %6582 = vst.msk [vmem:[%s11924_s4 + $0x10c8] sm:$0xff] %vm866_vm3, %v4385_v25  ;;  %v434_v9 = vpop.permute.xlu1 %433  ;;  %v436_v25 = vpop.permute.xlu0 %435 }
 0x90d   :  { %v4065_v54 = vpop.f32.mrb[18].mxu1  ;;  %v4389_v62 = vpop.f32.mrb[18].mxu0 }
 0x90e   :  { %6511 = vst [vmem:[%s11924_s4 + $0xf60] sm:$0xff] %v4065_v54  ;;  %6583 = vst [vmem:[%s11924_s4 + $0x10d0] sm:$0xff] %v4389_v62  ;;  %v4067_v0 = vpop.f32.mrb[19].mxu1  ;;  %v4391_v45 = vpop.f32.mrb[19].mxu0  ;;  %v367_v54 = vadd.f32 %v334_v21, %v267_v7  ;;  %v368_v62 = vadd.f32 %v336_v23, %v268_v1 }
 0x90f   :  { %6512 = vst.msk [vmem:[%s11924_s4 + $0xf68] sm:$0xff] %vm866_vm3, %v4067_v0  ;;  %6584 = vst.msk [vmem:[%s11924_s4 + $0x10d8] sm:$0xff] %vm866_vm3, %v4391_v45  ;;  %v11128_v0 = vld [vmem:[%s11922_s2 + $0xb0] sm:$0x3] }
 0x910   :  { %v467_v57 = vadd.f32 %v434_v9, %v367_v54  ;;  %v468_v40 = vadd.f32 %v436_v25, %v368_v62 }
 0x911   :  { %v4071_v46 = vpop.f32.mrb[20].mxu1  ;;  %v4395_v4 = vpop.f32.mrb[20].mxu0 }
 0x912   :  { %6513 = vst [vmem:[%s11924_s4 + $0xf70] sm:$0xff] %v4071_v46  ;;  %6585 = vst [vmem:[%s11924_s4 + $0x10e0] sm:$0xff] %v4395_v4  ;;  %v4073_v5 = vpop.f32.mrb[21].mxu1  ;;  %v4397_v33 = vpop.f32.mrb[21].mxu0 }
 0x913   :  { %6514 = vst.msk [vmem:[%s11924_s4 + $0xf78] sm:$0xff] %vm866_vm3, %v4073_v5  ;;  %6586 = vst.msk [vmem:[%s11924_s4 + $0x10e8] sm:$0xff] %vm866_vm3, %v4397_v33 }
 0x915   :  { %v4077_v34 = vpop.f32.mrb[22].mxu1  ;;  %v4401_v52 = vpop.f32.mrb[22].mxu0 }
 0x916   :  { %6515 = vst [vmem:[%s11924_s4 + $0xf80] sm:$0xff] %v4077_v34  ;;  %6587 = vst [vmem:[%s11924_s4 + $0x10f0] sm:$0xff] %v4401_v52  ;;  %v4079_v53 = vpop.f32.mrb[23].mxu1  ;;  %v4403_v31 = vpop.f32.mrb[23].mxu0 }
 0x917   :  { %6516 = vst.msk [vmem:[%s11924_s4 + $0xf88] sm:$0xff] %vm866_vm3, %v4079_v53  ;;  %6588 = vst.msk [vmem:[%s11924_s4 + $0x10f8] sm:$0xff] %vm866_vm3, %v4403_v31 }
 0x919   :  { %v4083_v32 = vpop.f32.mrb[24].mxu1  ;;  %v4407_v10 = vpop.f32.mrb[24].mxu0 }
 0x91a   :  { %6517 = vst [vmem:[%s11924_s4 + $0xf90] sm:$0xff] %v4083_v32  ;;  %6589 = vst [vmem:[%s11924_s4 + $0x1100] sm:$0xff] %v4407_v10  ;;  %v4085_v47 = vpop.f32.mrb[25].mxu1  ;;  %v4409_v51 = vpop.f32.mrb[25].mxu0 }
 0x91b   :  { %6518 = vst.msk [vmem:[%s11924_s4 + $0xf98] sm:$0xff] %vm866_vm3, %v4085_v47  ;;  %6590 = vst.msk [vmem:[%s11924_s4 + $0x1108] sm:$0xff] %vm866_vm3, %v4409_v51 }
 0x91d   :  { %v4089_v58 = vpop.f32.mrb[26].mxu1  ;;  %v4413_v48 = vpop.f32.mrb[26].mxu0 }
 0x91e   :  { %6519 = vst [vmem:[%s11924_s4 + $0xfa0] sm:$0xff] %v4089_v58  ;;  %6591 = vst [vmem:[%s11924_s4 + $0x1110] sm:$0xff] %v4413_v48  ;;  %v4091_v60 = vpop.f32.mrb[27].mxu1  ;;  %v4415_v61 = vpop.f32.mrb[27].mxu0 }
 0x91f   :  { %6520 = vst.msk [vmem:[%s11924_s4 + $0xfa8] sm:$0xff] %vm866_vm3, %v4091_v60  ;;  %6592 = vst.msk [vmem:[%s11924_s4 + $0x1118] sm:$0xff] %vm866_vm3, %v4415_v61 }
 0x921   :  { %v4095_v49 = vpop.f32.mrb[28].mxu1  ;;  %v4419_v2 = vpop.f32.mrb[28].mxu0 }
 0x922   :  { %6521 = vst [vmem:[%s11924_s4 + $0xfb0] sm:$0xff] %v4095_v49  ;;  %6593 = vst [vmem:[%s11924_s4 + $0x1120] sm:$0xff] %v4419_v2  ;;  %v4097_v59 = vpop.f32.mrb[29].mxu1  ;;  %v4421_v24 = vpop.f32.mrb[29].mxu0 }
 0x923   :  { %6522 = vst.msk [vmem:[%s11924_s4 + $0xfb8] sm:$0xff] %vm866_vm3, %v4097_v59  ;;  %6594 = vst.msk [vmem:[%s11924_s4 + $0x1128] sm:$0xff] %vm866_vm3, %v4421_v24 }
 0x925   :  { %v4101_v35 = vpop.f32.mrb[30].mxu1  ;;  %v4425_v36 = vpop.f32.mrb[30].mxu0 }
 0x926   :  { %6523 = vst [vmem:[%s11924_s4 + $0xfc0] sm:$0x3] %v4101_v35  ;;  %6595 = vst [vmem:[%s11924_s4 + $0x1130] sm:$0x3] %v4425_v36  ;;  %v4103_v41 = vpop.f32.mrb[31].mxu1  ;;  %v4427_v42 = vpop.f32.mrb[31].mxu0 }
 0x927   :  { %6524 = vst.msk [vmem:[%s11924_s4 + $0xfc8] sm:$0x3] %vm911_vm4, %v4103_v41  ;;  %6596 = vst.msk [vmem:[%s11924_s4 + $0x1138] sm:$0x3] %vm911_vm4, %v4427_v42 }
 0x929   :  { %v4546_v43 = vpop.f32.mrb[32].mxu1  ;;  %v4870_v3 = vpop.f32.mrb[32].mxu0 }
 0x92a   :  { %v4548_v28 = vpop.f32.mrb[33].mxu1  ;;  %v4872_v30 = vpop.f32.mrb[33].mxu0 }
 0x92b   :  { %4551 = vmatprep.subr.mxu1 %v4548_v28  ;;  %4875 = vmatprep.subr.mxu0 %v4872_v30 }
 0x92c   :  { %4552 = vmatpush1.msra.mxu1 %v4546_v43  ;;  %4876 = vmatpush1.msra.mxu0 %v4870_v3 }
 0x92d   :  { %6600 = vmatmul.mubr.msk.f32.vlgmr.msra.gmra.mrb[34].mxu1 %vm592_vm2, %v10858_v44  ;;  %6672 = vmatmul.mubr.msk.f32.vlgmr.msra.gmra.mrb[34].mxu0 %vm592_vm2, %v10858_v44 }
 0x92e   :  { %7110 = vmatprep.subr.bf16.mxu1 %v7350_v8  ;;  %7126 = vmatprep.subr.bf16.mxu0 %v7350_v8  ;;  %v10888_v8 = vld [vmem:[%s11922_s2 + $0x10] sm:$0xff] }
 0x92f   :  { %4621 = vmatprep.mubr.f32.mxu1 %v7295_v50  ;;  %4945 = vmatprep.mubr.f32.mxu0 %v7295_v50 }
 0x930   :  { %7112 = vmatpush1.bf16.msra.mxu1 %v7352_v12  ;;  %7128 = vmatpush1.bf16.msra.mxu0 %v7352_v12  ;;  %v10903_v12 = vld [vmem:[%s11922_s2 + $0x18] sm:$0xff] }
 0x931   :  { %6601 = vmatmul.mubr.msk.f32.gmra.mrb[36].mxu1 %vm592_vm2, %v10873_v63  ;;  %6673 = vmatmul.mubr.msk.f32.gmra.mrb[36].mxu0 %vm592_vm2, %v10873_v63 }
 0x932   :  { %4627 = vmatprep.mubr.f32.mxu1 %v7295_v50  ;;  %4951 = vmatprep.mubr.f32.mxu0 %v7295_v50 }
 0x933   :  { %7114 = vmatprep.subr.bf16.mxu1 %v7354_v13  ;;  %7130 = vmatprep.subr.bf16.mxu0 %v7354_v13  ;;  %v10918_v13 = vld [vmem:[%s11922_s2 + $0x20] sm:$0xff] }
 0x934   :  { %7116 = vmatpush1.bf16.msra.mxu1 %v7360_v18  ;;  %7132 = vmatpush1.bf16.msra.mxu0 %v7360_v18  ;;  %v10937_v18 = vld [vmem:[%s11922_s2 + $0x28] sm:$0xff] }
 0x935   :  { %6602 = vmatmul.mubr.msk.f32.gmra.mrb[38].mxu1 %vm592_vm2, %v10888_v8  ;;  %6674 = vmatmul.mubr.msk.f32.gmra.mrb[38].mxu0 %vm592_vm2, %v10888_v8 }
 0x936   :  { %4633 = vmatprep.mubr.f32.mxu1 %v7295_v50  ;;  %4957 = vmatprep.mubr.f32.mxu0 %v7295_v50 }
 0x937   :  { %7118 = vmatprep.subr.bf16.mxu1 %v7364_v19  ;;  %7134 = vmatprep.subr.bf16.mxu0 %v7364_v19  ;;  %v10948_v19 = vld [vmem:[%s11922_s2 + $0x30] sm:$0xff] }
 0x938   :  { %7120 = vmatpush1.bf16.msra.mxu1 %v7368_v22  ;;  %7136 = vmatpush1.bf16.msra.mxu0 %v7368_v22  ;;  %v10959_v22 = vld [vmem:[%s11922_s2 + $0x38] sm:$0xff] }
 0x939   :  { %6603 = vmatmul.mubr.msk.f32.gmra.mrb[40].mxu1 %vm592_vm2, %v10903_v12  ;;  %6675 = vmatmul.mubr.msk.f32.gmra.mrb[40].mxu0 %vm592_vm2, %v10903_v12 }
 0x93a   :  { %4639 = vmatprep.mubr.f32.mxu1 %v7295_v50  ;;  %4963 = vmatprep.mubr.f32.mxu0 %v7295_v50 }
 0x93b   :  { %7122 = vmatprep.subr.bf16.mxu1 %v7374_v37  ;;  %7138 = vmatprep.subr.bf16.mxu0 %v7374_v37  ;;  %v10970_v37 = vld [vmem:[%s11922_s2 + $0x40] sm:$0xff] }
 0x93c   :  { %7124 = vmatpush1.bf16.msra.mxu1 %v7376_v39  ;;  %7140 = vmatpush1.bf16.msra.mxu0 %v7376_v39  ;;  %v10981_v39 = vld [vmem:[%s11922_s2 + $0x48] sm:$0xff] }
 0x93d   :  { %6604 = vmatmul.mubr.msk.f32.gmra.mrb[42].mxu1 %vm592_vm2, %v10918_v13  ;;  %6676 = vmatmul.mubr.msk.f32.gmra.mrb[42].mxu0 %vm592_vm2, %v10918_v13 }
 0x93e   :  { %4645 = vmatprep.mubr.f32.mxu1 %v7295_v50  ;;  %4969 = vmatprep.mubr.f32.mxu0 %v7295_v50 }
 0x93f   :  { %6741 = vmatprep.subr.msk.mxu1 %vm514_vm0, %v10405_v29  ;;  %6813 = vmatprep.subr.msk.mxu0 %vm514_vm0, %v10405_v29  ;;  %v10992_v29 = vld [vmem:[%s11922_s2 + $0x50] sm:$0xff] }
 0x940   :  { %6742 = vmatpush1.msk.msra.mxu1 %vm514_vm0, %v10411_v38  ;;  %6814 = vmatpush1.msk.msra.mxu0 %vm514_vm0, %v10411_v38  ;;  %v11003_v38 = vld [vmem:[%s11922_s2 + $0x58] sm:$0xff] }
 0x941   :  { %6605 = vmatmul.mubr.msk.f32.gmra.mrb[44].mxu1 %vm592_vm2, %v10937_v18  ;;  %6677 = vmatmul.mubr.msk.f32.gmra.mrb[44].mxu0 %vm592_vm2, %v10937_v18 }
 0x942   :  { %4651 = vmatprep.mubr.f32.mxu1 %v7295_v50  ;;  %4975 = vmatprep.mubr.f32.mxu0 %v7295_v50 }
 0x945   :  { %6606 = vmatmul.mubr.msk.f32.gmra.mrb[46].mxu1 %vm592_vm2, %v10948_v19  ;;  %6678 = vmatmul.mubr.msk.f32.gmra.mrb[46].mxu0 %vm592_vm2, %v10948_v19 }
 0x946   :  { %4657 = vmatprep.mubr.f32.mxu1 %v7295_v50  ;;  %4981 = vmatprep.mubr.f32.mxu0 %v7295_v50 }
 0x949   :  { %6607 = vmatmul.mubr.msk.f32.gmra.mrb[48].mxu1 %vm592_vm2, %v10959_v22  ;;  %6679 = vmatmul.mubr.msk.f32.gmra.mrb[48].mxu0 %vm592_vm2, %v10959_v22 }
 0x94a   :  { %4663 = vmatprep.mubr.f32.mxu1 %v7295_v50  ;;  %4987 = vmatprep.mubr.f32.mxu0 %v7295_v50 }
 0x94d   :  { %6608 = vmatmul.mubr.msk.f32.gmra.mrb[50].mxu1 %vm592_vm2, %v10970_v37  ;;  %6680 = vmatmul.mubr.msk.f32.gmra.mrb[50].mxu0 %vm592_vm2, %v10970_v37 }
 0x94e   :  { %4669 = vmatprep.mubr.f32.mxu1 %v7295_v50  ;;  %4993 = vmatprep.mubr.f32.mxu0 %v7295_v50 }
 0x951   :  { %6609 = vmatmul.mubr.msk.f32.gmra.mrb[52].mxu1 %vm592_vm2, %v10981_v39  ;;  %6681 = vmatmul.mubr.msk.f32.gmra.mrb[52].mxu0 %vm592_vm2, %v10981_v39 }
 0x952   :  { %4675 = vmatprep.mubr.f32.mxu1 %v7295_v50  ;;  %4999 = vmatprep.mubr.f32.mxu0 %v7295_v50 }
 0x955   :  { %6610 = vmatmul.mubr.msk.f32.gmra.mrb[54].mxu1 %vm592_vm2, %v10992_v29  ;;  %6682 = vmatmul.mubr.msk.f32.gmra.mrb[54].mxu0 %vm592_vm2, %v10992_v29 }
 0x956   :  { %4681 = vmatprep.mubr.f32.mxu1 %v7295_v50  ;;  %5005 = vmatprep.mubr.f32.mxu0 %v7295_v50 }
 0x959   :  { %6611 = vmatmul.mubr.msk.f32.gmra.mrb[56].mxu1 %vm592_vm2, %v11003_v38  ;;  %6683 = vmatmul.mubr.msk.f32.gmra.mrb[56].mxu0 %vm592_vm2, %v11003_v38 }
 0x95a   :  { %4687 = vmatprep.mubr.f32.mxu1 %v7295_v50  ;;  %5011 = vmatprep.mubr.f32.mxu0 %v7295_v50 }
 0x95d   :  { %6612 = vmatmul.mubr.msk.f32.gmra.mrb[58].mxu1 %vm592_vm2, %v11014_v6  ;;  %6684 = vmatmul.mubr.msk.f32.gmra.mrb[58].mxu0 %vm592_vm2, %v11014_v6 }
 0x95e   :  { %4693 = vmatprep.mubr.f32.mxu1 %v7295_v50  ;;  %5017 = vmatprep.mubr.f32.mxu0 %v7295_v50 }
 0x961   :  { %6613 = vmatmul.mubr.msk.f32.gmra.mrb[60].mxu1 %vm592_vm2, %v11025_v11  ;;  %6685 = vmatmul.mubr.msk.f32.gmra.mrb[60].mxu0 %vm592_vm2, %v11025_v11 }
 0x962   :  { %4699 = vmatprep.mubr.f32.mxu1 %v7295_v50  ;;  %5023 = vmatprep.mubr.f32.mxu0 %v7295_v50 }
 0x965   :  { %6614 = vmatmul.mubr.msk.f32.gmra.mrb[62].mxu1 %vm592_vm2, %v11036_v55  ;;  %6686 = vmatmul.mubr.msk.f32.gmra.mrb[62].mxu0 %vm592_vm2, %v11036_v55 }
 0x966   :  { %4705 = vmatprep.mubr.f32.mxu1 %v7295_v50  ;;  %5029 = vmatprep.mubr.f32.mxu0 %v7295_v50 }
 0x969   :  { %6615 = vmatmul.mubr.msk.f32.gmra.mrb[64].mxu1 %vm592_vm2, %v11047_v56  ;;  %6687 = vmatmul.mubr.msk.f32.gmra.mrb[64].mxu0 %vm592_vm2, %v11047_v56 }
 0x96a   :  { %4711 = vmatprep.mubr.f32.mxu1 %v7295_v50  ;;  %5035 = vmatprep.mubr.f32.mxu0 %v7295_v50 }
 0x96d   :  { %6616 = vmatmul.mubr.msk.f32.gmra.mrb[66].mxu1 %vm592_vm2, %v11058_v14  ;;  %6688 = vmatmul.mubr.msk.f32.gmra.mrb[66].mxu0 %vm592_vm2, %v11058_v14 }
 0x96e   :  { %4717 = vmatprep.mubr.f32.mxu1 %v7295_v50  ;;  %5041 = vmatprep.mubr.f32.mxu0 %v7295_v50 }
 0x971   :  { %6617 = vmatmul.mubr.msk.f32.gmra.mrb[68].mxu1 %vm592_vm2, %v11069_v16  ;;  %6689 = vmatmul.mubr.msk.f32.gmra.mrb[68].mxu0 %vm592_vm2, %v11069_v16 }
 0x972   :  { %4723 = vmatprep.mubr.f32.mxu1 %v7295_v50  ;;  %5047 = vmatprep.mubr.f32.mxu0 %v7295_v50 }
 0x975   :  { %6618 = vmatmul.mubr.msk.f32.gmra.mrb[70].mxu1 %vm592_vm2, %v11080_v15  ;;  %6690 = vmatmul.mubr.msk.f32.gmra.mrb[70].mxu0 %vm592_vm2, %v11080_v15 }
 0x976   :  { %4729 = vmatprep.mubr.f32.mxu1 %v7295_v50  ;;  %5053 = vmatprep.mubr.f32.mxu0 %v7295_v50 }
 0x979   :  { %6619 = vmatmul.mubr.msk.f32.gmra.mrb[72].mxu1 %vm592_vm2, %v11091_v17  ;;  %6691 = vmatmul.mubr.msk.f32.gmra.mrb[72].mxu0 %vm592_vm2, %v11091_v17 }
 0x97a   :  { %4735 = vmatprep.mubr.f32.mxu1 %v7295_v50  ;;  %5059 = vmatprep.mubr.f32.mxu0 %v7295_v50 }
 0x97d   :  { %6620 = vmatmul.mubr.msk.f32.gmra.mrb[74].mxu1 %vm592_vm2, %v11102_v20  ;;  %6692 = vmatmul.mubr.msk.f32.gmra.mrb[74].mxu0 %vm592_vm2, %v11102_v20 }
 0x97e   :  { %4741 = vmatprep.mubr.f32.mxu1 %v7295_v50  ;;  %5065 = vmatprep.mubr.f32.mxu0 %v7295_v50 }
 0x981   :  { %6621 = vmatmul.mubr.msk.f32.gmra.mrb[76].mxu1 %vm592_vm2, %v11113_v26  ;;  %6693 = vmatmul.mubr.msk.f32.gmra.mrb[76].mxu0 %vm592_vm2, %v11113_v26 }
 0x982   :  { %4747 = vmatprep.mubr.f32.mxu1 %v7295_v50  ;;  %5071 = vmatprep.mubr.f32.mxu0 %v7295_v50 }
 0x985   :  { %6622 = vmatmul.mubr.msk.f32.gmra.mrb[78].mxu1 %vm592_vm2, %v11128_v0  ;;  %6694 = vmatmul.mubr.msk.f32.gmra.mrb[78].mxu0 %vm592_vm2, %v11128_v0 }
 0x986   :  { %5192 = vmatprep.mubr.f32.mxu1 %v7295_v50  ;;  %5516 = vmatprep.mubr.f32.mxu0 %v7295_v50 }
 0x989   :  { %6743 = vmatmul.mubr.msk.f32.vlgmr.msra.gmra.mrb[80].mxu1 %vm510_vm1, %v467_v57  ;;  %6815 = vmatmul.mubr.msk.f32.vlgmr.msra.gmra.mrb[80].mxu0 %vm510_vm1, %v468_v40 }
 0x98a   :  { %5263 = vmatprep.mubr.f32.mxu1 %v7295_v50  ;;  %5587 = vmatprep.mubr.f32.mxu0 %v7295_v50 }
 0xa00   :  { %v4617_v27 = vpop.f32.mrb[34].mxu1  ;;  %v4941_v45 = vpop.f32.mrb[34].mxu0 }
 0xa01   :  { %6623 = vst [vmem:[%s11924_s4 + $0x1140] sm:$0xff] %v4617_v27  ;;  %6695 = vst [vmem:[%s11924_s4 + $0x12b0] sm:$0xff] %v4941_v45  ;;  %v4619_v46 = vpop.f32.mrb[35].mxu1  ;;  %v4943_v4 = vpop.f32.mrb[35].mxu0 }
 0xa02   :  { %6624 = vst.msk [vmem:[%s11924_s4 + $0x1148] sm:$0xff] %vm866_vm3, %v4619_v46  ;;  %6696 = vst.msk [vmem:[%s11924_s4 + $0x12b8] sm:$0xff] %vm866_vm3, %v4943_v4 }
 0xa04   :  { %v4623_v5 = vpop.f32.mrb[36].mxu1  ;;  %v4947_v33 = vpop.f32.mrb[36].mxu0 }
 0xa05   :  { %6625 = vst [vmem:[%s11924_s4 + $0x1150] sm:$0xff] %v4623_v5  ;;  %6697 = vst [vmem:[%s11924_s4 + $0x12c0] sm:$0xff] %v4947_v33  ;;  %v4625_v34 = vpop.f32.mrb[37].mxu1  ;;  %v4949_v52 = vpop.f32.mrb[37].mxu0 }
 0xa06   :  { %6626 = vst.msk [vmem:[%s11924_s4 + $0x1158] sm:$0xff] %vm866_vm3, %v4625_v34  ;;  %6698 = vst.msk [vmem:[%s11924_s4 + $0x12c8] sm:$0xff] %vm866_vm3, %v4949_v52 }
 0xa08   :  { %v4629_v53 = vpop.f32.mrb[38].mxu1  ;;  %v4953_v31 = vpop.f32.mrb[38].mxu0 }
 0xa09   :  { %6627 = vst [vmem:[%s11924_s4 + $0x1160] sm:$0xff] %v4629_v53  ;;  %6699 = vst [vmem:[%s11924_s4 + $0x12d0] sm:$0xff] %v4953_v31  ;;  %v4631_v32 = vpop.f32.mrb[39].mxu1  ;;  %v4955_v10 = vpop.f32.mrb[39].mxu0 }
 0xa0a   :  { %6628 = vst.msk [vmem:[%s11924_s4 + $0x1168] sm:$0xff] %vm866_vm3, %v4631_v32  ;;  %6700 = vst.msk [vmem:[%s11924_s4 + $0x12d8] sm:$0xff] %vm866_vm3, %v4955_v10 }
 0xa0c   :  { %v4635_v47 = vpop.f32.mrb[40].mxu1  ;;  %v4959_v51 = vpop.f32.mrb[40].mxu0 }
 0xa0d   :  { %6629 = vst [vmem:[%s11924_s4 + $0x1170] sm:$0xff] %v4635_v47  ;;  %6701 = vst [vmem:[%s11924_s4 + $0x12e0] sm:$0xff] %v4959_v51  ;;  %v4637_v58 = vpop.f32.mrb[41].mxu1  ;;  %v4961_v48 = vpop.f32.mrb[41].mxu0 }
 0xa0e   :  { %6630 = vst.msk [vmem:[%s11924_s4 + $0x1178] sm:$0xff] %vm866_vm3, %v4637_v58  ;;  %6702 = vst.msk [vmem:[%s11924_s4 + $0x12e8] sm:$0xff] %vm866_vm3, %v4961_v48 }
 0xa10   :  { %v4641_v60 = vpop.f32.mrb[42].mxu1  ;;  %v4965_v61 = vpop.f32.mrb[42].mxu0 }
 0xa11   :  { %6631 = vst [vmem:[%s11924_s4 + $0x1180] sm:$0xff] %v4641_v60  ;;  %6703 = vst [vmem:[%s11924_s4 + $0x12f0] sm:$0xff] %v4965_v61  ;;  %v4643_v49 = vpop.f32.mrb[43].mxu1  ;;  %v4967_v2 = vpop.f32.mrb[43].mxu0 }
 0xa12   :  { %6632 = vst.msk [vmem:[%s11924_s4 + $0x1188] sm:$0xff] %vm866_vm3, %v4643_v49  ;;  %6704 = vst.msk [vmem:[%s11924_s4 + $0x12f8] sm:$0xff] %vm866_vm3, %v4967_v2 }
 0xa14   :  { %v4647_v59 = vpop.f32.mrb[44].mxu1  ;;  %v4971_v24 = vpop.f32.mrb[44].mxu0 }
 0xa15   :  { %6633 = vst [vmem:[%s11924_s4 + $0x1190] sm:$0xff] %v4647_v59  ;;  %6705 = vst [vmem:[%s11924_s4 + $0x1300] sm:$0xff] %v4971_v24  ;;  %v4649_v35 = vpop.f32.mrb[45].mxu1  ;;  %v4973_v36 = vpop.f32.mrb[45].mxu0 }
 0xa16   :  { %6634 = vst.msk [vmem:[%s11924_s4 + $0x1198] sm:$0xff] %vm866_vm3, %v4649_v35  ;;  %6706 = vst.msk [vmem:[%s11924_s4 + $0x1308] sm:$0xff] %vm866_vm3, %v4973_v36 }
 0xa18   :  { %v4653_v41 = vpop.f32.mrb[46].mxu1  ;;  %v4977_v42 = vpop.f32.mrb[46].mxu0 }
 0xa19   :  { %6635 = vst [vmem:[%s11924_s4 + $0x11a0] sm:$0xff] %v4653_v41  ;;  %6707 = vst [vmem:[%s11924_s4 + $0x1310] sm:$0xff] %v4977_v42  ;;  %v4655_v43 = vpop.f32.mrb[47].mxu1  ;;  %v4979_v3 = vpop.f32.mrb[47].mxu0 }
 0xa1a   :  { %6636 = vst.msk [vmem:[%s11924_s4 + $0x11a8] sm:$0xff] %vm866_vm3, %v4655_v43  ;;  %6708 = vst.msk [vmem:[%s11924_s4 + $0x1318] sm:$0xff] %vm866_vm3, %v4979_v3 }
 0xa1c   :  { %v4659_v28 = vpop.f32.mrb[48].mxu1  ;;  %v4983_v30 = vpop.f32.mrb[48].mxu0 }
 0xa1d   :  { %6637 = vst [vmem:[%s11924_s4 + $0x11b0] sm:$0xff] %v4659_v28  ;;  %6709 = vst [vmem:[%s11924_s4 + $0x1320] sm:$0xff] %v4983_v30  ;;  %v4661_v21 = vpop.f32.mrb[49].mxu1  ;;  %v4985_v23 = vpop.f32.mrb[49].mxu0 }
 0xa1e   :  { %6638 = vst.msk [vmem:[%s11924_s4 + $0x11b8] sm:$0xff] %vm866_vm3, %v4661_v21  ;;  %6710 = vst.msk [vmem:[%s11924_s4 + $0x1328] sm:$0xff] %vm866_vm3, %v4985_v23 }
 0xa20   :  { %v4665_v7 = vpop.f32.mrb[50].mxu1  ;;  %v4989_v1 = vpop.f32.mrb[50].mxu0 }
 0xa21   :  { %6639 = vst [vmem:[%s11924_s4 + $0x11c0] sm:$0xff] %v4665_v7  ;;  %6711 = vst [vmem:[%s11924_s4 + $0x1330] sm:$0xff] %v4989_v1  ;;  %v4667_v9 = vpop.f32.mrb[51].mxu1  ;;  %v4991_v25 = vpop.f32.mrb[51].mxu0 }
 0xa22   :  { %6640 = vst.msk [vmem:[%s11924_s4 + $0x11c8] sm:$0xff] %vm866_vm3, %v4667_v9  ;;  %6712 = vst.msk [vmem:[%s11924_s4 + $0x1338] sm:$0xff] %vm866_vm3, %v4991_v25 }
 0xa24   :  { %v4671_v54 = vpop.f32.mrb[52].mxu1  ;;  %v4995_v62 = vpop.f32.mrb[52].mxu0 }
 0xa25   :  { %6641 = vst [vmem:[%s11924_s4 + $0x11d0] sm:$0xff] %v4671_v54  ;;  %6713 = vst [vmem:[%s11924_s4 + $0x1340] sm:$0xff] %v4995_v62  ;;  %v4673_v57 = vpop.f32.mrb[53].mxu1  ;;  %v4997_v40 = vpop.f32.mrb[53].mxu0 }
 0xa26   :  { %6642 = vst.msk [vmem:[%s11924_s4 + $0x11d8] sm:$0xff] %vm866_vm3, %v4673_v57  ;;  %6714 = vst.msk [vmem:[%s11924_s4 + $0x1348] sm:$0xff] %vm866_vm3, %v4997_v40 }
 0xa28   :  { %v4677_v27 = vpop.f32.mrb[54].mxu1  ;;  %v5001_v45 = vpop.f32.mrb[54].mxu0 }
 0xa29   :  { %6643 = vst [vmem:[%s11924_s4 + $0x11e0] sm:$0xff] %v4677_v27  ;;  %6715 = vst [vmem:[%s11924_s4 + $0x1350] sm:$0xff] %v5001_v45  ;;  %v4679_v46 = vpop.f32.mrb[55].mxu1  ;;  %v5003_v4 = vpop.f32.mrb[55].mxu0 }
 0xa2a   :  { %6644 = vst.msk [vmem:[%s11924_s4 + $0x11e8] sm:$0xff] %vm866_vm3, %v4679_v46  ;;  %6716 = vst.msk [vmem:[%s11924_s4 + $0x1358] sm:$0xff] %vm866_vm3, %v5003_v4 }
 0xa2c   :  { %v4683_v5 = vpop.f32.mrb[56].mxu1  ;;  %v5007_v33 = vpop.f32.mrb[56].mxu0 }
 0xa2d   :  { %6645 = vst [vmem:[%s11924_s4 + $0x11f0] sm:$0xff] %v4683_v5  ;;  %6717 = vst [vmem:[%s11924_s4 + $0x1360] sm:$0xff] %v5007_v33  ;;  %v4685_v34 = vpop.f32.mrb[57].mxu1  ;;  %v5009_v52 = vpop.f32.mrb[57].mxu0 }
 0xa2e   :  { %6646 = vst.msk [vmem:[%s11924_s4 + $0x11f8] sm:$0xff] %vm866_vm3, %v4685_v34  ;;  %6718 = vst.msk [vmem:[%s11924_s4 + $0x1368] sm:$0xff] %vm866_vm3, %v5009_v52 }
 0xa30   :  { %v4689_v53 = vpop.f32.mrb[58].mxu1  ;;  %v5013_v31 = vpop.f32.mrb[58].mxu0 }
 0xa31   :  { %6647 = vst [vmem:[%s11924_s4 + $0x1200] sm:$0xff] %v4689_v53  ;;  %6719 = vst [vmem:[%s11924_s4 + $0x1370] sm:$0xff] %v5013_v31  ;;  %v4691_v32 = vpop.f32.mrb[59].mxu1  ;;  %v5015_v10 = vpop.f32.mrb[59].mxu0 }
 0xa32   :  { %6648 = vst.msk [vmem:[%s11924_s4 + $0x1208] sm:$0xff] %vm866_vm3, %v4691_v32  ;;  %6720 = vst.msk [vmem:[%s11924_s4 + $0x1378] sm:$0xff] %vm866_vm3, %v5015_v10 }
 0xa34   :  { %v4695_v47 = vpop.f32.mrb[60].mxu1  ;;  %v5019_v51 = vpop.f32.mrb[60].mxu0 }
 0xa35   :  { %6649 = vst [vmem:[%s11924_s4 + $0x1210] sm:$0xff] %v4695_v47  ;;  %6721 = vst [vmem:[%s11924_s4 + $0x1380] sm:$0xff] %v5019_v51  ;;  %v4697_v58 = vpop.f32.mrb[61].mxu1  ;;  %v5021_v48 = vpop.f32.mrb[61].mxu0 }
 0xa36   :  { %6650 = vst.msk [vmem:[%s11924_s4 + $0x1218] sm:$0xff] %vm866_vm3, %v4697_v58  ;;  %6722 = vst.msk [vmem:[%s11924_s4 + $0x1388] sm:$0xff] %vm866_vm3, %v5021_v48 }
 0xa38   :  { %v4701_v60 = vpop.f32.mrb[62].mxu1  ;;  %v5025_v61 = vpop.f32.mrb[62].mxu0 }
 0xa39   :  { %6651 = vst [vmem:[%s11924_s4 + $0x1220] sm:$0xff] %v4701_v60  ;;  %6723 = vst [vmem:[%s11924_s4 + $0x1390] sm:$0xff] %v5025_v61  ;;  %v4703_v49 = vpop.f32.mrb[63].mxu1  ;;  %v5027_v2 = vpop.f32.mrb[63].mxu0 }
 0xa3a   :  { %6652 = vst.msk [vmem:[%s11924_s4 + $0x1228] sm:$0xff] %vm866_vm3, %v4703_v49  ;;  %6724 = vst.msk [vmem:[%s11924_s4 + $0x1398] sm:$0xff] %vm866_vm3, %v5027_v2 }
 0xa3c   :  { %v4707_v59 = vpop.f32.mrb[64].mxu1  ;;  %v5031_v24 = vpop.f32.mrb[64].mxu0 }
 0xa3d   :  { %6653 = vst [vmem:[%s11924_s4 + $0x1230] sm:$0xff] %v4707_v59  ;;  %6725 = vst [vmem:[%s11924_s4 + $0x13a0] sm:$0xff] %v5031_v24  ;;  %v4709_v35 = vpop.f32.mrb[65].mxu1  ;;  %v5033_v36 = vpop.f32.mrb[65].mxu0 }
 0xa3e   :  { %6654 = vst.msk [vmem:[%s11924_s4 + $0x1238] sm:$0xff] %vm866_vm3, %v4709_v35  ;;  %6726 = vst.msk [vmem:[%s11924_s4 + $0x13a8] sm:$0xff] %vm866_vm3, %v5033_v36 }
 0xa40   :  { %v4713_v41 = vpop.f32.mrb[66].mxu1  ;;  %v5037_v42 = vpop.f32.mrb[66].mxu0 }
 0xa41   :  { %6655 = vst [vmem:[%s11924_s4 + $0x1240] sm:$0xff] %v4713_v41  ;;  %6727 = vst [vmem:[%s11924_s4 + $0x13b0] sm:$0xff] %v5037_v42  ;;  %v4715_v43 = vpop.f32.mrb[67].mxu1  ;;  %v5039_v3 = vpop.f32.mrb[67].mxu0 }
 0xa42   :  { %6656 = vst.msk [vmem:[%s11924_s4 + $0x1248] sm:$0xff] %vm866_vm3, %v4715_v43  ;;  %6728 = vst.msk [vmem:[%s11924_s4 + $0x13b8] sm:$0xff] %vm866_vm3, %v5039_v3 }
 0xa44   :  { %v4719_v28 = vpop.f32.mrb[68].mxu1  ;;  %v5043_v30 = vpop.f32.mrb[68].mxu0 }
 0xa45   :  { %6657 = vst [vmem:[%s11924_s4 + $0x1250] sm:$0xff] %v4719_v28  ;;  %6729 = vst [vmem:[%s11924_s4 + $0x13c0] sm:$0xff] %v5043_v30  ;;  %v4721_v21 = vpop.f32.mrb[69].mxu1  ;;  %v5045_v23 = vpop.f32.mrb[69].mxu0 }
 0xa46   :  { %6658 = vst.msk [vmem:[%s11924_s4 + $0x1258] sm:$0xff] %vm866_vm3, %v4721_v21  ;;  %6730 = vst.msk [vmem:[%s11924_s4 + $0x13c8] sm:$0xff] %vm866_vm3, %v5045_v23 }
 0xa48   :  { %v4725_v7 = vpop.f32.mrb[70].mxu1  ;;  %v5049_v1 = vpop.f32.mrb[70].mxu0 }
 0xa49   :  { %6659 = vst [vmem:[%s11924_s4 + $0x1260] sm:$0xff] %v4725_v7  ;;  %6731 = vst [vmem:[%s11924_s4 + $0x13d0] sm:$0xff] %v5049_v1  ;;  %v4727_v9 = vpop.f32.mrb[71].mxu1  ;;  %v5051_v25 = vpop.f32.mrb[71].mxu0 }
 0xa4a   :  { %6660 = vst.msk [vmem:[%s11924_s4 + $0x1268] sm:$0xff] %vm866_vm3, %v4727_v9  ;;  %6732 = vst.msk [vmem:[%s11924_s4 + $0x13d8] sm:$0xff] %vm866_vm3, %v5051_v25 }
 0xa4c   :  { %v4731_v54 = vpop.f32.mrb[72].mxu1  ;;  %v5055_v62 = vpop.f32.mrb[72].mxu0 }
 0xa4d   :  { %6661 = vst [vmem:[%s11924_s4 + $0x1270] sm:$0xff] %v4731_v54  ;;  %6733 = vst [vmem:[%s11924_s4 + $0x13e0] sm:$0xff] %v5055_v62  ;;  %v4733_v57 = vpop.f32.mrb[73].mxu1  ;;  %v5057_v40 = vpop.f32.mrb[73].mxu0 }
 0xa4e   :  { %6662 = vst.msk [vmem:[%s11924_s4 + $0x1278] sm:$0xff] %vm866_vm3, %v4733_v57  ;;  %6734 = vst.msk [vmem:[%s11924_s4 + $0x13e8] sm:$0xff] %vm866_vm3, %v5057_v40 }
 0xa50   :  { %v4737_v27 = vpop.f32.mrb[74].mxu1  ;;  %v5061_v45 = vpop.f32.mrb[74].mxu0 }
 0xa51   :  { %6663 = vst [vmem:[%s11924_s4 + $0x1280] sm:$0xff] %v4737_v27  ;;  %6735 = vst [vmem:[%s11924_s4 + $0x13f0] sm:$0xff] %v5061_v45  ;;  %v4739_v46 = vpop.f32.mrb[75].mxu1  ;;  %v5063_v4 = vpop.f32.mrb[75].mxu0 }
 0xa52   :  { %6664 = vst.msk [vmem:[%s11924_s4 + $0x1288] sm:$0xff] %vm866_vm3, %v4739_v46  ;;  %6736 = vst.msk [vmem:[%s11924_s4 + $0x13f8] sm:$0xff] %vm866_vm3, %v5063_v4 }
 0xa54   :  { %v4743_v5 = vpop.f32.mrb[76].mxu1  ;;  %v5067_v33 = vpop.f32.mrb[76].mxu0 }
 0xa55   :  { %6665 = vst [vmem:[%s11924_s4 + $0x1290] sm:$0xff] %v4743_v5  ;;  %6737 = vst [vmem:[%s11924_s4 + $0x1400] sm:$0xff] %v5067_v33  ;;  %v4745_v34 = vpop.f32.mrb[77].mxu1  ;;  %v5069_v52 = vpop.f32.mrb[77].mxu0 }
 0xa56   :  { %6666 = vst.msk [vmem:[%s11924_s4 + $0x1298] sm:$0xff] %vm866_vm3, %v4745_v34  ;;  %6738 = vst.msk [vmem:[%s11924_s4 + $0x1408] sm:$0xff] %vm866_vm3, %v5069_v52 }
 0xa58   :  { %v4749_v53 = vpop.f32.mrb[78].mxu1  ;;  %v5073_v31 = vpop.f32.mrb[78].mxu0 }
 0xa59   :  { %6667 = vst [vmem:[%s11924_s4 + $0x12a0] sm:$0x3] %v4749_v53  ;;  %6739 = vst [vmem:[%s11924_s4 + $0x1410] sm:$0x3] %v5073_v31  ;;  %v4751_v32 = vpop.f32.mrb[79].mxu1  ;;  %v5075_v10 = vpop.f32.mrb[79].mxu0 }
 0xa5a   :  { %6668 = vst.msk [vmem:[%s11924_s4 + $0x12a8] sm:$0x3] %vm911_vm4, %v4751_v32  ;;  %6740 = vst.msk [vmem:[%s11924_s4 + $0x1418] sm:$0x3] %vm911_vm4, %v5075_v10 }
 0xa5c   :  { %v5194_v47 = vpop.f32.mrb[80].mxu1  ;;  %v5518_v51 = vpop.f32.mrb[80].mxu0 }
 0xa5d   :  { %v5196_v58 = vpop.f32.mrb[81].mxu1  ;;  %v5520_v48 = vpop.f32.mrb[81].mxu0 }
 0xa5e   :  { %5199 = vmatprep.subr.mxu1 %v5196_v58  ;;  %5523 = vmatprep.subr.mxu0 %v5520_v48 }
 0xa5f   :  { %5200 = vmatpush1.msra.mxu1 %v5194_v47  ;;  %5524 = vmatpush1.msra.mxu0 %v5518_v51 }
 0xa60   :  { %6744 = vmatmul.mubr.msk.f32.vlgmr.msra.gmra.mrb[82].mxu1 %vm592_vm2, %v10858_v44  ;;  %6816 = vmatmul.mubr.msk.f32.vlgmr.msra.gmra.mrb[82].mxu0 %vm592_vm2, %v10858_v44 }
 0xa61   :  { %5269 = vmatprep.mubr.f32.mxu1 %v7295_v50  ;;  %5593 = vmatprep.mubr.f32.mxu0 %v7295_v50 }
 0xa64   :  { %6745 = vmatmul.mubr.msk.f32.gmra.mrb[84].mxu1 %vm592_vm2, %v10873_v63  ;;  %6817 = vmatmul.mubr.msk.f32.gmra.mrb[84].mxu0 %vm592_vm2, %v10873_v63 }
 0xa65   :  { %5275 = vmatprep.mubr.f32.mxu1 %v7295_v50  ;;  %5599 = vmatprep.mubr.f32.mxu0 %v7295_v50 }
 0xa68   :  { %6746 = vmatmul.mubr.msk.f32.gmra.mrb[86].mxu1 %vm592_vm2, %v10888_v8  ;;  %6818 = vmatmul.mubr.msk.f32.gmra.mrb[86].mxu0 %vm592_vm2, %v10888_v8 }
 0xa69   :  { %5281 = vmatprep.mubr.f32.mxu1 %v7295_v50  ;;  %5605 = vmatprep.mubr.f32.mxu0 %v7295_v50 }
 0xa6c   :  { %6747 = vmatmul.mubr.msk.f32.gmra.mrb[88].mxu1 %vm592_vm2, %v10903_v12  ;;  %6819 = vmatmul.mubr.msk.f32.gmra.mrb[88].mxu0 %vm592_vm2, %v10903_v12 }
 0xa6d   :  { %5287 = vmatprep.mubr.f32.mxu1 %v7295_v50  ;;  %5611 = vmatprep.mubr.f32.mxu0 %v7295_v50 }
 0xa70   :  { %6748 = vmatmul.mubr.msk.f32.gmra.mrb[90].mxu1 %vm592_vm2, %v10918_v13  ;;  %6820 = vmatmul.mubr.msk.f32.gmra.mrb[90].mxu0 %vm592_vm2, %v10918_v13 }
 0xa71   :  { %5293 = vmatprep.mubr.f32.mxu1 %v7295_v50  ;;  %5617 = vmatprep.mubr.f32.mxu0 %v7295_v50 }
 0xa74   :  { %6749 = vmatmul.mubr.msk.f32.gmra.mrb[92].mxu1 %vm592_vm2, %v10937_v18  ;;  %6821 = vmatmul.mubr.msk.f32.gmra.mrb[92].mxu0 %vm592_vm2, %v10937_v18 }
 0xa75   :  { %5299 = vmatprep.mubr.f32.mxu1 %v7295_v50  ;;  %5623 = vmatprep.mubr.f32.mxu0 %v7295_v50 }
 0xa78   :  { %6750 = vmatmul.mubr.msk.f32.gmra.mrb[94].mxu1 %vm592_vm2, %v10948_v19  ;;  %6822 = vmatmul.mubr.msk.f32.gmra.mrb[94].mxu0 %vm592_vm2, %v10948_v19 }
 0xa79   :  { %5305 = vmatprep.mubr.f32.mxu1 %v7295_v50  ;;  %5629 = vmatprep.mubr.f32.mxu0 %v7295_v50 }
 0xa7c   :  { %6751 = vmatmul.mubr.msk.f32.gmra.mrb[96].mxu1 %vm592_vm2, %v10959_v22  ;;  %6823 = vmatmul.mubr.msk.f32.gmra.mrb[96].mxu0 %vm592_vm2, %v10959_v22 }
 0xa7d   :  { %5311 = vmatprep.mubr.f32.mxu1 %v7295_v50  ;;  %5635 = vmatprep.mubr.f32.mxu0 %v7295_v50 }
 0xa80   :  { %6752 = vmatmul.mubr.msk.f32.gmra.mrb[98].mxu1 %vm592_vm2, %v10970_v37  ;;  %6824 = vmatmul.mubr.msk.f32.gmra.mrb[98].mxu0 %vm592_vm2, %v10970_v37 }
 0xa81   :  { %5317 = vmatprep.mubr.f32.mxu1 %v7295_v50  ;;  %5641 = vmatprep.mubr.f32.mxu0 %v7295_v50 }
 0xa84   :  { %6753 = vmatmul.mubr.msk.f32.gmra.mrb[100].mxu1 %vm592_vm2, %v10981_v39  ;;  %6825 = vmatmul.mubr.msk.f32.gmra.mrb[100].mxu0 %vm592_vm2, %v10981_v39 }
 0xa85   :  { %5323 = vmatprep.mubr.f32.mxu1 %v7295_v50  ;;  %5647 = vmatprep.mubr.f32.mxu0 %v7295_v50 }
 0xa88   :  { %6754 = vmatmul.mubr.msk.f32.gmra.mrb[102].mxu1 %vm592_vm2, %v10992_v29  ;;  %6826 = vmatmul.mubr.msk.f32.gmra.mrb[102].mxu0 %vm592_vm2, %v10992_v29 }
 0xa89   :  { %5329 = vmatprep.mubr.f32.mxu1 %v7295_v50  ;;  %5653 = vmatprep.mubr.f32.mxu0 %v7295_v50 }
 0xa8c   :  { %6755 = vmatmul.mubr.msk.f32.gmra.mrb[104].mxu1 %vm592_vm2, %v11003_v38  ;;  %6827 = vmatmul.mubr.msk.f32.gmra.mrb[104].mxu0 %vm592_vm2, %v11003_v38 }
 0xa8d   :  { %5335 = vmatprep.mubr.f32.mxu1 %v7295_v50  ;;  %5659 = vmatprep.mubr.f32.mxu0 %v7295_v50 }
 0xa90   :  { %6756 = vmatmul.mubr.msk.f32.gmra.mrb[106].mxu1 %vm592_vm2, %v11014_v6  ;;  %6828 = vmatmul.mubr.msk.f32.gmra.mrb[106].mxu0 %vm592_vm2, %v11014_v6 }
 0xa91   :  { %5341 = vmatprep.mubr.f32.mxu1 %v7295_v50  ;;  %5665 = vmatprep.mubr.f32.mxu0 %v7295_v50 }
 0xa94   :  { %6757 = vmatmul.mubr.msk.f32.gmra.mrb[108].mxu1 %vm592_vm2, %v11025_v11  ;;  %6829 = vmatmul.mubr.msk.f32.gmra.mrb[108].mxu0 %vm592_vm2, %v11025_v11 }
 0xa95   :  { %5347 = vmatprep.mubr.f32.mxu1 %v7295_v50  ;;  %5671 = vmatprep.mubr.f32.mxu0 %v7295_v50 }
 0xa98   :  { %6758 = vmatmul.mubr.msk.f32.gmra.mrb[110].mxu1 %vm592_vm2, %v11036_v55  ;;  %6830 = vmatmul.mubr.msk.f32.gmra.mrb[110].mxu0 %vm592_vm2, %v11036_v55 }
 0xa99   :  { %5353 = vmatprep.mubr.f32.mxu1 %v7295_v50  ;;  %5677 = vmatprep.mubr.f32.mxu0 %v7295_v50 }
 0xa9c   :  { %6759 = vmatmul.mubr.msk.f32.gmra.mrb[112].mxu1 %vm592_vm2, %v11047_v56  ;;  %6831 = vmatmul.mubr.msk.f32.gmra.mrb[112].mxu0 %vm592_vm2, %v11047_v56 }
 0xa9d   :  { %5359 = vmatprep.mubr.f32.mxu1 %v7295_v50  ;;  %5683 = vmatprep.mubr.f32.mxu0 %v7295_v50 }
 0xaa0   :  { %6760 = vmatmul.mubr.msk.f32.gmra.mrb[114].mxu1 %vm592_vm2, %v11058_v14  ;;  %6832 = vmatmul.mubr.msk.f32.gmra.mrb[114].mxu0 %vm592_vm2, %v11058_v14 }
 0xaa1   :  { %5365 = vmatprep.mubr.f32.mxu1 %v7295_v50  ;;  %5689 = vmatprep.mubr.f32.mxu0 %v7295_v50 }
 0xaa4   :  { %6761 = vmatmul.mubr.msk.f32.gmra.mrb[116].mxu1 %vm592_vm2, %v11069_v16  ;;  %6833 = vmatmul.mubr.msk.f32.gmra.mrb[116].mxu0 %vm592_vm2, %v11069_v16 }
 0xaa5   :  { %5371 = vmatprep.mubr.f32.mxu1 %v7295_v50  ;;  %5695 = vmatprep.mubr.f32.mxu0 %v7295_v50 }
 0xaa8   :  { %6762 = vmatmul.mubr.msk.f32.gmra.mrb[118].mxu1 %vm592_vm2, %v11080_v15  ;;  %6834 = vmatmul.mubr.msk.f32.gmra.mrb[118].mxu0 %vm592_vm2, %v11080_v15 }
 0xaa9   :  { %5377 = vmatprep.mubr.f32.mxu1 %v7295_v50  ;;  %5701 = vmatprep.mubr.f32.mxu0 %v7295_v50 }
 0xaac   :  { %6763 = vmatmul.mubr.msk.f32.gmra.mrb[120].mxu1 %vm592_vm2, %v11091_v17  ;;  %6835 = vmatmul.mubr.msk.f32.gmra.mrb[120].mxu0 %vm592_vm2, %v11091_v17 }
 0xaad   :  { %5383 = vmatprep.mubr.f32.mxu1 %v7295_v50  ;;  %5707 = vmatprep.mubr.f32.mxu0 %v7295_v50 }
 0xab0   :  { %6764 = vmatmul.mubr.msk.f32.gmra.mrb[122].mxu1 %vm592_vm2, %v11102_v20  ;;  %6836 = vmatmul.mubr.msk.f32.gmra.mrb[122].mxu0 %vm592_vm2, %v11102_v20 }
 0xab1   :  { %5389 = vmatprep.mubr.f32.mxu1 %v7295_v50  ;;  %5713 = vmatprep.mubr.f32.mxu0 %v7295_v50 }
 0xab4   :  { %6765 = vmatmul.mubr.msk.f32.gmra.mrb[124].mxu1 %vm592_vm2, %v11113_v26  ;;  %6837 = vmatmul.mubr.msk.f32.gmra.mrb[124].mxu0 %vm592_vm2, %v11113_v26 }
 0xab5   :  { %5395 = vmatprep.mubr.f32.mxu1 %v7295_v50  ;;  %5719 = vmatprep.mubr.f32.mxu0 %v7295_v50 }
 0xab8   :  { %6766 = vmatmul.mubr.msk.f32.gmra.mrb[126].mxu1 %vm592_vm2, %v11128_v0  ;;  %6838 = vmatmul.mubr.msk.f32.gmra.mrb[126].mxu0 %vm592_vm2, %v11128_v0 }
 0xb33   :  { %v5265_v44 = vpop.f32.mrb[82].mxu1  ;;  %v5589_v63 = vpop.f32.mrb[82].mxu0 }
 0xb34   :  { %6767 = vst [vmem:[%s11924_s4 + $0x1420] sm:$0xff] %v5265_v44  ;;  %6839 = vst [vmem:[%s11924_s4 + $0x1590] sm:$0xff] %v5589_v63  ;;  %v5267_v8 = vpop.f32.mrb[83].mxu1  ;;  %v5591_v12 = vpop.f32.mrb[83].mxu0 }
 0xb35   :  { %6768 = vst.msk [vmem:[%s11924_s4 + $0x1428] sm:$0xff] %vm866_vm3, %v5267_v8  ;;  %6840 = vst.msk [vmem:[%s11924_s4 + $0x1598] sm:$0xff] %vm866_vm3, %v5591_v12 }
 0xb37   :  { %v5271_v50 = vpop.f32.mrb[84].mxu1  ;;  %v5595_v13 = vpop.f32.mrb[84].mxu0 }
 0xb38   :  { %6769 = vst [vmem:[%s11924_s4 + $0x1430] sm:$0xff] %v5271_v50  ;;  %6841 = vst [vmem:[%s11924_s4 + $0x15a0] sm:$0xff] %v5595_v13  ;;  %v5273_v18 = vpop.f32.mrb[85].mxu1  ;;  %v5597_v19 = vpop.f32.mrb[85].mxu0 }
 0xb39   :  { %6770 = vst.msk [vmem:[%s11924_s4 + $0x1438] sm:$0xff] %vm866_vm3, %v5273_v18  ;;  %6842 = vst.msk [vmem:[%s11924_s4 + $0x15a8] sm:$0xff] %vm866_vm3, %v5597_v19 }
 0xb3b   :  { %v5277_v22 = vpop.f32.mrb[86].mxu1  ;;  %v5601_v37 = vpop.f32.mrb[86].mxu0 }
 0xb3c   :  { %6771 = vst [vmem:[%s11924_s4 + $0x1440] sm:$0xff] %v5277_v22  ;;  %6843 = vst [vmem:[%s11924_s4 + $0x15b0] sm:$0xff] %v5601_v37  ;;  %v5279_v39 = vpop.f32.mrb[87].mxu1  ;;  %v5603_v29 = vpop.f32.mrb[87].mxu0 }
 0xb3d   :  { %6772 = vst.msk [vmem:[%s11924_s4 + $0x1448] sm:$0xff] %vm866_vm3, %v5279_v39  ;;  %6844 = vst.msk [vmem:[%s11924_s4 + $0x15b8] sm:$0xff] %vm866_vm3, %v5603_v29 }
 0xb3f   :  { %v5283_v38 = vpop.f32.mrb[88].mxu1  ;;  %v5607_v6 = vpop.f32.mrb[88].mxu0 }
 0xb40   :  { %6773 = vst [vmem:[%s11924_s4 + $0x1450] sm:$0xff] %v5283_v38  ;;  %6845 = vst [vmem:[%s11924_s4 + $0x15c0] sm:$0xff] %v5607_v6  ;;  %v5285_v11 = vpop.f32.mrb[89].mxu1  ;;  %v5609_v55 = vpop.f32.mrb[89].mxu0 }
 0xb41   :  { %6774 = vst.msk [vmem:[%s11924_s4 + $0x1458] sm:$0xff] %vm866_vm3, %v5285_v11  ;;  %6846 = vst.msk [vmem:[%s11924_s4 + $0x15c8] sm:$0xff] %vm866_vm3, %v5609_v55 }
 0xb43   :  { %v5289_v56 = vpop.f32.mrb[90].mxu1  ;;  %v5613_v14 = vpop.f32.mrb[90].mxu0 }
 0xb44   :  { %6775 = vst [vmem:[%s11924_s4 + $0x1460] sm:$0xff] %v5289_v56  ;;  %6847 = vst [vmem:[%s11924_s4 + $0x15d0] sm:$0xff] %v5613_v14  ;;  %v5291_v16 = vpop.f32.mrb[91].mxu1  ;;  %v5615_v15 = vpop.f32.mrb[91].mxu0 }
 0xb45   :  { %6776 = vst.msk [vmem:[%s11924_s4 + $0x1468] sm:$0xff] %vm866_vm3, %v5291_v16  ;;  %6848 = vst.msk [vmem:[%s11924_s4 + $0x15d8] sm:$0xff] %vm866_vm3, %v5615_v15 }
 0xb47   :  { %v5295_v17 = vpop.f32.mrb[92].mxu1  ;;  %v5619_v20 = vpop.f32.mrb[92].mxu0 }
 0xb48   :  { %6777 = vst [vmem:[%s11924_s4 + $0x1470] sm:$0xff] %v5295_v17  ;;  %6849 = vst [vmem:[%s11924_s4 + $0x15e0] sm:$0xff] %v5619_v20  ;;  %v5297_v26 = vpop.f32.mrb[93].mxu1  ;;  %v5621_v0 = vpop.f32.mrb[93].mxu0 }
 0xb49   :  { %6778 = vst.msk [vmem:[%s11924_s4 + $0x1478] sm:$0xff] %vm866_vm3, %v5297_v26  ;;  %6850 = vst.msk [vmem:[%s11924_s4 + $0x15e8] sm:$0xff] %vm866_vm3, %v5621_v0 }
 0xb4b   :  { %v5301_v60 = vpop.f32.mrb[94].mxu1  ;;  %v5625_v61 = vpop.f32.mrb[94].mxu0 }
 0xb4c   :  { %6779 = vst [vmem:[%s11924_s4 + $0x1480] sm:$0xff] %v5301_v60  ;;  %6851 = vst [vmem:[%s11924_s4 + $0x15f0] sm:$0xff] %v5625_v61  ;;  %v5303_v49 = vpop.f32.mrb[95].mxu1  ;;  %v5627_v2 = vpop.f32.mrb[95].mxu0 }
 0xb4d   :  { %6780 = vst.msk [vmem:[%s11924_s4 + $0x1488] sm:$0xff] %vm866_vm3, %v5303_v49  ;;  %6852 = vst.msk [vmem:[%s11924_s4 + $0x15f8] sm:$0xff] %vm866_vm3, %v5627_v2 }
 0xb4f   :  { %v5307_v59 = vpop.f32.mrb[96].mxu1  ;;  %v5631_v24 = vpop.f32.mrb[96].mxu0 }
 0xb50   :  { %6781 = vst [vmem:[%s11924_s4 + $0x1490] sm:$0xff] %v5307_v59  ;;  %6853 = vst [vmem:[%s11924_s4 + $0x1600] sm:$0xff] %v5631_v24  ;;  %v5309_v35 = vpop.f32.mrb[97].mxu1  ;;  %v5633_v36 = vpop.f32.mrb[97].mxu0 }
 0xb51   :  { %6782 = vst.msk [vmem:[%s11924_s4 + $0x1498] sm:$0xff] %vm866_vm3, %v5309_v35  ;;  %6854 = vst.msk [vmem:[%s11924_s4 + $0x1608] sm:$0xff] %vm866_vm3, %v5633_v36 }
 0xb53   :  { %v5313_v41 = vpop.f32.mrb[98].mxu1  ;;  %v5637_v42 = vpop.f32.mrb[98].mxu0 }
 0xb54   :  { %6783 = vst [vmem:[%s11924_s4 + $0x14a0] sm:$0xff] %v5313_v41  ;;  %6855 = vst [vmem:[%s11924_s4 + $0x1610] sm:$0xff] %v5637_v42  ;;  %v5315_v43 = vpop.f32.mrb[99].mxu1  ;;  %v5639_v3 = vpop.f32.mrb[99].mxu0 }
 0xb55   :  { %6784 = vst.msk [vmem:[%s11924_s4 + $0x14a8] sm:$0xff] %vm866_vm3, %v5315_v43  ;;  %6856 = vst.msk [vmem:[%s11924_s4 + $0x1618] sm:$0xff] %vm866_vm3, %v5639_v3 }
 0xb57   :  { %v5319_v28 = vpop.f32.mrb[100].mxu1  ;;  %v5643_v30 = vpop.f32.mrb[100].mxu0 }
 0xb58   :  { %6785 = vst [vmem:[%s11924_s4 + $0x14b0] sm:$0xff] %v5319_v28  ;;  %6857 = vst [vmem:[%s11924_s4 + $0x1620] sm:$0xff] %v5643_v30  ;;  %v5321_v21 = vpop.f32.mrb[101].mxu1  ;;  %v5645_v23 = vpop.f32.mrb[101].mxu0 }
 0xb59   :  { %6786 = vst.msk [vmem:[%s11924_s4 + $0x14b8] sm:$0xff] %vm866_vm3, %v5321_v21  ;;  %6858 = vst.msk [vmem:[%s11924_s4 + $0x1628] sm:$0xff] %vm866_vm3, %v5645_v23 }
 0xb5b   :  { %v5325_v7 = vpop.f32.mrb[102].mxu1  ;;  %v5649_v1 = vpop.f32.mrb[102].mxu0 }
 0xb5c   :  { %6787 = vst [vmem:[%s11924_s4 + $0x14c0] sm:$0xff] %v5325_v7  ;;  %6859 = vst [vmem:[%s11924_s4 + $0x1630] sm:$0xff] %v5649_v1  ;;  %v5327_v9 = vpop.f32.mrb[103].mxu1  ;;  %v5651_v25 = vpop.f32.mrb[103].mxu0 }
 0xb5d   :  { %6788 = vst.msk [vmem:[%s11924_s4 + $0x14c8] sm:$0xff] %vm866_vm3, %v5327_v9  ;;  %6860 = vst.msk [vmem:[%s11924_s4 + $0x1638] sm:$0xff] %vm866_vm3, %v5651_v25 }
 0xb5f   :  { %v5331_v54 = vpop.f32.mrb[104].mxu1  ;;  %v5655_v62 = vpop.f32.mrb[104].mxu0 }
 0xb60   :  { %6789 = vst [vmem:[%s11924_s4 + $0x14d0] sm:$0xff] %v5331_v54  ;;  %6861 = vst [vmem:[%s11924_s4 + $0x1640] sm:$0xff] %v5655_v62  ;;  %v5333_v57 = vpop.f32.mrb[105].mxu1  ;;  %v5657_v40 = vpop.f32.mrb[105].mxu0 }
 0xb61   :  { %6790 = vst.msk [vmem:[%s11924_s4 + $0x14d8] sm:$0xff] %vm866_vm3, %v5333_v57  ;;  %6862 = vst.msk [vmem:[%s11924_s4 + $0x1648] sm:$0xff] %vm866_vm3, %v5657_v40 }
 0xb63   :  { %v5337_v27 = vpop.f32.mrb[106].mxu1  ;;  %v5661_v45 = vpop.f32.mrb[106].mxu0 }
 0xb64   :  { %6791 = vst [vmem:[%s11924_s4 + $0x14e0] sm:$0xff] %v5337_v27  ;;  %6863 = vst [vmem:[%s11924_s4 + $0x1650] sm:$0xff] %v5661_v45  ;;  %v5339_v46 = vpop.f32.mrb[107].mxu1  ;;  %v5663_v4 = vpop.f32.mrb[107].mxu0 }
 0xb65   :  { %6792 = vst.msk [vmem:[%s11924_s4 + $0x14e8] sm:$0xff] %vm866_vm3, %v5339_v46  ;;  %6864 = vst.msk [vmem:[%s11924_s4 + $0x1658] sm:$0xff] %vm866_vm3, %v5663_v4 }
 0xb67   :  { %v5343_v5 = vpop.f32.mrb[108].mxu1  ;;  %v5667_v33 = vpop.f32.mrb[108].mxu0 }
 0xb68   :  { %6793 = vst [vmem:[%s11924_s4 + $0x14f0] sm:$0xff] %v5343_v5  ;;  %6865 = vst [vmem:[%s11924_s4 + $0x1660] sm:$0xff] %v5667_v33  ;;  %v5345_v34 = vpop.f32.mrb[109].mxu1  ;;  %v5669_v52 = vpop.f32.mrb[109].mxu0 }
 0xb69   :  { %6794 = vst.msk [vmem:[%s11924_s4 + $0x14f8] sm:$0xff] %vm866_vm3, %v5345_v34  ;;  %6866 = vst.msk [vmem:[%s11924_s4 + $0x1668] sm:$0xff] %vm866_vm3, %v5669_v52 }
 0xb6b   :  { %v5349_v53 = vpop.f32.mrb[110].mxu1  ;;  %v5673_v31 = vpop.f32.mrb[110].mxu0 }
 0xb6c   :  { %6795 = vst [vmem:[%s11924_s4 + $0x1500] sm:$0xff] %v5349_v53  ;;  %6867 = vst [vmem:[%s11924_s4 + $0x1670] sm:$0xff] %v5673_v31  ;;  %v5351_v32 = vpop.f32.mrb[111].mxu1  ;;  %v5675_v10 = vpop.f32.mrb[111].mxu0 }
 0xb6d   :  { %6796 = vst.msk [vmem:[%s11924_s4 + $0x1508] sm:$0xff] %vm866_vm3, %v5351_v32  ;;  %6868 = vst.msk [vmem:[%s11924_s4 + $0x1678] sm:$0xff] %vm866_vm3, %v5675_v10 }
 0xb6f   :  { %v5355_v47 = vpop.f32.mrb[112].mxu1  ;;  %v5679_v51 = vpop.f32.mrb[112].mxu0 }
 0xb70   :  { %6797 = vst [vmem:[%s11924_s4 + $0x1510] sm:$0xff] %v5355_v47  ;;  %6869 = vst [vmem:[%s11924_s4 + $0x1680] sm:$0xff] %v5679_v51  ;;  %v5357_v58 = vpop.f32.mrb[113].mxu1  ;;  %v5681_v48 = vpop.f32.mrb[113].mxu0 }
 0xb71   :  { %6798 = vst.msk [vmem:[%s11924_s4 + $0x1518] sm:$0xff] %vm866_vm3, %v5357_v58  ;;  %6870 = vst.msk [vmem:[%s11924_s4 + $0x1688] sm:$0xff] %vm866_vm3, %v5681_v48 }
 0xb73   :  { %v5361_v44 = vpop.f32.mrb[114].mxu1  ;;  %v5685_v63 = vpop.f32.mrb[114].mxu0 }
 0xb74   :  { %6799 = vst [vmem:[%s11924_s4 + $0x1520] sm:$0xff] %v5361_v44  ;;  %6871 = vst [vmem:[%s11924_s4 + $0x1690] sm:$0xff] %v5685_v63  ;;  %v5363_v8 = vpop.f32.mrb[115].mxu1  ;;  %v5687_v12 = vpop.f32.mrb[115].mxu0 }
 0xb75   :  { %6800 = vst.msk [vmem:[%s11924_s4 + $0x1528] sm:$0xff] %vm866_vm3, %v5363_v8  ;;  %6872 = vst.msk [vmem:[%s11924_s4 + $0x1698] sm:$0xff] %vm866_vm3, %v5687_v12 }
 0xb77   :  { %v5367_v50 = vpop.f32.mrb[116].mxu1  ;;  %v5691_v13 = vpop.f32.mrb[116].mxu0 }
 0xb78   :  { %6801 = vst [vmem:[%s11924_s4 + $0x1530] sm:$0xff] %v5367_v50  ;;  %6873 = vst [vmem:[%s11924_s4 + $0x16a0] sm:$0xff] %v5691_v13  ;;  %v5369_v18 = vpop.f32.mrb[117].mxu1  ;;  %v5693_v19 = vpop.f32.mrb[117].mxu0 }
 0xb79   :  { %6802 = vst.msk [vmem:[%s11924_s4 + $0x1538] sm:$0xff] %vm866_vm3, %v5369_v18  ;;  %6874 = vst.msk [vmem:[%s11924_s4 + $0x16a8] sm:$0xff] %vm866_vm3, %v5693_v19 }
 0xb7b   :  { %v5373_v22 = vpop.f32.mrb[118].mxu1  ;;  %v5697_v37 = vpop.f32.mrb[118].mxu0 }
 0xb7c   :  { %6803 = vst [vmem:[%s11924_s4 + $0x1540] sm:$0xff] %v5373_v22  ;;  %6875 = vst [vmem:[%s11924_s4 + $0x16b0] sm:$0xff] %v5697_v37  ;;  %v5375_v39 = vpop.f32.mrb[119].mxu1  ;;  %v5699_v29 = vpop.f32.mrb[119].mxu0 }
 0xb7d   :  { %6804 = vst.msk [vmem:[%s11924_s4 + $0x1548] sm:$0xff] %vm866_vm3, %v5375_v39  ;;  %6876 = vst.msk [vmem:[%s11924_s4 + $0x16b8] sm:$0xff] %vm866_vm3, %v5699_v29 }
 0xb7f   :  { %v5379_v38 = vpop.f32.mrb[120].mxu1  ;;  %v5703_v6 = vpop.f32.mrb[120].mxu0 }
 0xb80   :  { %6805 = vst [vmem:[%s11924_s4 + $0x1550] sm:$0xff] %v5379_v38  ;;  %6877 = vst [vmem:[%s11924_s4 + $0x16c0] sm:$0xff] %v5703_v6  ;;  %v5381_v11 = vpop.f32.mrb[121].mxu1  ;;  %v5705_v55 = vpop.f32.mrb[121].mxu0 }
 0xb81   :  { %6806 = vst.msk [vmem:[%s11924_s4 + $0x1558] sm:$0xff] %vm866_vm3, %v5381_v11  ;;  %6878 = vst.msk [vmem:[%s11924_s4 + $0x16c8] sm:$0xff] %vm866_vm3, %v5705_v55 }
 0xb83   :  { %v5385_v56 = vpop.f32.mrb[122].mxu1  ;;  %v5709_v14 = vpop.f32.mrb[122].mxu0 }
 0xb84   :  { %6807 = vst [vmem:[%s11924_s4 + $0x1560] sm:$0xff] %v5385_v56  ;;  %6879 = vst [vmem:[%s11924_s4 + $0x16d0] sm:$0xff] %v5709_v14  ;;  %v5387_v16 = vpop.f32.mrb[123].mxu1  ;;  %v5711_v15 = vpop.f32.mrb[123].mxu0 }
 0xb85   :  { %6808 = vst.msk [vmem:[%s11924_s4 + $0x1568] sm:$0xff] %vm866_vm3, %v5387_v16  ;;  %6880 = vst.msk [vmem:[%s11924_s4 + $0x16d8] sm:$0xff] %vm866_vm3, %v5711_v15 }
 0xb87   :  { %v5391_v17 = vpop.f32.mrb[124].mxu1  ;;  %v5715_v20 = vpop.f32.mrb[124].mxu0 }
 0xb88   :  { %6809 = vst [vmem:[%s11924_s4 + $0x1570] sm:$0xff] %v5391_v17  ;;  %6881 = vst [vmem:[%s11924_s4 + $0x16e0] sm:$0xff] %v5715_v20  ;;  %v5393_v26 = vpop.f32.mrb[125].mxu1  ;;  %v5717_v0 = vpop.f32.mrb[125].mxu0 }
 0xb89   :  { %6810 = vst.msk [vmem:[%s11924_s4 + $0x1578] sm:$0xff] %vm866_vm3, %v5393_v26  ;;  %6882 = vst.msk [vmem:[%s11924_s4 + $0x16e8] sm:$0xff] %vm866_vm3, %v5717_v0 }
 0xb8b   :  { %v5397_v60 = vpop.f32.mrb[126].mxu1  ;;  %v5721_v61 = vpop.f32.mrb[126].mxu0 }
 0xb8c   :  { %6811 = vst [vmem:[%s11924_s4 + $0x1580] sm:$0x3] %v5397_v60  ;;  %6883 = vst [vmem:[%s11924_s4 + $0x16f0] sm:$0x3] %v5721_v61  ;;  %v5399_v49 = vpop.f32.mrb[127].mxu1  ;;  %v5723_v2 = vpop.f32.mrb[127].mxu0 }
 0xb8d   :  { %6812 = vst.msk [vmem:[%s11924_s4 + $0x1588] sm:$0x3] %vm911_vm4, %v5399_v49  ;;  %6884 = vst.msk [vmem:[%s11924_s4 + $0x16f8] sm:$0x3] %vm911_vm4, %v5723_v2 }
 0xb8e   :  { %5777 = vsyncpa [#allocation3], 1 }
 0xb8f   :  { %5778 = vsyncpa [#allocation5], 1 }

</bundles_post_ra>
